<compile_context>
chip_gen: v7x
topology: tpu7x:2x2x1
jax: 0.10.0
libtpu: 0.0.40
codegen_flags: <defaults>
</compile_context>

<pallas_src>
import jax
import jax.numpy as jnp
import numpy as np
from jax.experimental import pallas as pl
from jax.experimental.pallas import tpu as pltpu

EPS = 1e-5          # nn.BatchNorm1d default eps
IN_DIM = 784
K_PAD = 896         # 7 * 128 : lane-aligned contraction dim for fc1
HID = 1024
OUT_DIM = 10
LANE = 128          # pad final N to one full lane group


def _round_up(x, m):
    return (x + m - 1) // m * m


# ----------------------------- Pallas kernel ------------------------------- #

def mlp_fused_kernel(x_ref, w1_ref, b1_ref, w2_ref, b2_ref, w3_ref, b3_ref,
                     o_ref):
    # fc1 + bias + ReLU           (BN1 already folded into fc2)
    x = x_ref[...].astype(jnp.bfloat16)
    h = jnp.dot(x, w1_ref[...], preferred_element_type=jnp.float32)
    h = jnp.maximum(h + b1_ref[...], 0.0)
    # fc2 (BN1-folded) + bias + ReLU   (BN2 already folded into fc3)
    h = jnp.dot(h.astype(jnp.bfloat16), w2_ref[...],
                preferred_element_type=jnp.float32)
    h = jnp.maximum(h + b2_ref[...], 0.0)
    # fc3 (BN2-folded) + bias, lane-padded to 128 output columns
    o = jnp.dot(h.astype(jnp.bfloat16), w3_ref[...],
                preferred_element_type=jnp.float32)
    o_ref[...] = (o + b3_ref[...]).astype(o_ref.dtype)


# ----------------------------- JAX wrapper --------------------------------- #

def mnistfc_forward(x, fp):
    """x: [B, 1, 28, 28] (or [B, 784]); fp: folded params from fold_params()."""
    B = x.shape[0]
    x2 = x.reshape(B, IN_DIM).astype(jnp.float32)      # View(784)

    # Batch tile: up to 256 rows per grid step; tiny batches padded to a
    # sublane multiple (8) so the block shape stays (8,128)-aligned.
    TB = min(256, _round_up(B, 8))
    B_pad = _round_up(B, TB)
    x_pad = jnp.zeros((B_pad, K_PAD), jnp.float32).at[:B, :IN_DIM].set(x2)

    grid = (B_pad // TB,)

    weight_bytes = (fp['w1'].size + fp['w2'].size + fp['w3'].size) * 2   # bf16
    cost = pl.CostEstimate(
        flops=2 * B_pad * (K_PAD * HID + HID * HID + HID * LANE),
        transcendentals=0,
        bytes_accessed=x_pad.size * 4 + weight_bytes + B_pad * LANE * 4)

    const = lambda i: (0, 0)          # weights/biases: same block every step
    out_pad = pl.pallas_call(
        mlp_fused_kernel,
        grid=grid,
        in_specs=[pl.BlockSpec((TB, K_PAD), lambda i: (i, 0)),   # x tile
                  pl.BlockSpec((K_PAD, HID), const),             # w1 (bf16)
                  pl.BlockSpec((1, HID), const),                 # b1 (f32)
                  pl.BlockSpec((HID, HID), const),               # w2 (bf16)
                  pl.BlockSpec((1, HID), const),                 # b2 (f32)
                  pl.BlockSpec((HID, LANE), const),              # w3 (bf16)
                  pl.BlockSpec((1, LANE), const)],               # b3 (f32)
        out_specs=pl.BlockSpec((TB, LANE), lambda i: (i, 0)),
        out_shape=jax.ShapeDtypeStruct((B_pad, LANE), jnp.float32),
        compiler_params=pltpu.CompilerParams(
            dimension_semantics=("parallel",)),
        cost_estimate=cost,
    )(x_pad, fp['w1'], fp['b1'], fp['w2'], fp['b2'], fp['w3'], fp['b3'])
    return out_pad[:B, :OUT_DIM]


# ------------------ host-side BN folding / weight prep --------------------- #

def fold_params(p):
    """Pre-transpose Linear weights, fold eval-mode BatchNorm1d affines into
    the following Linear layer (exact algebra), pad K and N to lane multiples,
    and store weights in bf16 (biases kept in f32)."""
    s1 = p['g1'] / jnp.sqrt(p['rv1'] + EPS)          # BN1 scale
    t1 = p['be1'] - p['rm1'] * s1                    # BN1 shift
    s2 = p['g2'] / jnp.sqrt(p['rv2'] + EPS)          # BN2 scale
    t2 = p['be2'] - p['rm2'] * s2                    # BN2 shift

    # fc1: [784,1024], zero-padded K: 784 -> 896 (matching zero-padded x cols).
    w1 = jnp.zeros((K_PAD, HID), jnp.float32).at[:IN_DIM, :].set(p['fc1_w'].T)
    b1 = p['fc1_b'].reshape(1, HID)

    # (h*s1 + t1) @ W2^T + b2  ==  h @ (s1[:,None]*W2^T) + (t1 @ W2^T + b2)
    w2 = s1[:, None] * p['fc2_w'].T                  # [1024, 1024]
    b2 = (p['fc2_b'] + t1 @ p['fc2_w'].T).reshape(1, HID)

    # (h*s2 + t2) @ W3^T + b3  ==  h @ (s2[:,None]*W3^T) + (t2 @ W3^T + b3)
    w3_raw = s2[:, None] * p['fc3_w'].T              # [1024, 10]
    b3_raw = p['fc3_b'] + t2 @ p['fc3_w'].T          # [10]

    # Zero-pad N: 10 -> 128 for a lane-dense, unmasked store path.
    w3 = jnp.zeros((HID, LANE), jnp.float32).at[:, :OUT_DIM].set(w3_raw)
    b3 = jnp.zeros((1, LANE), jnp.float32).at[0, :OUT_DIM].set(b3_raw)

    return {'w1': w1.astype(jnp.bfloat16), 'b1': b1.astype(jnp.float32),
            'w2': w2.astype(jnp.bfloat16), 'b2': b2.astype(jnp.float32),
            'w3': w3.astype(jnp.bfloat16), 'b3': b3.astype(jnp.float32)}


# ------------------------ deterministic parameters ------------------------- #

def init_params(key):
    ks = jax.random.split(key, 16)

    def u(k, shape, s=0.1):
        return jax.random.uniform(k, shape, jnp.float32, -s, s)

    return {
        'fc1_w': u(ks[0], (HID, IN_DIM)),  'fc1_b': u(ks[1], (HID,)),
        'g1': 1.0 + u(ks[2], (HID,)),      'be1': u(ks[3], (HID,)),
        'rm1': u(ks[4], (HID,)),           'rv1': 1.0 + u(ks[5], (HID,)),
        'fc2_w': u(ks[6], (HID, HID)),     'fc2_b': u(ks[7], (HID,)),
        'g2': 1.0 + u(ks[8], (HID,)),      'be2': u(ks[9], (HID,)),
        'rm2': u(ks[10], (HID,)),          'rv2': 1.0 + u(ks[11], (HID,)),
        'fc3_w': u(ks[12], (OUT_DIM, HID)), 'fc3_b': u(ks[13], (OUT_DIM,)),
    }


# ------------------------ pure-JAX reference check ------------------------- #

def reference_forward(x, p):
    B = x.shape[0]
    h = x.reshape(B, IN_DIM)
    # Dropout(0.2): identity in eval mode.
    h = jnp.maximum(h @ p['fc1_w'].T + p['fc1_b'], 0.0)
    h = (h - p['rm1']) / jnp.sqrt(p['rv1'] + EPS) * p['g1'] + p['be1']
    h = jnp.maximum(h @ p['fc2_w'].T + p['fc2_b'], 0.0)
    h = (h - p['rm2']) / jnp.sqrt(p['rv2'] + EPS) * p['g2'] + p['be2']
    return h @ p['fc3_w'].T + p['fc3_b']


# ---------------------------------- main ------------------------------------ #

if __name__ == "__main__":
    key = jax.random.PRNGKey(0)
    kx, kp = jax.random.split(key)
    # MNIST-style input implied by View(784): 28x28, 1 channel; batch=2.
    x = jax.random.normal(kx, (2, 1, 28, 28), jnp.float32)
    params = init_params(kp)
    folded = jax.tree_util.tree_map(jax.block_until_ready, fold_params(params))

    out = jax.jit(mnistfc_forward)(x, folded)
    out = jax.block_until_ready(out)
    assert out.shape == (2, OUT_DIM)

    # bf16 weights => looser tolerance vs. the f32 reference (per review).
    ref = reference_forward(x, params)
    np.testing.assert_allclose(np.asarray(out), np.asarray(ref),
                               rtol=2e-2, atol=5e-2)

    print("KERNEL_OK")
</pallas_src>

<mosaic_0001>
module attributes {stable_mosaic.version = 11 : i64} {
  func.func @mlp_fused_kernel(%arg0: i32, %arg1: memref<8x896xf32, #tpu.memory_space<vmem>>, %arg2: memref<896x1024xbf16, #tpu.memory_space<vmem>>, %arg3: memref<1x1024xf32, #tpu.memory_space<vmem>>, %arg4: memref<1024x1024xbf16, #tpu.memory_space<vmem>>, %arg5: memref<1x1024xf32, #tpu.memory_space<vmem>>, %arg6: memref<1024x128xbf16, #tpu.memory_space<vmem>>, %arg7: memref<1x128xf32, #tpu.memory_space<vmem>>, %arg8: memref<8x128xf32, #tpu.memory_space<vmem>>) attributes {dimension_semantics = [#tpu.dimension_semantics<parallel>], iteration_bounds = array<i64: 1>, scalar_prefetch = 0 : i64, scratch_operands = 0 : i64, tpu.core_type = #tpu.core_type<tc>, window_params = [{transform_indices = @transform_0, window_bounds = array<i64: 8, 896>}, {pipeline_mode = #tpu.pipeline_mode<synchronous>, transform_indices = @transform_1, window_bounds = array<i64: 896, 1024>}, {pipeline_mode = #tpu.pipeline_mode<synchronous>, transform_indices = @transform_2, window_bounds = array<i64: 1, 1024>}, {pipeline_mode = #tpu.pipeline_mode<synchronous>, transform_indices = @transform_3, window_bounds = array<i64: 1024, 1024>}, {pipeline_mode = #tpu.pipeline_mode<synchronous>, transform_indices = @transform_4, window_bounds = array<i64: 1, 1024>}, {pipeline_mode = #tpu.pipeline_mode<synchronous>, transform_indices = @transform_5, window_bounds = array<i64: 1024, 128>}, {pipeline_mode = #tpu.pipeline_mode<synchronous>, transform_indices = @transform_6, window_bounds = array<i64: 1, 128>}, {transform_indices = @transform_7, window_bounds = array<i64: 8, 128>}]} {
    %c0 = arith.constant 0 : index
    %c0_0 = arith.constant 0 : index
    %0 = vector.load %arg1[%c0, %c0_0] : memref<8x896xf32, #tpu.memory_space<vmem>>, vector<8x896xf32>
    %1 = arith.truncf %0 : vector<8x896xf32> to vector<8x896xbf16>
    %c0_1 = arith.constant 0 : index
    %c0_2 = arith.constant 0 : index
    %2 = vector.load %arg2[%c0_1, %c0_2] : memref<896x1024xbf16, #tpu.memory_space<vmem>>, vector<896x1024xbf16>
    %cst = arith.constant dense<0.000000e+00> : vector<8x1024xf32>
    %3 = tpu.matmul %1, %2, %cst {dimension_numbers = #tpu.dot_dimension_numbers<[1], [0], [0], [1], [0, 0, 1, 1], [], []>} : vector<8x896xbf16>, vector<896x1024xbf16>, vector<8x1024xf32> -> vector<8x1024xf32>
    %c0_3 = arith.constant 0 : index
    %c0_4 = arith.constant 0 : index
    %4 = vector.load %arg3[%c0_3, %c0_4] : memref<1x1024xf32, #tpu.memory_space<vmem>>, vector<1x1024xf32>
    %5 = vector.broadcast %4 : vector<1x1024xf32> to vector<8x1024xf32>
    %6 = arith.addf %3, %5 : vector<8x1024xf32>
    %cst_5 = arith.constant 0.000000e+00 : f32
    %7 = vector.broadcast %cst_5 : f32 to vector<8x1024xf32>
    %8 = arith.maximumf %6, %7 : vector<8x1024xf32>
    %9 = arith.truncf %8 : vector<8x1024xf32> to vector<8x1024xbf16>
    %c0_6 = arith.constant 0 : index
    %c0_7 = arith.constant 0 : index
    %10 = vector.load %arg4[%c0_6, %c0_7] : memref<1024x1024xbf16, #tpu.memory_space<vmem>>, vector<1024x1024xbf16>
    %cst_8 = arith.constant dense<0.000000e+00> : vector<8x1024xf32>
    %11 = tpu.matmul %9, %10, %cst_8 {dimension_numbers = #tpu.dot_dimension_numbers<[1], [0], [0], [1], [0, 0, 1, 1], [], []>} : vector<8x1024xbf16>, vector<1024x1024xbf16>, vector<8x1024xf32> -> vector<8x1024xf32>
    %c0_9 = arith.constant 0 : index
    %c0_10 = arith.constant 0 : index
    %12 = vector.load %arg5[%c0_9, %c0_10] : memref<1x1024xf32, #tpu.memory_space<vmem>>, vector<1x1024xf32>
    %13 = vector.broadcast %12 : vector<1x1024xf32> to vector<8x1024xf32>
    %14 = arith.addf %11, %13 : vector<8x1024xf32>
    %cst_11 = arith.constant 0.000000e+00 : f32
    %15 = vector.broadcast %cst_11 : f32 to vector<8x1024xf32>
    %16 = arith.maximumf %14, %15 : vector<8x1024xf32>
    %17 = arith.truncf %16 : vector<8x1024xf32> to vector<8x1024xbf16>
    %c0_12 = arith.constant 0 : index
    %c0_13 = arith.constant 0 : index
    %18 = vector.load %arg6[%c0_12, %c0_13] : memref<1024x128xbf16, #tpu.memory_space<vmem>>, vector<1024x128xbf16>
    %cst_14 = arith.constant dense<0.000000e+00> : vector<8x128xf32>
    %19 = tpu.matmul %17, %18, %cst_14 {dimension_numbers = #tpu.dot_dimension_numbers<[1], [0], [0], [1], [0, 0, 1, 1], [], []>} : vector<8x1024xbf16>, vector<1024x128xbf16>, vector<8x128xf32> -> vector<8x128xf32>
    %c0_15 = arith.constant 0 : index
    %c0_16 = arith.constant 0 : index
    %20 = vector.load %arg7[%c0_15, %c0_16] : memref<1x128xf32, #tpu.memory_space<vmem>>, vector<1x128xf32>
    %21 = vector.broadcast %20 : vector<1x128xf32> to vector<8x128xf32>
    %22 = arith.addf %19, %21 : vector<8x128xf32>
    %c0_17 = arith.constant 0 : index
    %c0_18 = arith.constant 0 : index
    %23 = vector.load %arg8[%c0_17, %c0_18] : memref<8x128xf32, #tpu.memory_space<vmem>>, vector<8x128xf32>
    tpu.vector_store %arg8[%c0_17, %c0_18], %22 {strides = array<i32>} : memref<8x128xf32, #tpu.memory_space<vmem>>, vector<8x128xf32>,
    return
  }
  func.func @transform_0(%arg0: i32) -> (i32, i32) {
    %c0_i32 = arith.constant 0 : i32
    %c0_i32_0 = arith.constant 0 : i32
    return %arg0, %c0_i32 : i32, i32
  }
  func.func @transform_1(%arg0: i32) -> (i32, i32) {
    %c0_i32 = arith.constant 0 : i32
    %c0_i32_0 = arith.constant 0 : i32
    %c0_i32_1 = arith.constant 0 : i32
    return %c0_i32, %c0_i32_0 : i32, i32
  }
  func.func @transform_2(%arg0: i32) -> (i32, i32) {
    %c0_i32 = arith.constant 0 : i32
    %c0_i32_0 = arith.constant 0 : i32
    %c0_i32_1 = arith.constant 0 : i32
    return %c0_i32, %c0_i32_0 : i32, i32
  }
  func.func @transform_3(%arg0: i32) -> (i32, i32) {
    %c0_i32 = arith.constant 0 : i32
    %c0_i32_0 = arith.constant 0 : i32
    %c0_i32_1 = arith.constant 0 : i32
    return %c0_i32, %c0_i32_0 : i32, i32
  }
  func.func @transform_4(%arg0: i32) -> (i32, i32) {
    %c0_i32 = arith.constant 0 : i32
    %c0_i32_0 = arith.constant 0 : i32
    %c0_i32_1 = arith.constant 0 : i32
    return %c0_i32, %c0_i32_0 : i32, i32
  }
  func.func @transform_5(%arg0: i32) -> (i32, i32) {
    %c0_i32 = arith.constant 0 : i32
    %c0_i32_0 = arith.constant 0 : i32
    %c0_i32_1 = arith.constant 0 : i32
    return %c0_i32, %c0_i32_0 : i32, i32
  }
  func.func @transform_6(%arg0: i32) -> (i32, i32) {
    %c0_i32 = arith.constant 0 : i32
    %c0_i32_0 = arith.constant 0 : i32
    %c0_i32_1 = arith.constant 0 : i32
    return %c0_i32, %c0_i32_0 : i32, i32
  }
  func.func @transform_7(%arg0: i32) -> (i32, i32) {
    %c0_i32 = arith.constant 0 : i32
    %c0_i32_0 = arith.constant 0 : i32
    return %arg0, %c0_i32 : i32, i32
  }
}

</mosaic_0001>

<bundles_post_ra>
// kernel: mnistfc_forward.1
= control target key start
LH: loop header
LB: loop body
LE: loop exit
PB: predicated region body
PF: predicated region fallthrough
CT: control target
= control target key end

     0   :  { %12 = vsyncpa [#allocation3], 0  ;;  %s9763_s0 = inlined_call_operand.vmem [shape: f32[8,896], index: 0, kind: input, shape index: {}]   ;;  %s9764_s1 = inlined_call_operand.hbm [shape: bf16[896,1024], index: 1, kind: input, shape index: {}]   ;;  %s9765_s2 = inlined_call_operand.hbm [shape: f32[1,1024], index: 2, kind: input, shape index: {}]   ;;  %s9766_s3 = inlined_call_operand.hbm [shape: bf16[1024,1024], index: 3, kind: input, shape index: {}]   ;;  %s9767_s4 = inlined_call_operand.hbm [shape: f32[1,1024], index: 4, kind: input, shape index: {}]   ;;  %s9768_s5 = inlined_call_operand.hbm [shape: bf16[1024,128], index: 5, kind: input, shape index: {}]   ;;  %s9769_s6 = inlined_call_operand.hbm [shape: f32[1,128], index: 6, kind: input, shape index: {}]   ;;  %s9770_s7 = inlined_call_operand.vmem [shape: f32[8,128], index: 7, kind: output, shape index: {}]  }
   0x1   :  { %13 = vsyncpa [#allocation5], 0 }
   0x2   :  { %14 = vsyncpa [#allocation8], 0 }
   0x3   :  { %15 = vsyncpa [#allocation11], 0  ;;  %s9434_s24 = smov [#allocation4]   ;;  %s9435_s26 = smov [#allocation7]  }
   0x4   :  { %s36_s25 = sshll.u32 %s9434_s24, 4  ;;  %s58_s27 = sshll.u32 %s9435_s26, 4  ;;  %s37_s25 = int_to_ptr.vmem [resolvable:$true] %s36_s25  ;;  %s59_s27 = int_to_ptr.vmem [resolvable:$true] %s58_s27 }
   0x5   :  { %s9294_s30 = scalar_lea.hbm %s9765_s2, 128 }
   0x6   :  { %p9295_p0 = scmp.ne.s32.totalorder %s9765_s2, %s9294_s30  ;;  %p9298_p1 = scmp.lt.u32.totalorder %s9294_s30, %s9765_s2 }
   0x8   :  { %p9300_p2 = pnand %p9298_p1, %p9295_p0 }
   0xa   :  { %9303 = shalt.err (!%p9300_p2)
}
   0xb   :  { %s9304_s12 = scalar_lea.vmem %s37_s25, 128  ;;  %p9309_p4 = scmp.lt.s32.totalorder %s37_s25, %s37_s25 }
   0xc   :  { %p9305_p3 = scmp.ne.s32.totalorder %s37_s25, %s9304_s12  ;;  %p9310_p5 = scmp.lt.s32.totalorder %s9304_s12, %s9304_s12 }
   0xe   :  { %p9311_p6 = por %p9310_p5, %p9309_p4 }
  0x10   :  { %p9312_p7 = pnand %p9311_p6, %p9305_p3 }
  0x12   :  { %9315 = shalt.err (!%p9312_p7)
}
  0x13   :  { %39 = dma.hbm_to_vmem [thread:$0]  %s9765_s2, 128, %s37_s25, [#allocation5]  }
  0x14   :  { %s9316_s17 = scalar_lea.hbm %s9767_s4, 128 }
  0x15   :  { %p9317_p8 = scmp.ne.s32.totalorder %s9767_s4, %s9316_s17  ;;  %p9320_p9 = scmp.lt.u32.totalorder %s9316_s17, %s9767_s4 }
  0x17   :  { %p9322_p10 = pnand %p9320_p9, %p9317_p8 }
  0x19   :  { %9325 = shalt.err (!%p9322_p10)
}
  0x1a   :  { %s9326_s22 = scalar_lea.vmem %s59_s27, 128  ;;  %p9331_p12 = scmp.lt.s32.totalorder %s59_s27, %s59_s27 }
  0x1b   :  { %p9327_p11 = scmp.ne.s32.totalorder %s59_s27, %s9326_s22  ;;  %p9332_p13 = scmp.lt.s32.totalorder %s9326_s22, %s9326_s22 }
  0x1d   :  { %p9333_p0 = por %p9332_p13, %p9331_p12 }
  0x1f   :  { %p9334_p1 = pnand %p9333_p0, %p9327_p11 }
  0x21   :  { %9337 = shalt.err (!%p9334_p1)
}
  0x22   :  { %61 = dma.hbm_to_vmem [thread:$0]  %s9767_s4, 128, %s59_s27, [#allocation8]  }
  0x23   :  { %s9436_s24 = smov [#allocation2]   ;;  %s9338_s29 = scalar_lea.hbm %s9764_s1, 57344 }
  0x24   :  { %s23_s25 = sshll.u32 %s9436_s24, 4  ;;  %p9339_p2 = scmp.ne.s32.totalorder %s9764_s1, %s9338_s29  ;;  %s24_s25 = int_to_ptr.vmem [resolvable:$true] %s23_s25 }
  0x25   :  { %p9342_p3 = scmp.lt.u32.totalorder %s9338_s29, %s9764_s1 }
  0x27   :  { %p9344_p4 = pnand %p9342_p3, %p9339_p2 }
  0x29   :  { %9347 = shalt.err (!%p9344_p4)
}
  0x2a   :  { %s9348_s11 = scalar_lea.vmem %s24_s25, 57344  ;;  %p9353_p6 = scmp.lt.s32.totalorder %s24_s25, %s24_s25 }
  0x2b   :  { %p9349_p5 = scmp.ne.s32.totalorder %s24_s25, %s9348_s11  ;;  %p9354_p7 = scmp.lt.s32.totalorder %s9348_s11, %s9348_s11 }
  0x2d   :  { %p9355_p8 = por %p9354_p7, %p9353_p6 }
  0x2f   :  { %p9356_p9 = pnand %p9355_p8, %p9349_p5 }
  0x31   :  { %9359 = shalt.err (!%p9356_p9)
}
  0x32   :  { %s9437_s4 = smov 512   ;;  %s9438_s27 = smov 32  }
  0x33   :  { %29 = dma.hbm_to_vmem [thread:$0]  %s9764_s1, 57344, %s24_s25, [#allocation3], %s9437_s4, %s9437_s4, %s9438_s27  }
  0x34   :  { %s9439_s14 = smov [#allocation6]   ;;  %s9440_s16 = smov [#allocation9]  }
  0x35   :  { %s45_s15 = sshll.u32 %s9439_s14, 4  ;;  %s67_s17 = sshll.u32 %s9440_s16, 4  ;;  %s46_s15 = int_to_ptr.vmem [resolvable:$true] %s45_s15  ;;  %s68_s17 = int_to_ptr.vmem [resolvable:$true] %s67_s17 }
  0x36   :  { %s9360_s20 = scalar_lea.hbm %s9766_s3, 65536 }
  0x37   :  { %p9361_p10 = scmp.ne.s32.totalorder %s9766_s3, %s9360_s20  ;;  %p9364_p11 = scmp.lt.u32.totalorder %s9360_s20, %s9766_s3 }
  0x39   :  { %p9366_p12 = pnand %p9364_p11, %p9361_p10 }
  0x3b   :  { %9369 = shalt.err (!%p9366_p12)
}
  0x3c   :  { %s9370_s1 = scalar_lea.vmem %s46_s15, 65536  ;;  %p9375_p0 = scmp.lt.s32.totalorder %s46_s15, %s46_s15 }
  0x3d   :  { %p9371_p13 = scmp.ne.s32.totalorder %s46_s15, %s9370_s1  ;;  %p9376_p1 = scmp.lt.s32.totalorder %s9370_s1, %s9370_s1 }
  0x3f   :  { %p9377_p2 = por %p9376_p1, %p9375_p0 }
  0x41   :  { %p9378_p3 = pnand %p9377_p2, %p9371_p13 }
  0x43   :  { %9381 = shalt.err (!%p9378_p3)
}
  0x44   :  { %51 = dma.hbm_to_vmem [thread:$0]  %s9766_s3, 65536, %s46_s15, [#allocation5], %s9437_s4, %s9437_s4, %s9438_s27  }
  0x45   :  { %s9382_s29 = scalar_lea.hbm %s9768_s5, 8192 }
  0x46   :  { %p9383_p4 = scmp.ne.s32.totalorder %s9768_s5, %s9382_s29  ;;  %p9386_p5 = scmp.lt.u32.totalorder %s9382_s29, %s9768_s5 }
  0x48   :  { %p9388_p6 = pnand %p9386_p5, %p9383_p4 }
  0x4a   :  { %9391 = shalt.err (!%p9388_p6)
}
  0x4b   :  { %s9392_s11 = scalar_lea.vmem %s68_s17, 8192  ;;  %p9397_p8 = scmp.lt.s32.totalorder %s68_s17, %s68_s17 }
  0x4c   :  { %p9393_p7 = scmp.ne.s32.totalorder %s68_s17, %s9392_s11  ;;  %p9398_p9 = scmp.lt.s32.totalorder %s9392_s11, %s9392_s11 }
  0x4e   :  { %p9399_p10 = por %p9398_p9, %p9397_p8 }
  0x50   :  { %p9400_p11 = pnand %p9399_p10, %p9393_p7 }
  0x52   :  { %9403 = shalt.err (!%p9400_p11)
}
  0x53   :  { %s9441_s3 = smov 64   ;;  %s9442_s4 = smov 4  }
  0x54   :  { %73 = dma.hbm_to_vmem [thread:$0]  %s9768_s5, 8192, %s68_s17, [#allocation8], %s9441_s3, %s9441_s3, %s9442_s4  }
  0x55   :  { %s9443_s13 = smov [#allocation10]   ;;  %s9404_s18 = scalar_lea.hbm %s9769_s6, 16 }
  0x56   :  { %s80_s14 = sshll.u32 %s9443_s13, 4  ;;  %p9405_p12 = scmp.ne.s32.totalorder %s9769_s6, %s9404_s18  ;;  %s81_s14 = int_to_ptr.vmem [resolvable:$true] %s80_s14 }
  0x57   :  { %p9408_p13 = scmp.lt.u32.totalorder %s9404_s18, %s9769_s6 }
  0x59   :  { %p9410_p0 = pnand %p9408_p13, %p9405_p12 }
  0x5b   :  { %9413 = shalt.err (!%p9410_p0)
}
  0x5c   :  { %s9414_s2 = scalar_lea.vmem %s81_s14, 16  ;;  %s9418_s5 = scalar_lea.vmem %s81_s14, 32 }
  0x5d   :  { %p9415_p1 = scmp.ne.s32.totalorder %s81_s14, %s9414_s2  ;;  %p9419_p2 = scmp.lt.s32.totalorder %s81_s14, %s81_s14 }
  0x5e   :  { %p9420_p3 = scmp.lt.s32.totalorder %s9418_s5, %s9414_s2 }
  0x60   :  { %p9421_p4 = por %p9420_p3, %p9419_p2 }
  0x62   :  { %p9422_p5 = pnand %p9421_p4, %p9415_p1 }
  0x64   :  { %9425 = shalt.err (!%p9422_p5)
}
  0x65   :  { %83 = dma.hbm_to_vmem [thread:$0]  %s9769_s6, 16, %s81_s14, [#allocation11]  }
  0x66   :  { %9426 = dma.done.wait [#allocation3], 57344  }
  0x67   :  { %9427 = vsyncadd [#allocation3], 4294909952 }
  0x68   :  { %9428 = dma.done.wait [#allocation5], 65664  }
  0x69   :  { %9429 = vsyncadd [#allocation5], 4294901632 }
  0x6a   :  { %9430 = dma.done.wait [#allocation8], 8320  }
  0x6b   :  { %9431 = vsyncadd [#allocation8], 4294958976 }
  0x6c   :  { %9432 = dma.done.wait [#allocation11], 16  }
  0x6d   :  { %9433 = vsyncadd [#allocation11], 4294967280  ;;  %v117_v0 = vld [vmem:[#allocation2] sm:$0xff]  ;;  %v118_v2 = vld [vmem:[#allocation2 + $0x8] sm:$0xff] }
  0x6e   :  { %v121_v1 = vld [vmem:[#allocation2 + $0x20] sm:$0xff]  ;;  %v122_v4 = vld [vmem:[#allocation2 + $0x28] sm:$0xff] }
  0x6f   :  { %v7994_v3 = vcombine.high %v117_v0, %v121_v1  ;;  %v7993_v5 = vcombine.low %v117_v0, %v121_v1  ;;  %v125_v6 = vld [vmem:[#allocation2 + $0x40] sm:$0xff]  ;;  %v7996_v8 = vcombine.high %v118_v2, %v122_v4  ;;  %v7995_v9 = vcombine.low %v118_v2, %v122_v4  ;;  %v126_v11 = vld [vmem:[#allocation2 + $0x48] sm:$0xff] }
  0x70   :  { %v129_v7 = vld [vmem:[#allocation2 + $0x60] sm:$0xff]  ;;  %v130_v12 = vld [vmem:[#allocation2 + $0x68] sm:$0xff] }
  0x71   :  { %v8002_v10 = vcombine.high %v125_v6, %v129_v7  ;;  %v133_v13 = vld [vmem:[#allocation2 + $0x80] sm:$0xff]  ;;  %2847 = vmatprep.subr.bf16.mxu0 %v7994_v3  ;;  %v8004_v14 = vcombine.high %v126_v11, %v130_v12  ;;  %v134_v16 = vld [vmem:[#allocation2 + $0x88] sm:$0xff]  ;;  %3011 = vmatprep.subr.bf16.mxu1 %v7996_v8  ;;  %v8001_v18 = vcombine.low %v125_v6, %v129_v7 }
  0x72   :  { %v137_v15 = vld [vmem:[#allocation2 + $0xa0] sm:$0xff]  ;;  %v138_v17 = vld [vmem:[#allocation2 + $0xa8] sm:$0xff]  ;;  %2848 = vmatpush1.bf16.msra.mxu0 %v7993_v5  ;;  %3012 = vmatpush1.bf16.msra.mxu1 %v7995_v9  ;;  %v8003_v19 = vcombine.low %v126_v11, %v130_v12 }
  0x73   :  { %2849 = vmatprep.subr.bf16.mxu0 %v8002_v10  ;;  %v8010_v20 = vcombine.high %v133_v13, %v137_v15  ;;  %3013 = vmatprep.subr.bf16.mxu1 %v8004_v14  ;;  %v8012_v21 = vcombine.high %v134_v16, %v138_v17  ;;  %v141_v22 = vld [vmem:[#allocation2 + $0xc0] sm:$0xff]  ;;  %v142_v24 = vld [vmem:[#allocation2 + $0xc8] sm:$0xff]  ;;  %v8009_v26 = vcombine.low %v133_v13, %v137_v15 }
  0x74   :  { %v145_v23 = vld [vmem:[#allocation2 + $0xe0] sm:$0xff]  ;;  %v146_v25 = vld [vmem:[#allocation2 + $0xe8] sm:$0xff]  ;;  %v8011_v27 = vcombine.low %v134_v16, %v138_v17 }
  0x75   :  { %v8018_v28 = vcombine.high %v141_v22, %v145_v23  ;;  %v8020_v29 = vcombine.high %v142_v24, %v146_v25  ;;  %v149_v30 = vld [vmem:[#allocation2 + $0x100] sm:$0xff]  ;;  %v150_v32 = vld [vmem:[#allocation2 + $0x108] sm:$0xff]  ;;  %v8017_v34 = vcombine.low %v141_v22, %v145_v23  ;;  %v8019_v35 = vcombine.low %v142_v24, %v146_v25 }
  0x76   :  { %2850 = vmatpush1.bf16.msra.mxu0 %v8001_v18  ;;  %3014 = vmatpush1.bf16.msra.mxu1 %v8003_v19  ;;  %v153_v31 = vld [vmem:[#allocation2 + $0x120] sm:$0xff]  ;;  %v154_v33 = vld [vmem:[#allocation2 + $0x128] sm:$0xff] }
  0x77   :  { %2851 = vmatprep.subr.bf16.mxu0 %v8010_v20  ;;  %3015 = vmatprep.subr.bf16.mxu1 %v8012_v21  ;;  %v8026_v36 = vcombine.high %v149_v30, %v153_v31  ;;  %v8028_v37 = vcombine.high %v150_v32, %v154_v33  ;;  %v157_v38 = vld [vmem:[#allocation2 + $0x140] sm:$0xff]  ;;  %v158_v40 = vld [vmem:[#allocation2 + $0x148] sm:$0xff]  ;;  %v8025_v42 = vcombine.low %v149_v30, %v153_v31 }
  0x78   :  { %v161_v39 = vld [vmem:[#allocation2 + $0x160] sm:$0xff]  ;;  %v162_v41 = vld [vmem:[#allocation2 + $0x168] sm:$0xff]  ;;  %v8027_v43 = vcombine.low %v150_v32, %v154_v33 }
  0x79   :  { %v8034_v44 = vcombine.high %v157_v38, %v161_v39  ;;  %v8036_v45 = vcombine.high %v158_v40, %v162_v41  ;;  %v165_v46 = vld [vmem:[#allocation2 + $0x180] sm:$0xff]  ;;  %v166_v48 = vld [vmem:[#allocation2 + $0x188] sm:$0xff]  ;;  %v8033_v50 = vcombine.low %v157_v38, %v161_v39  ;;  %v8035_v51 = vcombine.low %v158_v40, %v162_v41 }
  0x7a   :  { %2852 = vmatpush1.bf16.msra.mxu0 %v8009_v26  ;;  %3016 = vmatpush1.bf16.msra.mxu1 %v8011_v27  ;;  %v169_v47 = vld [vmem:[#allocation2 + $0x1a0] sm:$0xff]  ;;  %v170_v49 = vld [vmem:[#allocation2 + $0x1a8] sm:$0xff] }
  0x7b   :  { %2853 = vmatprep.subr.bf16.mxu0 %v8018_v28  ;;  %3017 = vmatprep.subr.bf16.mxu1 %v8020_v29  ;;  %v8042_v52 = vcombine.high %v165_v46, %v169_v47  ;;  %v104_v53 = vld [vmem:[%s9763_s0 + $0x8] sm:$0xff]  ;;  %v8044_v54 = vcombine.high %v166_v48, %v170_v49  ;;  %v173_v55 = vld [vmem:[#allocation2 + $0x1c0] sm:$0xff]  ;;  %v8041_v60 = vcombine.low %v165_v46, %v169_v47 }
  0x7c   :  { %v177_v56 = vld [vmem:[#allocation2 + $0x1e0] sm:$0xff]  ;;  %v9560_v57 = vpack.c.bf16 %v104_v53, %v104_v53  ;;  %v174_v58 = vld [vmem:[#allocation2 + $0x1c8] sm:$0xff]  ;;  %v8043_v61 = vcombine.low %v166_v48, %v170_v49 }
  0x7d   :  { %v178_v59 = vld [vmem:[#allocation2 + $0x1e8] sm:$0xff]  ;;  %v8050_v62 = vcombine.high %v173_v55, %v177_v56  ;;  %v181_v0 = vld [vmem:[#allocation2 + $0x200] sm:$0xff]  ;;  %v8049_v4 = vcombine.low %v173_v55, %v177_v56 }
  0x7e   :  { %2854 = vmatpush1.bf16.msra.mxu0 %v8017_v34  ;;  %3018 = vmatpush1.bf16.msra.mxu1 %v8019_v35  ;;  %v8052_v63 = vcombine.high %v174_v58, %v178_v59  ;;  %v185_v1 = vld [vmem:[#allocation2 + $0x220] sm:$0xff]  ;;  %v182_v2 = vld [vmem:[#allocation2 + $0x208] sm:$0xff]  ;;  %v8051_v5 = vcombine.low %v174_v58, %v178_v59 }
  0x7f   :  { %2855 = vmatprep.subr.bf16.mxu0 %v8026_v36  ;;  %3019 = vmatprep.subr.bf16.mxu1 %v8028_v37  ;;  %v186_v3 = vld [vmem:[#allocation2 + $0x228] sm:$0xff]  ;;  %v8058_v6 = vcombine.high %v181_v0, %v185_v1  ;;  %v189_v8 = vld [vmem:[#allocation2 + $0x240] sm:$0xff]  ;;  %v8057_v12 = vcombine.low %v181_v0, %v185_v1 }
  0x80   :  { %2879 = vmatprep.mubr.bf16.mxu0 %v9560_v57  ;;  %3043 = vmatprep.mubr.bf16.mxu1 %v9560_v57  ;;  %v8060_v7 = vcombine.high %v182_v2, %v186_v3  ;;  %v193_v9 = vld [vmem:[#allocation2 + $0x260] sm:$0xff]  ;;  %v190_v10 = vld [vmem:[#allocation2 + $0x248] sm:$0xff]  ;;  %v8059_v13 = vcombine.low %v182_v2, %v186_v3 }
  0x81   :  { %v194_v11 = vld [vmem:[#allocation2 + $0x268] sm:$0xff]  ;;  %v8066_v14 = vcombine.high %v189_v8, %v193_v9  ;;  %v197_v16 = vld [vmem:[#allocation2 + $0x280] sm:$0xff]  ;;  %v8065_v20 = vcombine.low %v189_v8, %v193_v9 }
  0x82   :  { %2856 = vmatpush1.bf16.msra.mxu0 %v8025_v42  ;;  %3020 = vmatpush1.bf16.msra.mxu1 %v8027_v43  ;;  %v8068_v15 = vcombine.high %v190_v10, %v194_v11  ;;  %v201_v17 = vld [vmem:[#allocation2 + $0x2a0] sm:$0xff]  ;;  %v198_v18 = vld [vmem:[#allocation2 + $0x288] sm:$0xff]  ;;  %v8067_v21 = vcombine.low %v190_v10, %v194_v11 }
  0x83   :  { %2857 = vmatprep.subr.bf16.mxu0 %v8034_v44  ;;  %3021 = vmatprep.subr.bf16.mxu1 %v8036_v45  ;;  %v202_v19 = vld [vmem:[#allocation2 + $0x2a8] sm:$0xff]  ;;  %v8074_v22 = vcombine.high %v197_v16, %v201_v17  ;;  %v205_v24 = vld [vmem:[#allocation2 + $0x2c0] sm:$0xff]  ;;  %v8073_v28 = vcombine.low %v197_v16, %v201_v17 }
  0x84   :  { %v8076_v23 = vcombine.high %v198_v18, %v202_v19  ;;  %v209_v25 = vld [vmem:[#allocation2 + $0x2e0] sm:$0xff]  ;;  %v206_v26 = vld [vmem:[#allocation2 + $0x2c8] sm:$0xff]  ;;  %v8075_v29 = vcombine.low %v198_v18, %v202_v19 }
  0x85   :  { %v210_v27 = vld [vmem:[#allocation2 + $0x2e8] sm:$0xff]  ;;  %v8082_v30 = vcombine.high %v205_v24, %v209_v25  ;;  %v213_v32 = vld [vmem:[#allocation2 + $0x300] sm:$0xff]  ;;  %v8081_v36 = vcombine.low %v205_v24, %v209_v25 }
  0x86   :  { %2858 = vmatpush1.bf16.msra.mxu0 %v8033_v50  ;;  %3022 = vmatpush1.bf16.msra.mxu1 %v8035_v51  ;;  %v8084_v31 = vcombine.high %v206_v26, %v210_v27  ;;  %v217_v33 = vld [vmem:[#allocation2 + $0x320] sm:$0xff]  ;;  %v214_v34 = vld [vmem:[#allocation2 + $0x308] sm:$0xff]  ;;  %v8083_v37 = vcombine.low %v206_v26, %v210_v27 }
  0x87   :  { %2859 = vmatprep.subr.bf16.mxu0 %v8042_v52  ;;  %3023 = vmatprep.subr.bf16.mxu1 %v8044_v54  ;;  %v218_v35 = vld [vmem:[#allocation2 + $0x328] sm:$0xff]  ;;  %v8090_v38 = vcombine.high %v213_v32, %v217_v33  ;;  %v221_v40 = vld [vmem:[#allocation2 + $0x340] sm:$0xff]  ;;  %v8089_v44 = vcombine.low %v213_v32, %v217_v33 }
  0x88   :  { %v8092_v39 = vcombine.high %v214_v34, %v218_v35  ;;  %v225_v41 = vld [vmem:[#allocation2 + $0x360] sm:$0xff]  ;;  %v222_v42 = vld [vmem:[#allocation2 + $0x348] sm:$0xff]  ;;  %v8091_v45 = vcombine.low %v214_v34, %v218_v35 }
  0x89   :  { %v226_v43 = vld [vmem:[#allocation2 + $0x368] sm:$0xff]  ;;  %v8098_v46 = vcombine.high %v221_v40, %v225_v41  ;;  %v229_v48 = vld [vmem:[#allocation2 + $0x380] sm:$0xff]  ;;  %v8097_v52 = vcombine.low %v221_v40, %v225_v41 }
  0x8a   :  { %2860 = vmatpush1.bf16.msra.mxu0 %v8041_v60  ;;  %3024 = vmatpush1.bf16.msra.mxu1 %v8043_v61  ;;  %v8100_v47 = vcombine.high %v222_v42, %v226_v43  ;;  %v233_v49 = vld [vmem:[#allocation2 + $0x3a0] sm:$0xff]  ;;  %v230_v50 = vld [vmem:[#allocation2 + $0x388] sm:$0xff]  ;;  %v8099_v53 = vcombine.low %v222_v42, %v226_v43 }
  0x8b   :  { %2861 = vmatprep.subr.bf16.mxu0 %v8050_v62  ;;  %3025 = vmatprep.subr.bf16.mxu1 %v8052_v63  ;;  %v234_v51 = vld [vmem:[#allocation2 + $0x3a8] sm:$0xff]  ;;  %v8106_v54 = vcombine.high %v229_v48, %v233_v49  ;;  %v237_v56 = vld [vmem:[#allocation2 + $0x3c0] sm:$0xff]  ;;  %v8105_v61 = vcombine.low %v229_v48, %v233_v49 }
  0x8c   :  { %v8108_v55 = vcombine.high %v230_v50, %v234_v51  ;;  %v241_v58 = vld [vmem:[#allocation2 + $0x3e0] sm:$0xff]  ;;  %v238_v59 = vld [vmem:[#allocation2 + $0x3c8] sm:$0xff]  ;;  %v8107_v62 = vcombine.low %v230_v50, %v234_v51 }
  0x8d   :  { %v242_v60 = vld [vmem:[#allocation2 + $0x3e8] sm:$0xff]  ;;  %v8114_v63 = vcombine.high %v237_v56, %v241_v58  ;;  %v245_v1 = vld [vmem:[#allocation2 + $0x400] sm:$0xff] }
  0x8e   :  { %2862 = vmatpush1.bf16.msra.mxu0 %v8049_v4  ;;  %3026 = vmatpush1.bf16.msra.mxu1 %v8051_v5  ;;  %v8116_v0 = vcombine.high %v238_v59, %v242_v60  ;;  %v249_v2 = vld [vmem:[#allocation2 + $0x420] sm:$0xff]  ;;  %v246_v3 = vld [vmem:[#allocation2 + $0x408] sm:$0xff]  ;;  %v8113_v5 = vcombine.low %v237_v56, %v241_v58 }
  0x8f   :  { %2863 = vmatprep.subr.bf16.mxu0 %v8058_v6  ;;  %3027 = vmatprep.subr.bf16.mxu1 %v8060_v7  ;;  %v250_v4 = vld [vmem:[#allocation2 + $0x428] sm:$0xff]  ;;  %v103_v6 = vld [vmem:[%s9763_s0] sm:$0xff]  ;;  %v8115_v7 = vcombine.low %v238_v59, %v242_v60  ;;  %v8122_v8 = vcombine.high %v245_v1, %v249_v2  ;;  %v8121_v16 = vcombine.low %v245_v1, %v249_v2 }
  0x90   :  { %v8124_v9 = vcombine.high %v246_v3, %v250_v4  ;;  %v253_v10 = vld [vmem:[#allocation2 + $0x440] sm:$0xff]  ;;  %v8123_v17 = vcombine.low %v246_v3, %v250_v4  ;;  %v266_v24 = vld [vmem:[#allocation2 + $0x4a8] sm:$0xff] }
  0x91   :  { %v257_v11 = vld [vmem:[#allocation2 + $0x460] sm:$0xff]  ;;  %v274_v32 = vld [vmem:[#allocation2 + $0x4e8] sm:$0xff] }
  0x92   :  { %2864 = vmatpush1.bf16.msra.mxu0 %v8057_v12  ;;  %3028 = vmatpush1.bf16.msra.mxu1 %v8059_v13  ;;  %v9567_v12 = vpack.c.bf16 %v103_v6, %v103_v6  ;;  %v254_v13 = vld [vmem:[#allocation2 + $0x448] sm:$0xff]  ;;  %v8130_v18 = vcombine.high %v253_v10, %v257_v11  ;;  %v8129_v25 = vcombine.low %v253_v10, %v257_v11  ;;  %v313_v6 = vld [vmem:[#allocation2 + $0x620] sm:$0xff] }
  0x93   :  { %2865 = vmatprep.subr.bf16.mxu0 %v8066_v14  ;;  %3029 = vmatprep.subr.bf16.mxu1 %v8068_v15  ;;  %v258_v14 = vld [vmem:[#allocation2 + $0x468] sm:$0xff]  ;;  %v106_v15 = vld [vmem:[%s9763_s0 + $0x18] sm:$0xff] }
  0x94   :  { %v8132_v19 = vcombine.high %v254_v13, %v258_v14  ;;  %v8131_v26 = vcombine.low %v254_v13, %v258_v14  ;;  %v282_v40 = vld [vmem:[#allocation2 + $0x528] sm:$0xff]  ;;  %v317_v14 = vld [vmem:[#allocation2 + $0x640] sm:$0xff] }
  0x95   :  { %v290_v48 = vld [vmem:[#allocation2 + $0x568] sm:$0xff] }
  0x96   :  { %2866 = vmatpush1.bf16.msra.mxu0 %v8065_v20  ;;  %3030 = vmatpush1.bf16.msra.mxu1 %v8067_v21  ;;  %v261_v20 = vld [vmem:[#allocation2 + $0x480] sm:$0xff]  ;;  %v298_v56 = vld [vmem:[#allocation2 + $0x5a8] sm:$0xff] }
  0x97   :  { %2867 = vmatprep.subr.bf16.mxu0 %v8074_v22  ;;  %3031 = vmatprep.subr.bf16.mxu1 %v8076_v23  ;;  %v265_v21 = vld [vmem:[#allocation2 + $0x4a0] sm:$0xff]  ;;  %v262_v22 = vld [vmem:[#allocation2 + $0x488] sm:$0xff]  ;;  %v9572_v23 = vpack.c.bf16 %v106_v15, %v106_v15 }
  0x98   :  { %v8138_v27 = vcombine.high %v261_v20, %v265_v21  ;;  %v8137_v33 = vcombine.low %v261_v20, %v265_v21  ;;  %v8139_v34 = vcombine.low %v262_v22, %v266_v24  ;;  %v306_v1 = vld [vmem:[#allocation2 + $0x5e8] sm:$0xff]  ;;  %v321_v15 = vld [vmem:[#allocation2 + $0x660] sm:$0xff] }
  0x99   :  { %v8194_v21 = vcombine.high %v317_v14, %v321_v15 }
  0x9a   :  { %2868 = vmatpush1.bf16.msra.mxu0 %v8073_v28  ;;  %3032 = vmatpush1.bf16.msra.mxu1 %v8075_v29  ;;  %v269_v28 = vld [vmem:[#allocation2 + $0x4c0] sm:$0xff] }
  0x9b   :  { %2869 = vmatprep.subr.bf16.mxu0 %v8082_v30  ;;  %3033 = vmatprep.subr.bf16.mxu1 %v8084_v31  ;;  %v273_v29 = vld [vmem:[#allocation2 + $0x4e0] sm:$0xff]  ;;  %v270_v30 = vld [vmem:[#allocation2 + $0x4c8] sm:$0xff]  ;;  %v8140_v31 = vcombine.high %v262_v22, %v266_v24 }
  0x9c   :  { %v8146_v35 = vcombine.high %v269_v28, %v273_v29  ;;  %v8145_v41 = vcombine.low %v269_v28, %v273_v29  ;;  %v8147_v42 = vcombine.low %v270_v30, %v274_v32  ;;  %v325_v22 = vld [vmem:[#allocation2 + $0x680] sm:$0xff]  ;;  %v8193_v28 = vcombine.low %v317_v14, %v321_v15  ;;  %v105_v14 = vld [vmem:[%s9763_s0 + $0x10] sm:$0xff] }
  0x9d   :  { %v329_v24 = vld [vmem:[#allocation2 + $0x6a0] sm:$0xff] }
  0x9e   :  { %2870 = vmatpush1.bf16.msra.mxu0 %v8081_v36  ;;  %3034 = vmatpush1.bf16.msra.mxu1 %v8083_v37  ;;  %v277_v36 = vld [vmem:[#allocation2 + $0x500] sm:$0xff] }
  0x9f   :  { %2871 = vmatprep.subr.bf16.mxu0 %v8090_v38  ;;  %3035 = vmatprep.subr.bf16.mxu1 %v8092_v39  ;;  %v281_v37 = vld [vmem:[#allocation2 + $0x520] sm:$0xff]  ;;  %v278_v38 = vld [vmem:[#allocation2 + $0x508] sm:$0xff]  ;;  %v8148_v39 = vcombine.high %v270_v30, %v274_v32  ;;  %v8202_v30 = vcombine.high %v325_v22, %v329_v24 }
  0xa0   :  { %v8154_v43 = vcombine.high %v277_v36, %v281_v37  ;;  %v8153_v49 = vcombine.low %v277_v36, %v281_v37  ;;  %v8155_v50 = vcombine.low %v278_v38, %v282_v40  ;;  %v337_v32 = vld [vmem:[#allocation2 + $0x6e0] sm:$0xff]  ;;  %v8201_v36 = vcombine.low %v325_v22, %v329_v24  ;;  %v108_v24 = vld [vmem:[%s9763_s0 + $0x28] sm:$0xff] }
  0xa2   :  { %2872 = vmatpush1.bf16.msra.mxu0 %v8089_v44  ;;  %3036 = vmatpush1.bf16.msra.mxu1 %v8091_v45  ;;  %v285_v44 = vld [vmem:[#allocation2 + $0x540] sm:$0xff] }
  0xa3   :  { %2873 = vmatprep.subr.bf16.mxu0 %v8098_v46  ;;  %3037 = vmatprep.subr.bf16.mxu1 %v8100_v47  ;;  %v289_v45 = vld [vmem:[#allocation2 + $0x560] sm:$0xff]  ;;  %v286_v46 = vld [vmem:[#allocation2 + $0x548] sm:$0xff]  ;;  %v8156_v47 = vcombine.high %v278_v38, %v282_v40 }
  0xa4   :  { %v8162_v51 = vcombine.high %v285_v44, %v289_v45  ;;  %v8161_v58 = vcombine.low %v285_v44, %v289_v45  ;;  %v8163_v59 = vcombine.low %v286_v46, %v290_v48  ;;  %v345_v40 = vld [vmem:[#allocation2 + $0x720] sm:$0xff] }
  0xa6   :  { %2874 = vmatpush1.bf16.msra.mxu0 %v8097_v52  ;;  %3038 = vmatpush1.bf16.msra.mxu1 %v8099_v53  ;;  %v293_v52 = vld [vmem:[#allocation2 + $0x580] sm:$0xff] }
  0xa7   :  { %2875 = vmatprep.subr.bf16.mxu0 %v8106_v54  ;;  %3039 = vmatprep.subr.bf16.mxu1 %v8108_v55  ;;  %v297_v53 = vld [vmem:[#allocation2 + $0x5a0] sm:$0xff]  ;;  %v294_v54 = vld [vmem:[#allocation2 + $0x588] sm:$0xff]  ;;  %v8164_v55 = vcombine.high %v286_v46, %v290_v48 }
  0xa8   :  { %v8170_v60 = vcombine.high %v293_v52, %v297_v53  ;;  %v8169_v2 = vcombine.low %v293_v52, %v297_v53  ;;  %v8171_v3 = vcombine.low %v294_v54, %v298_v56  ;;  %v353_v48 = vld [vmem:[#allocation2 + $0x760] sm:$0xff] }
  0xaa   :  { %2876 = vmatpush1.bf16.msra.mxu0 %v8105_v61  ;;  %3040 = vmatpush1.bf16.msra.mxu1 %v8107_v62  ;;  %v301_v61 = vld [vmem:[#allocation2 + $0x5c0] sm:$0xff] }
  0xab   :  { %2877 = vmatprep.subr.bf16.mxu0 %v8114_v63  ;;  %3041 = vmatprep.subr.bf16.mxu1 %v8116_v0  ;;  %v305_v62 = vld [vmem:[#allocation2 + $0x5e0] sm:$0xff]  ;;  %v302_v63 = vld [vmem:[#allocation2 + $0x5c8] sm:$0xff]  ;;  %v8172_v0 = vcombine.high %v294_v54, %v298_v56 }
  0xac   :  { %v8178_v4 = vcombine.high %v301_v61, %v305_v62  ;;  %v8177_v10 = vcombine.low %v301_v61, %v305_v62  ;;  %v8179_v11 = vcombine.low %v302_v63, %v306_v1  ;;  %v361_v56 = vld [vmem:[#allocation2 + $0x7a0] sm:$0xff] }
  0xae   :  { %2878 = vmatpush1.bf16.msra.mxu0 %v8113_v5  ;;  %3042 = vmatpush1.bf16.msra.mxu1 %v8115_v7  ;;  %v309_v5 = vld [vmem:[#allocation2 + $0x600] sm:$0xff]  ;;  %v310_v7 = vld [vmem:[#allocation2 + $0x608] sm:$0xff] }
  0xaf   :  { %2888 = vmatprep.subr.bf16.mxu0 %v8122_v8  ;;  %3052 = vmatprep.subr.bf16.mxu1 %v8124_v9  ;;  %v8180_v8 = vcombine.high %v302_v63, %v306_v1  ;;  %v314_v9 = vld [vmem:[#allocation2 + $0x628] sm:$0xff]  ;;  %v8186_v13 = vcombine.high %v309_v5, %v313_v6  ;;  %v369_v1 = vld [vmem:[#allocation2 + $0x7e0] sm:$0xff] }
  0xb0   :  { %v8187_v20 = vcombine.low %v310_v7, %v314_v9 }
  0xb1   :  { %2880 = vmatmul.mubr.bf16.vlgmr.msra.gmra.mrb[0].mxu0 %v9567_v12  ;;  %3044 = vmatmul.mubr.bf16.vlgmr.msra.gmra.mrb[0].mxu1 %v9567_v12 }
  0xb2   :  { %2889 = vmatpush1.bf16.msra.mxu0 %v8121_v16  ;;  %3053 = vmatpush1.bf16.msra.mxu1 %v8123_v17  ;;  %v318_v16 = vld [vmem:[#allocation2 + $0x648] sm:$0xff]  ;;  %v8188_v17 = vcombine.high %v310_v7, %v314_v9  ;;  %v377_v9 = vld [vmem:[#allocation2 + $0x820] sm:$0xff] }
  0xb3   :  { %2890 = vmatprep.subr.bf16.mxu0 %v8130_v18  ;;  %3054 = vmatprep.subr.bf16.mxu1 %v8132_v19  ;;  %v322_v18 = vld [vmem:[#allocation2 + $0x668] sm:$0xff]  ;;  %v8185_v19 = vcombine.low %v309_v5, %v313_v6  ;;  %v373_v6 = vld [vmem:[#allocation2 + $0x800] sm:$0xff] }
  0xb4   :  { %2920 = vmatprep.mubr.bf16.mxu0 %v9572_v23  ;;  %3084 = vmatprep.mubr.bf16.mxu1 %v9572_v23  ;;  %v8195_v29 = vcombine.low %v318_v16, %v322_v18 }
  0xb6   :  { %2891 = vmatpush1.bf16.msra.mxu0 %v8129_v25  ;;  %3055 = vmatpush1.bf16.msra.mxu1 %v8131_v26  ;;  %v8196_v25 = vcombine.high %v318_v16, %v322_v18  ;;  %v326_v26 = vld [vmem:[#allocation2 + $0x688] sm:$0xff]  ;;  %v381_v16 = vld [vmem:[#allocation2 + $0x840] sm:$0xff]  ;;  %v8250_v18 = vcombine.high %v373_v6, %v377_v9 }
  0xb7   :  { %2892 = vmatprep.subr.bf16.mxu0 %v8138_v27  ;;  %3056 = vmatprep.subr.bf16.mxu1 %v8140_v31  ;;  %v330_v27 = vld [vmem:[#allocation2 + $0x6a8] sm:$0xff]  ;;  %v333_v31 = vld [vmem:[#allocation2 + $0x6c0] sm:$0xff] }
  0xb8   :  { %v8203_v37 = vcombine.low %v326_v26, %v330_v27  ;;  %v8210_v38 = vcombine.high %v333_v31, %v337_v32  ;;  %v8209_v44 = vcombine.low %v333_v31, %v337_v32  ;;  %v390_v32 = vld [vmem:[#allocation2 + $0x888] sm:$0xff] }
  0xba   :  { %2893 = vmatpush1.bf16.msra.mxu0 %v8137_v33  ;;  %3057 = vmatpush1.bf16.msra.mxu1 %v8139_v34  ;;  %v334_v33 = vld [vmem:[#allocation2 + $0x6c8] sm:$0xff]  ;;  %v8204_v34 = vcombine.high %v326_v26, %v330_v27  ;;  %v8249_v26 = vcombine.low %v373_v6, %v377_v9  ;;  %v433_v9 = vld [vmem:[#allocation2 + $0x9e0] sm:$0xff] }
  0xbb   :  { %2894 = vmatprep.subr.bf16.mxu0 %v8146_v35  ;;  %3058 = vmatprep.subr.bf16.mxu1 %v8148_v39  ;;  %v338_v35 = vld [vmem:[#allocation2 + $0x6e8] sm:$0xff]  ;;  %v341_v39 = vld [vmem:[#allocation2 + $0x700] sm:$0xff] }
  0xbc   :  { %v8211_v45 = vcombine.low %v334_v33, %v338_v35  ;;  %v8218_v46 = vcombine.high %v341_v39, %v345_v40  ;;  %v8217_v52 = vcombine.low %v341_v39, %v345_v40  ;;  %v397_v39 = vld [vmem:[#allocation2 + $0x8c0] sm:$0xff] }
  0xbd   :  { %v401_v40 = vld [vmem:[#allocation2 + $0x8e0] sm:$0xff] }
  0xbe   :  { %2895 = vmatpush1.bf16.msra.mxu0 %v8145_v41  ;;  %3059 = vmatpush1.bf16.msra.mxu1 %v8147_v42  ;;  %v342_v41 = vld [vmem:[#allocation2 + $0x708] sm:$0xff]  ;;  %v8212_v42 = vcombine.high %v334_v33, %v338_v35  ;;  %v9586_v33 = vpack.c.bf16 %v108_v24, %v108_v24 }
  0xbf   :  { %2896 = vmatprep.subr.bf16.mxu0 %v8154_v43  ;;  %3060 = vmatprep.subr.bf16.mxu1 %v8156_v47  ;;  %v346_v43 = vld [vmem:[#allocation2 + $0x728] sm:$0xff]  ;;  %v349_v47 = vld [vmem:[#allocation2 + $0x740] sm:$0xff] }
  0xc0   :  { %v8219_v53 = vcombine.low %v342_v41, %v346_v43  ;;  %v8226_v54 = vcombine.high %v349_v47, %v353_v48  ;;  %v8225_v61 = vcombine.low %v349_v47, %v353_v48  ;;  %v405_v47 = vld [vmem:[#allocation2 + $0x900] sm:$0xff] }
  0xc1   :  { %v409_v48 = vld [vmem:[#allocation2 + $0x920] sm:$0xff] }
  0xc2   :  { %2897 = vmatpush1.bf16.msra.mxu0 %v8153_v49  ;;  %3061 = vmatpush1.bf16.msra.mxu1 %v8155_v50  ;;  %v350_v49 = vld [vmem:[#allocation2 + $0x748] sm:$0xff]  ;;  %v8220_v50 = vcombine.high %v342_v41, %v346_v43 }
  0xc3   :  { %2898 = vmatprep.subr.bf16.mxu0 %v8162_v51  ;;  %3062 = vmatprep.subr.bf16.mxu1 %v8164_v55  ;;  %v354_v51 = vld [vmem:[#allocation2 + $0x768] sm:$0xff]  ;;  %v357_v55 = vld [vmem:[#allocation2 + $0x780] sm:$0xff] }
  0xc4   :  { %v8227_v62 = vcombine.low %v350_v49, %v354_v51  ;;  %v8234_v63 = vcombine.high %v357_v55, %v361_v56  ;;  %v8233_v5 = vcombine.low %v357_v55, %v361_v56  ;;  %v398_v41 = vld [vmem:[#allocation2 + $0x8c8] sm:$0xff]  ;;  %v413_v55 = vld [vmem:[#allocation2 + $0x940] sm:$0xff] }
  0xc5   :  { %v417_v56 = vld [vmem:[#allocation2 + $0x960] sm:$0xff] }
  0xc6   :  { %2899 = vmatpush1.bf16.msra.mxu0 %v8161_v58  ;;  %3063 = vmatpush1.bf16.msra.mxu1 %v8163_v59  ;;  %v358_v58 = vld [vmem:[#allocation2 + $0x788] sm:$0xff]  ;;  %v8228_v59 = vcombine.high %v350_v49, %v354_v51  ;;  %v8273_v51 = vcombine.low %v397_v39, %v401_v40 }
  0xc7   :  { %2900 = vmatprep.subr.bf16.mxu0 %v8170_v60  ;;  %3064 = vmatprep.subr.bf16.mxu1 %v8172_v0  ;;  %v362_v60 = vld [vmem:[#allocation2 + $0x7a8] sm:$0xff]  ;;  %v365_v0 = vld [vmem:[#allocation2 + $0x7c0] sm:$0xff] }
  0xc8   :  { %v8235_v7 = vcombine.low %v358_v58, %v362_v60  ;;  %v8241_v15 = vcombine.low %v365_v0, %v369_v1  ;;  %v406_v49 = vld [vmem:[#allocation2 + $0x908] sm:$0xff] }
  0xca   :  { %2901 = vmatpush1.bf16.msra.mxu0 %v8169_v2  ;;  %3065 = vmatpush1.bf16.msra.mxu1 %v8171_v3  ;;  %v366_v2 = vld [vmem:[#allocation2 + $0x7c8] sm:$0xff]  ;;  %v8236_v3 = vcombine.high %v358_v58, %v362_v60  ;;  %v8281_v60 = vcombine.low %v405_v47, %v409_v48 }
  0xcb   :  { %2902 = vmatprep.subr.bf16.mxu0 %v8178_v4  ;;  %3066 = vmatprep.subr.bf16.mxu1 %v8180_v8  ;;  %v370_v4 = vld [vmem:[#allocation2 + $0x7e8] sm:$0xff]  ;;  %v8242_v8 = vcombine.high %v365_v0, %v369_v1  ;;  %v421_v0 = vld [vmem:[#allocation2 + $0x980] sm:$0xff] }
  0xcc   :  { %v414_v58 = vld [vmem:[#allocation2 + $0x948] sm:$0xff]  ;;  %v425_v1 = vld [vmem:[#allocation2 + $0x9a0] sm:$0xff] }
  0xcd   :  { %v8298_v6 = vcombine.high %v421_v0, %v425_v1 }
  0xce   :  { %2903 = vmatpush1.bf16.msra.mxu0 %v8177_v10  ;;  %3067 = vmatpush1.bf16.msra.mxu1 %v8179_v11  ;;  %v374_v10 = vld [vmem:[#allocation2 + $0x808] sm:$0xff] }
  0xcf   :  { %2904 = vmatprep.subr.bf16.mxu0 %v8186_v13  ;;  %3068 = vmatprep.subr.bf16.mxu1 %v8188_v17  ;;  %v378_v11 = vld [vmem:[#allocation2 + $0x828] sm:$0xff]  ;;  %v8244_v13 = vcombine.high %v366_v2, %v370_v4  ;;  %v8243_v17 = vcombine.low %v366_v2, %v370_v4  ;;  %v8289_v4 = vcombine.low %v413_v55, %v417_v56 }
  0xd0   :  { %v8252_v22 = vcombine.high %v374_v10, %v378_v11  ;;  %v8251_v27 = vcombine.low %v374_v10, %v378_v11  ;;  %v422_v2 = vld [vmem:[#allocation2 + $0x988] sm:$0xff] }
  0xd1   :  { %v430_v10 = vld [vmem:[#allocation2 + $0x9c8] sm:$0xff] }
  0xd2   :  { %2905 = vmatpush1.bf16.msra.mxu0 %v8185_v19  ;;  %3069 = vmatpush1.bf16.msra.mxu1 %v8187_v20  ;;  %v385_v19 = vld [vmem:[#allocation2 + $0x860] sm:$0xff]  ;;  %v382_v20 = vld [vmem:[#allocation2 + $0x848] sm:$0xff] }
  0xd3   :  { %2906 = vmatprep.subr.bf16.mxu0 %v8194_v21  ;;  %3070 = vmatprep.subr.bf16.mxu1 %v8196_v25  ;;  %v386_v21 = vld [vmem:[#allocation2 + $0x868] sm:$0xff]  ;;  %v9584_v25 = vpack.c.bf16 %v105_v14, %v105_v14  ;;  %v8257_v35 = vcombine.low %v381_v16, %v385_v19 }
  0xd4   :  { %v8260_v31 = vcombine.high %v382_v20, %v386_v21  ;;  %v434_v11 = vld [vmem:[#allocation2 + $0x9e8] sm:$0xff] }
  0xd6   :  { %2907 = vmatpush1.bf16.msra.mxu0 %v8193_v28  ;;  %3071 = vmatpush1.bf16.msra.mxu1 %v8195_v29  ;;  %v8258_v28 = vcombine.high %v381_v16, %v385_v19  ;;  %v389_v29 = vld [vmem:[#allocation2 + $0x880] sm:$0xff]  ;;  %v8308_v16 = vcombine.high %v430_v10, %v434_v11  ;;  %v438_v19 = vld [vmem:[#allocation2 + $0xa08] sm:$0xff] }
  0xd7   :  { %2908 = vmatprep.subr.bf16.mxu0 %v8202_v30  ;;  %3072 = vmatprep.subr.bf16.mxu1 %v8204_v34  ;;  %v393_v30 = vld [vmem:[#allocation2 + $0x8a0] sm:$0xff]  ;;  %v394_v34 = vld [vmem:[#allocation2 + $0x8a8] sm:$0xff] }
  0xd8   :  { %v8265_v43 = vcombine.low %v389_v29, %v393_v30 }
  0xda   :  { %2909 = vmatpush1.bf16.msra.mxu0 %v8201_v36  ;;  %3073 = vmatpush1.bf16.msra.mxu1 %v8203_v37  ;;  %v8259_v36 = vcombine.low %v382_v20, %v386_v21  ;;  %v8266_v37 = vcombine.high %v389_v29, %v393_v30  ;;  %v442_v20 = vld [vmem:[#allocation2 + $0xa28] sm:$0xff] }
  0xdb   :  { %2910 = vmatprep.subr.bf16.mxu0 %v8210_v38  ;;  %3074 = vmatprep.subr.bf16.mxu1 %v8212_v42  ;;  %v8268_v38 = vcombine.high %v390_v32, %v394_v34  ;;  %v402_v42 = vld [vmem:[#allocation2 + $0x8e8] sm:$0xff] }
  0xdc   :  { %v446_v29 = vld [vmem:[#allocation2 + $0xa48] sm:$0xff] }
  0xdd   :  { %v450_v30 = vld [vmem:[#allocation2 + $0xa68] sm:$0xff] }
  0xde   :  { %2911 = vmatpush1.bf16.msra.mxu0 %v8209_v44  ;;  %3075 = vmatpush1.bf16.msra.mxu1 %v8211_v45  ;;  %v8267_v44 = vcombine.low %v390_v32, %v394_v34  ;;  %v8274_v45 = vcombine.high %v397_v39, %v401_v40  ;;  %v8315_v32 = vcombine.low %v438_v19, %v442_v20  ;;  %v458_v39 = vld [vmem:[#allocation2 + $0xaa8] sm:$0xff] }
  0xdf   :  { %2912 = vmatprep.subr.bf16.mxu0 %v8218_v46  ;;  %3076 = vmatprep.subr.bf16.mxu1 %v8220_v50  ;;  %v8276_v46 = vcombine.high %v398_v41, %v402_v42  ;;  %v410_v50 = vld [vmem:[#allocation2 + $0x928] sm:$0xff] }
  0xe2   :  { %2913 = vmatpush1.bf16.msra.mxu0 %v8217_v52  ;;  %3077 = vmatpush1.bf16.msra.mxu1 %v8219_v53  ;;  %v8275_v52 = vcombine.low %v398_v41, %v402_v42  ;;  %v8282_v53 = vcombine.high %v405_v47, %v409_v48  ;;  %v8323_v41 = vcombine.low %v446_v29, %v450_v30  ;;  %v466_v47 = vld [vmem:[#allocation2 + $0xae8] sm:$0xff] }
  0xe3   :  { %2914 = vmatprep.subr.bf16.mxu0 %v8226_v54  ;;  %3078 = vmatprep.subr.bf16.mxu1 %v8228_v59  ;;  %v8284_v54 = vcombine.high %v406_v49, %v410_v50  ;;  %v418_v59 = vld [vmem:[#allocation2 + $0x968] sm:$0xff] }
  0xe6   :  { %2915 = vmatpush1.bf16.msra.mxu0 %v8225_v61  ;;  %3079 = vmatpush1.bf16.msra.mxu1 %v8227_v62  ;;  %v8283_v61 = vcombine.low %v406_v49, %v410_v50  ;;  %v8290_v62 = vcombine.high %v413_v55, %v417_v56  ;;  %v474_v55 = vld [vmem:[#allocation2 + $0xb28] sm:$0xff] }
  0xe7   :  { %2916 = vmatprep.subr.bf16.mxu0 %v8234_v63  ;;  %3080 = vmatprep.subr.bf16.mxu1 %v8236_v3  ;;  %v8292_v63 = vcombine.high %v414_v58, %v418_v59  ;;  %v426_v3 = vld [vmem:[#allocation2 + $0x9a8] sm:$0xff] }
  0xe8   :  { %v8299_v14 = vcombine.low %v422_v2, %v426_v3 }
  0xea   :  { %2917 = vmatpush1.bf16.msra.mxu0 %v8233_v5  ;;  %3081 = vmatpush1.bf16.msra.mxu1 %v8235_v7  ;;  %v8291_v5 = vcombine.low %v414_v58, %v418_v59  ;;  %v8300_v7 = vcombine.high %v422_v2, %v426_v3 }
  0xeb   :  { %2918 = vmatprep.subr.bf16.mxu0 %v8242_v8  ;;  %3082 = vmatprep.subr.bf16.mxu1 %v8244_v13  ;;  %v429_v8 = vld [vmem:[#allocation2 + $0x9c0] sm:$0xff]  ;;  %v8297_v13 = vcombine.low %v421_v0, %v425_v1  ;;  %v482_v0 = vld [vmem:[#allocation2 + $0xb68] sm:$0xff] }
  0xec   :  { %v8305_v21 = vcombine.low %v429_v8, %v433_v9 }
  0xee   :  { %2919 = vmatpush1.bf16.msra.mxu0 %v8241_v15  ;;  %3083 = vmatpush1.bf16.msra.mxu1 %v8243_v17  ;;  %v8306_v15 = vcombine.high %v429_v8, %v433_v9  ;;  %v437_v17 = vld [vmem:[#allocation2 + $0xa00] sm:$0xff]  ;;  %v490_v8 = vld [vmem:[#allocation2 + $0xba8] sm:$0xff] }
  0xef   :  { %2929 = vmatprep.subr.bf16.mxu0 %v8250_v18  ;;  %3093 = vmatprep.subr.bf16.mxu1 %v8252_v22  ;;  %v441_v18 = vld [vmem:[#allocation2 + $0xa20] sm:$0xff]  ;;  %v8307_v22 = vcombine.low %v430_v10, %v434_v11 }
  0xf0   :  { %v8314_v24 = vcombine.high %v437_v17, %v441_v18 }
  0xf1   :  { %2921 = vmatmul.mubr.bf16.vlgmr.msra.gmra.mrb[0].mxu0 %v9584_v25  ;;  %3085 = vmatmul.mubr.bf16.vlgmr.msra.gmra.mrb[0].mxu1 %v9584_v25 }
  0xf2   :  { %2930 = vmatpush1.bf16.msra.mxu0 %v8249_v26  ;;  %3094 = vmatpush1.bf16.msra.mxu1 %v8251_v27  ;;  %v8316_v26 = vcombine.high %v438_v19, %v442_v20  ;;  %v445_v27 = vld [vmem:[#allocation2 + $0xa40] sm:$0xff] }
  0xf3   :  { %2931 = vmatprep.subr.bf16.mxu0 %v8258_v28  ;;  %3095 = vmatprep.subr.bf16.mxu1 %v8260_v31  ;;  %v449_v28 = vld [vmem:[#allocation2 + $0xa60] sm:$0xff]  ;;  %v8313_v31 = vcombine.low %v437_v17, %v441_v18  ;;  %v498_v17 = vld [vmem:[#allocation2 + $0xbe8] sm:$0xff] }
  0xf4   :  { %2961 = vmatprep.mubr.bf16.mxu0 %v9586_v33  ;;  %3125 = vmatprep.mubr.bf16.mxu1 %v9586_v33  ;;  %v8322_v34 = vcombine.high %v445_v27, %v449_v28  ;;  %v8321_v40 = vcombine.low %v445_v27, %v449_v28  ;;  %v506_v27 = vld [vmem:[#allocation2 + $0xc28] sm:$0xff] }
  0xf6   :  { %2932 = vmatpush1.bf16.msra.mxu0 %v8257_v35  ;;  %3096 = vmatpush1.bf16.msra.mxu1 %v8259_v36  ;;  %v8324_v35 = vcombine.high %v446_v29, %v450_v30  ;;  %v453_v36 = vld [vmem:[#allocation2 + $0xa80] sm:$0xff] }
  0xf7   :  { %2933 = vmatprep.subr.bf16.mxu0 %v8266_v37  ;;  %3097 = vmatprep.subr.bf16.mxu1 %v8268_v38  ;;  %v457_v37 = vld [vmem:[#allocation2 + $0xaa0] sm:$0xff]  ;;  %v454_v38 = vld [vmem:[#allocation2 + $0xa88] sm:$0xff] }
  0xf8   :  { %v8330_v42 = vcombine.high %v453_v36, %v457_v37  ;;  %v8329_v48 = vcombine.low %v453_v36, %v457_v37  ;;  %v8331_v49 = vcombine.low %v454_v38, %v458_v39  ;;  %v107_v29 = vld [vmem:[%s9763_s0 + $0x20] sm:$0xff]  ;;  %v510_v37 = vld [vmem:[#allocation2 + $0xc48] sm:$0xff] }
  0xf9   :  { %v9595_v36 = vpack.c.bf16 %v107_v29, %v107_v29 }
  0xfa   :  { %2934 = vmatpush1.bf16.msra.mxu0 %v8265_v43  ;;  %3098 = vmatpush1.bf16.msra.mxu1 %v8267_v44  ;;  %v8332_v43 = vcombine.high %v454_v38, %v458_v39  ;;  %v461_v44 = vld [vmem:[#allocation2 + $0xac0] sm:$0xff]  ;;  %v514_v38 = vld [vmem:[#allocation2 + $0xc68] sm:$0xff] }
  0xfb   :  { %2935 = vmatprep.subr.bf16.mxu0 %v8274_v45  ;;  %3099 = vmatprep.subr.bf16.mxu1 %v8276_v46  ;;  %v465_v45 = vld [vmem:[#allocation2 + $0xae0] sm:$0xff]  ;;  %v462_v46 = vld [vmem:[#allocation2 + $0xac8] sm:$0xff] }
  0xfc   :  { %v8338_v50 = vcombine.high %v461_v44, %v465_v45  ;;  %v8337_v56 = vcombine.low %v461_v44, %v465_v45  ;;  %v8339_v58 = vcombine.low %v462_v46, %v466_v47  ;;  %v521_v44 = vld [vmem:[#allocation2 + $0xca0] sm:$0xff]  ;;  %v518_v45 = vld [vmem:[#allocation2 + $0xc88] sm:$0xff] }
  0xfe   :  { %2936 = vmatpush1.bf16.msra.mxu0 %v8273_v51  ;;  %3100 = vmatpush1.bf16.msra.mxu1 %v8275_v52  ;;  %v8340_v51 = vcombine.high %v462_v46, %v466_v47  ;;  %v469_v52 = vld [vmem:[#allocation2 + $0xb00] sm:$0xff]  ;;  %v522_v46 = vld [vmem:[#allocation2 + $0xca8] sm:$0xff] }
  0xff   :  { %2937 = vmatprep.subr.bf16.mxu0 %v8282_v53  ;;  %3101 = vmatprep.subr.bf16.mxu1 %v8284_v54  ;;  %v473_v53 = vld [vmem:[#allocation2 + $0xb20] sm:$0xff]  ;;  %v470_v54 = vld [vmem:[#allocation2 + $0xb08] sm:$0xff] }
 0x100   :  { %v8346_v59 = vcombine.high %v469_v52, %v473_v53  ;;  %v8345_v1 = vcombine.low %v469_v52, %v473_v53  ;;  %v8347_v2 = vcombine.low %v470_v54, %v474_v55  ;;  %v529_v52 = vld [vmem:[#allocation2 + $0xce0] sm:$0xff]  ;;  %v9444_v53 = vmov 0  }
 0x102   :  { %2938 = vmatpush1.bf16.msra.mxu0 %v8281_v60  ;;  %3102 = vmatpush1.bf16.msra.mxu1 %v8283_v61  ;;  %v8348_v60 = vcombine.high %v470_v54, %v474_v55  ;;  %v477_v61 = vld [vmem:[#allocation2 + $0xb40] sm:$0xff]  ;;  %v526_v54 = vld [vmem:[#allocation2 + $0xcc8] sm:$0xff] }
 0x103   :  { %2939 = vmatprep.subr.bf16.mxu0 %v8290_v62  ;;  %3103 = vmatprep.subr.bf16.mxu1 %v8292_v63  ;;  %v481_v62 = vld [vmem:[#allocation2 + $0xb60] sm:$0xff]  ;;  %v478_v63 = vld [vmem:[#allocation2 + $0xb48] sm:$0xff] }
 0x104   :  { %v8354_v3 = vcombine.high %v477_v61, %v481_v62  ;;  %v8353_v9 = vcombine.low %v477_v61, %v481_v62  ;;  %v8355_v10 = vcombine.low %v478_v63, %v482_v0  ;;  %v530_v55 = vld [vmem:[#allocation2 + $0xce8] sm:$0xff]  ;;  %v533_v61 = vld [vmem:[#allocation2 + $0xd00] sm:$0xff] }
 0x105   :  { %v537_v62 = vld [vmem:[#allocation2 + $0xd20] sm:$0xff] }
 0x106   :  { %2940 = vmatpush1.bf16.msra.mxu0 %v8289_v4  ;;  %3104 = vmatpush1.bf16.msra.mxu1 %v8291_v5  ;;  %v8356_v4 = vcombine.high %v478_v63, %v482_v0  ;;  %v485_v5 = vld [vmem:[#allocation2 + $0xb80] sm:$0xff]  ;;  %v534_v63 = vld [vmem:[#allocation2 + $0xd08] sm:$0xff] }
 0x107   :  { %2941 = vmatprep.subr.bf16.mxu0 %v8298_v6  ;;  %3105 = vmatprep.subr.bf16.mxu1 %v8300_v7  ;;  %v489_v6 = vld [vmem:[#allocation2 + $0xba0] sm:$0xff]  ;;  %v486_v7 = vld [vmem:[#allocation2 + $0xb88] sm:$0xff] }
 0x108   :  { %v8362_v11 = vcombine.high %v485_v5, %v489_v6  ;;  %v8361_v18 = vcombine.low %v485_v5, %v489_v6  ;;  %v8363_v19 = vcombine.low %v486_v7, %v490_v8  ;;  %v538_v0 = vld [vmem:[#allocation2 + $0xd28] sm:$0xff]  ;;  %v541_v5 = vld [vmem:[#allocation2 + $0xd40] sm:$0xff] }
 0x109   :  { %v545_v6 = vld [vmem:[#allocation2 + $0xd60] sm:$0xff] }
 0x10a   :  { %2942 = vmatpush1.bf16.msra.mxu0 %v8297_v13  ;;  %3106 = vmatpush1.bf16.msra.mxu1 %v8299_v14  ;;  %v8364_v13 = vcombine.high %v486_v7, %v490_v8  ;;  %v493_v14 = vld [vmem:[#allocation2 + $0xbc0] sm:$0xff]  ;;  %v542_v7 = vld [vmem:[#allocation2 + $0xd48] sm:$0xff] }
 0x10b   :  { %2943 = vmatprep.subr.bf16.mxu0 %v8306_v15  ;;  %3107 = vmatprep.subr.bf16.mxu1 %v8308_v16  ;;  %v497_v15 = vld [vmem:[#allocation2 + $0xbe0] sm:$0xff]  ;;  %v494_v16 = vld [vmem:[#allocation2 + $0xbc8] sm:$0xff] }
 0x10c   :  { %v8370_v20 = vcombine.high %v493_v14, %v497_v15  ;;  %v8369_v28 = vcombine.low %v493_v14, %v497_v15  ;;  %v8371_v30 = vcombine.low %v494_v16, %v498_v17  ;;  %v546_v8 = vld [vmem:[#allocation2 + $0xd68] sm:$0xff]  ;;  %v549_v14 = vld [vmem:[#allocation2 + $0xd80] sm:$0xff] }
 0x10d   :  { %v553_v15 = vld [vmem:[#allocation2 + $0xda0] sm:$0xff] }
 0x10e   :  { %2944 = vmatpush1.bf16.msra.mxu0 %v8305_v21  ;;  %3108 = vmatpush1.bf16.msra.mxu1 %v8307_v22  ;;  %v8372_v21 = vcombine.high %v494_v16, %v498_v17  ;;  %v501_v22 = vld [vmem:[#allocation2 + $0xc00] sm:$0xff]  ;;  %v550_v16 = vld [vmem:[#allocation2 + $0xd88] sm:$0xff] }
 0x10f   :  { %2945 = vmatprep.subr.bf16.mxu0 %v8314_v24  ;;  %3109 = vmatprep.subr.bf16.mxu1 %v8316_v26  ;;  %v505_v24 = vld [vmem:[#allocation2 + $0xc20] sm:$0xff]  ;;  %v502_v26 = vld [vmem:[#allocation2 + $0xc08] sm:$0xff] }
 0x110   :  { %v8377_v39 = vcombine.low %v501_v22, %v505_v24  ;;  %v554_v17 = vld [vmem:[#allocation2 + $0xda8] sm:$0xff] }
 0x111   :  { %v8427_v29 = vcombine.low %v550_v16, %v554_v17 }
 0x112   :  { %2946 = vmatpush1.bf16.msra.mxu0 %v8313_v31  ;;  %3110 = vmatpush1.bf16.msra.mxu1 %v8315_v32  ;;  %v8378_v31 = vcombine.high %v501_v22, %v505_v24  ;;  %v8380_v32 = vcombine.high %v502_v26, %v506_v27  ;;  %v557_v22 = vld [vmem:[#allocation2 + $0xdc0] sm:$0xff] }
 0x113   :  { %2947 = vmatprep.subr.bf16.mxu0 %v8322_v34  ;;  %3111 = vmatprep.subr.bf16.mxu1 %v8324_v35  ;;  %v509_v34 = vld [vmem:[#allocation2 + $0xc40] sm:$0xff] }
 0x114   :  { %v513_v35 = vld [vmem:[#allocation2 + $0xc60] sm:$0xff] }
 0x115   :  { %v8385_v47 = vcombine.low %v509_v34, %v513_v35  ;;  %v561_v24 = vld [vmem:[#allocation2 + $0xde0] sm:$0xff] }
 0x116   :  { %2948 = vmatpush1.bf16.msra.mxu0 %v8321_v40  ;;  %3112 = vmatpush1.bf16.msra.mxu1 %v8323_v41  ;;  %v8379_v40 = vcombine.low %v502_v26, %v506_v27  ;;  %v8386_v41 = vcombine.high %v509_v34, %v513_v35  ;;  %v558_v26 = vld [vmem:[#allocation2 + $0xdc8] sm:$0xff]  ;;  %v123_v34 = vld [vmem:[#allocation2 + $0x30] sm:$0xff]  ;;  %v120_v35 = vld [vmem:[#allocation2 + $0x18] sm:$0xff] }
 0x117   :  { %2949 = vmatprep.subr.bf16.mxu0 %v8330_v42  ;;  %3113 = vmatprep.subr.bf16.mxu1 %v8332_v43  ;;  %v8388_v42 = vcombine.high %v510_v37, %v514_v38  ;;  %v517_v43 = vld [vmem:[#allocation2 + $0xc80] sm:$0xff]  ;;  %v562_v27 = vld [vmem:[#allocation2 + $0xde8] sm:$0xff] }
 0x11a   :  { %2950 = vmatpush1.bf16.msra.mxu0 %v8329_v48  ;;  %3114 = vmatpush1.bf16.msra.mxu1 %v8331_v49  ;;  %v8387_v48 = vcombine.low %v510_v37, %v514_v38  ;;  %v8394_v49 = vcombine.high %v517_v43, %v521_v44  ;;  %v124_v37 = vld [vmem:[#allocation2 + $0x38] sm:$0xff]  ;;  %v8433_v38 = vcombine.low %v557_v22, %v561_v24 }
 0x11b   :  { %2951 = vmatprep.subr.bf16.mxu0 %v8338_v50  ;;  %3115 = vmatprep.subr.bf16.mxu1 %v8340_v51  ;;  %v8396_v50 = vcombine.high %v518_v45, %v522_v46  ;;  %v525_v51 = vld [vmem:[#allocation2 + $0xcc0] sm:$0xff] }
 0x11e   :  { %2952 = vmatpush1.bf16.msra.mxu0 %v8337_v56  ;;  %3116 = vmatpush1.bf16.msra.mxu1 %v8339_v58  ;;  %v8393_v56 = vcombine.low %v517_v43, %v521_v44  ;;  %v8395_v58 = vcombine.low %v518_v45, %v522_v46  ;;  %v127_v43 = vld [vmem:[#allocation2 + $0x50] sm:$0xff]  ;;  %v128_v46 = vld [vmem:[#allocation2 + $0x58] sm:$0xff] }
 0x11f   :  { %2953 = vmatprep.subr.bf16.mxu0 %v8346_v59  ;;  %3117 = vmatprep.subr.bf16.mxu1 %v8348_v60  ;;  %v8402_v59 = vcombine.high %v525_v51, %v529_v52  ;;  %v8404_v60 = vcombine.high %v526_v54, %v530_v55  ;;  %v131_v44 = vld [vmem:[#allocation2 + $0x70] sm:$0xff] }
 0x122   :  { %2954 = vmatpush1.bf16.msra.mxu0 %v8345_v1  ;;  %3118 = vmatpush1.bf16.msra.mxu1 %v8347_v2  ;;  %v8401_v1 = vcombine.low %v525_v51, %v529_v52  ;;  %v8403_v2 = vcombine.low %v526_v54, %v530_v55  ;;  %v135_v52 = vld [vmem:[#allocation2 + $0x90] sm:$0xff]  ;;  %v136_v55 = vld [vmem:[#allocation2 + $0x98] sm:$0xff] }
 0x123   :  { %2955 = vmatprep.subr.bf16.mxu0 %v8354_v3  ;;  %3119 = vmatprep.subr.bf16.mxu1 %v8356_v4  ;;  %v8410_v3 = vcombine.high %v533_v61, %v537_v62  ;;  %v8412_v4 = vcombine.high %v534_v63, %v538_v0  ;;  %v139_v54 = vld [vmem:[#allocation2 + $0xb0] sm:$0xff] }
 0x126   :  { %2956 = vmatpush1.bf16.msra.mxu0 %v8353_v9  ;;  %3120 = vmatpush1.bf16.msra.mxu1 %v8355_v10  ;;  %v8409_v9 = vcombine.low %v533_v61, %v537_v62  ;;  %v8411_v10 = vcombine.low %v534_v63, %v538_v0  ;;  %v143_v62 = vld [vmem:[#allocation2 + $0xd0] sm:$0xff]  ;;  %v144_v0 = vld [vmem:[#allocation2 + $0xd8] sm:$0xff] }
 0x127   :  { %2957 = vmatprep.subr.bf16.mxu0 %v8362_v11  ;;  %3121 = vmatprep.subr.bf16.mxu1 %v8364_v13  ;;  %v8418_v11 = vcombine.high %v541_v5, %v545_v6  ;;  %v8420_v13 = vcombine.high %v542_v7, %v546_v8  ;;  %v147_v63 = vld [vmem:[#allocation2 + $0xf0] sm:$0xff] }
 0x12a   :  { %2958 = vmatpush1.bf16.msra.mxu0 %v8361_v18  ;;  %3122 = vmatpush1.bf16.msra.mxu1 %v8363_v19  ;;  %v8417_v18 = vcombine.low %v541_v5, %v545_v6  ;;  %v8419_v19 = vcombine.low %v542_v7, %v546_v8  ;;  %v151_v6 = vld [vmem:[#allocation2 + $0x110] sm:$0xff]  ;;  %v152_v8 = vld [vmem:[#allocation2 + $0x118] sm:$0xff] }
 0x12b   :  { %2959 = vmatprep.subr.bf16.mxu0 %v8370_v20  ;;  %3123 = vmatprep.subr.bf16.mxu1 %v8372_v21  ;;  %v8426_v20 = vcombine.high %v549_v14, %v553_v15  ;;  %v8428_v21 = vcombine.high %v550_v16, %v554_v17  ;;  %v155_v7 = vld [vmem:[#allocation2 + $0x130] sm:$0xff]  ;;  %v160_v16 = vld [vmem:[#allocation2 + $0x158] sm:$0xff] }
 0x12c   :  { %v164_v17 = vld [vmem:[#allocation2 + $0x178] sm:$0xff] }
 0x12e   :  { %2960 = vmatpush1.bf16.msra.mxu0 %v8369_v28  ;;  %3124 = vmatpush1.bf16.msra.mxu1 %v8371_v30  ;;  %v8425_v28 = vcombine.low %v549_v14, %v553_v15  ;;  %v8434_v30 = vcombine.high %v557_v22, %v561_v24  ;;  %v159_v14 = vld [vmem:[#allocation2 + $0x150] sm:$0xff] }
 0x12f   :  { %2970 = vmatprep.subr.bf16.mxu0 %v8378_v31  ;;  %3134 = vmatprep.subr.bf16.mxu1 %v8380_v32  ;;  %v8436_v31 = vcombine.high %v558_v26, %v562_v27  ;;  %v119_v32 = vld [vmem:[#allocation2 + $0x10] sm:$0xff] }
 0x130   :  { %v163_v15 = vld [vmem:[#allocation2 + $0x170] sm:$0xff] }
 0x131   :  { %2962 = vmatmul.mubr.bf16.vlgmr.msra.gmra.mrb[0].mxu0 %v9595_v36  ;;  %3126 = vmatmul.mubr.bf16.vlgmr.msra.gmra.mrb[0].mxu1 %v9595_v36  ;;  %v167_v22 = vld [vmem:[#allocation2 + $0x190] sm:$0xff] }
 0x132   :  { %2971 = vmatpush1.bf16.msra.mxu0 %v8377_v39  ;;  %3135 = vmatpush1.bf16.msra.mxu1 %v8379_v40  ;;  %v109_v39 = vld [vmem:[%s9763_s0 + $0x30] sm:$0xff]  ;;  %v8435_v40 = vcombine.low %v558_v26, %v562_v27  ;;  %v168_v26 = vld [vmem:[#allocation2 + $0x198] sm:$0xff] }
 0x133   :  { %2972 = vmatprep.subr.bf16.mxu0 %v8386_v41  ;;  %3136 = vmatprep.subr.bf16.mxu1 %v8388_v42  ;;  %v7998_v41 = vcombine.high %v119_v32, %v123_v34  ;;  %v8000_v42 = vcombine.high %v120_v35, %v124_v37  ;;  %v9604_v45 = vpack.c.bf16 %v109_v39, %v109_v39  ;;  %v171_v24 = vld [vmem:[#allocation2 + $0x1b0] sm:$0xff]  ;;  %v172_v27 = vld [vmem:[#allocation2 + $0x1b8] sm:$0xff] }
 0x134   :  { %3002 = vmatprep.mubr.bf16.mxu0 %v9444_v53  ;;  %3166 = vmatprep.mubr.bf16.mxu1 %v9444_v53  ;;  %v8047_v39 = vcombine.low %v168_v26, %v172_v27 }
 0x136   :  { %2973 = vmatpush1.bf16.msra.mxu0 %v8385_v47  ;;  %3137 = vmatpush1.bf16.msra.mxu1 %v8387_v48  ;;  %v132_v47 = vld [vmem:[#allocation2 + $0x78] sm:$0xff]  ;;  %v7997_v48 = vcombine.low %v119_v32, %v123_v34  ;;  %v175_v32 = vld [vmem:[#allocation2 + $0x1d0] sm:$0xff] }
 0x137   :  { %2974 = vmatprep.subr.bf16.mxu0 %v8394_v49  ;;  %3138 = vmatprep.subr.bf16.mxu1 %v8396_v50  ;;  %v7999_v49 = vcombine.low %v120_v35, %v124_v37  ;;  %v8006_v50 = vcombine.high %v127_v43, %v131_v44  ;;  %v8008_v51 = vcombine.high %v128_v46, %v132_v47  ;;  %v179_v34 = vld [vmem:[#allocation2 + $0x1f0] sm:$0xff]  ;;  %v176_v35 = vld [vmem:[#allocation2 + $0x1d8] sm:$0xff] }
 0x138   :  { %v180_v37 = vld [vmem:[#allocation2 + $0x1f8] sm:$0xff] }
 0x13a   :  { %2975 = vmatpush1.bf16.msra.mxu0 %v8393_v56  ;;  %3139 = vmatpush1.bf16.msra.mxu1 %v8395_v58  ;;  %v140_v56 = vld [vmem:[#allocation2 + $0xb8] sm:$0xff]  ;;  %v8005_v58 = vcombine.low %v127_v43, %v131_v44  ;;  %v187_v43 = vld [vmem:[#allocation2 + $0x230] sm:$0xff] }
 0x13b   :  { %2976 = vmatprep.subr.bf16.mxu0 %v8402_v59  ;;  %3140 = vmatprep.subr.bf16.mxu1 %v8404_v60  ;;  %v8007_v59 = vcombine.low %v128_v46, %v132_v47  ;;  %v8014_v60 = vcombine.high %v135_v52, %v139_v54  ;;  %v8016_v61 = vcombine.high %v136_v55, %v140_v56  ;;  %v184_v44 = vld [vmem:[#allocation2 + $0x218] sm:$0xff] }
 0x13c   :  { %v188_v46 = vld [vmem:[#allocation2 + $0x238] sm:$0xff]  ;;  %v8053_v47 = vcombine.low %v175_v32, %v179_v34 }
 0x13e   :  { %2977 = vmatpush1.bf16.msra.mxu0 %v8401_v1  ;;  %3141 = vmatpush1.bf16.msra.mxu1 %v8403_v2  ;;  %v148_v1 = vld [vmem:[#allocation2 + $0xf8] sm:$0xff]  ;;  %v8013_v2 = vcombine.low %v135_v52, %v139_v54  ;;  %v195_v52 = vld [vmem:[#allocation2 + $0x270] sm:$0xff] }
 0x13f   :  { %2978 = vmatprep.subr.bf16.mxu0 %v8410_v3  ;;  %3142 = vmatprep.subr.bf16.mxu1 %v8412_v4  ;;  %v8015_v3 = vcombine.low %v136_v55, %v140_v56  ;;  %v8022_v4 = vcombine.high %v143_v62, %v147_v63  ;;  %v8024_v5 = vcombine.high %v144_v0, %v148_v1  ;;  %v192_v54 = vld [vmem:[#allocation2 + $0x258] sm:$0xff] }
 0x140   :  { %v196_v55 = vld [vmem:[#allocation2 + $0x278] sm:$0xff] }
 0x142   :  { %2979 = vmatpush1.bf16.msra.mxu0 %v8409_v9  ;;  %3143 = vmatpush1.bf16.msra.mxu1 %v8411_v10  ;;  %v156_v9 = vld [vmem:[#allocation2 + $0x138] sm:$0xff]  ;;  %v8021_v10 = vcombine.low %v143_v62, %v147_v63  ;;  %v203_v62 = vld [vmem:[#allocation2 + $0x2b0] sm:$0xff] }
 0x143   :  { %2980 = vmatprep.subr.bf16.mxu0 %v8418_v11  ;;  %3144 = vmatprep.subr.bf16.mxu1 %v8420_v13  ;;  %v8023_v11 = vcombine.low %v144_v0, %v148_v1  ;;  %v8030_v13 = vcombine.high %v151_v6, %v155_v7  ;;  %v200_v63 = vld [vmem:[#allocation2 + $0x298] sm:$0xff] }
 0x144   :  { %v204_v0 = vld [vmem:[#allocation2 + $0x2b8] sm:$0xff] }
 0x146   :  { %2981 = vmatpush1.bf16.msra.mxu0 %v8417_v18  ;;  %3145 = vmatpush1.bf16.msra.mxu1 %v8419_v19  ;;  %v8029_v18 = vcombine.low %v151_v6, %v155_v7  ;;  %v8031_v19 = vcombine.low %v152_v8, %v156_v9  ;;  %v211_v6 = vld [vmem:[#allocation2 + $0x2f0] sm:$0xff]  ;;  %v208_v7 = vld [vmem:[#allocation2 + $0x2d8] sm:$0xff] }
 0x147   :  { %2982 = vmatprep.subr.bf16.mxu0 %v8426_v20  ;;  %3146 = vmatprep.subr.bf16.mxu1 %v8428_v21  ;;  %v8038_v20 = vcombine.high %v159_v14, %v163_v15  ;;  %v8040_v21 = vcombine.high %v160_v16, %v164_v17 }
 0x14a   :  { %2983 = vmatpush1.bf16.msra.mxu0 %v8425_v28  ;;  %3147 = vmatpush1.bf16.msra.mxu1 %v8427_v29  ;;  %v8037_v28 = vcombine.low %v159_v14, %v163_v15  ;;  %v8039_v29 = vcombine.low %v160_v16, %v164_v17  ;;  %v219_v14 = vld [vmem:[#allocation2 + $0x330] sm:$0xff]  ;;  %v216_v15 = vld [vmem:[#allocation2 + $0x318] sm:$0xff] }
 0x14b   :  { %2984 = vmatprep.subr.bf16.mxu0 %v8434_v30  ;;  %3148 = vmatprep.subr.bf16.mxu1 %v8436_v31  ;;  %v8046_v30 = vcombine.high %v167_v22, %v171_v24  ;;  %v8048_v31 = vcombine.high %v168_v26, %v172_v27  ;;  %v220_v16 = vld [vmem:[#allocation2 + $0x338] sm:$0xff] }
 0x14c   :  { %v228_v26 = vld [vmem:[#allocation2 + $0x378] sm:$0xff] }
 0x14e   :  { %2985 = vmatpush1.bf16.msra.mxu0 %v8433_v38  ;;  %3149 = vmatpush1.bf16.msra.mxu1 %v8435_v40  ;;  %v8045_v38 = vcombine.low %v167_v22, %v171_v24  ;;  %v8054_v40 = vcombine.high %v175_v32, %v179_v34  ;;  %v227_v22 = vld [vmem:[#allocation2 + $0x370] sm:$0xff]  ;;  %v224_v24 = vld [vmem:[#allocation2 + $0x358] sm:$0xff] }
 0x14f   :  { %3175 = vmatprep.subr.bf16.mxu0 %v7998_v41  ;;  %3339 = vmatprep.subr.bf16.mxu1 %v8000_v42  ;;  %v8056_v41 = vcombine.high %v176_v35, %v180_v37  ;;  %v183_v42 = vld [vmem:[#allocation2 + $0x210] sm:$0xff]  ;;  %v232_v34 = vld [vmem:[#allocation2 + $0x398] sm:$0xff] }
 0x150   :  { %v8061_v56 = vcombine.low %v183_v42, %v187_v43  ;;  %v235_v32 = vld [vmem:[#allocation2 + $0x3b0] sm:$0xff] }
 0x151   :  { %3003 = vmatmul.mubr.bf16.vlgmr.msra.gmra.mrb[0].mxu0 %v9604_v45  ;;  %3167 = vmatmul.mubr.bf16.vlgmr.msra.gmra.mrb[0].mxu1 %v9604_v45 }
 0x152   :  { %3176 = vmatpush1.bf16.msra.mxu0 %v7997_v48  ;;  %3340 = vmatpush1.bf16.msra.mxu1 %v7999_v49  ;;  %v8055_v48 = vcombine.low %v176_v35, %v180_v37  ;;  %v8062_v49 = vcombine.high %v183_v42, %v187_v43  ;;  %v236_v35 = vld [vmem:[#allocation2 + $0x3b8] sm:$0xff]  ;;  %v243_v42 = vld [vmem:[#allocation2 + $0x3f0] sm:$0xff] }
 0x153   :  { %3177 = vmatprep.subr.bf16.mxu0 %v8006_v50  ;;  %3341 = vmatprep.subr.bf16.mxu1 %v8008_v51  ;;  %v8064_v50 = vcombine.high %v184_v44, %v188_v46  ;;  %v191_v51 = vld [vmem:[#allocation2 + $0x250] sm:$0xff]  ;;  %v240_v43 = vld [vmem:[#allocation2 + $0x3d8] sm:$0xff] }
 0x154   :  { %3207 = vmatprep.mubr.bf16.mxu0 %v9560_v57  ;;  %3371 = vmatprep.mubr.bf16.mxu1 %v9560_v57  ;;  %v8032_v57 = vcombine.high %v152_v8, %v156_v9  ;;  %v8069_v1 = vcombine.low %v191_v51, %v195_v52  ;;  %v212_v8 = vld [vmem:[#allocation2 + $0x2f8] sm:$0xff] }
 0x156   :  { %3178 = vmatpush1.bf16.msra.mxu0 %v8005_v58  ;;  %3342 = vmatpush1.bf16.msra.mxu1 %v8007_v59  ;;  %v8063_v58 = vcombine.low %v184_v44, %v188_v46  ;;  %v8070_v59 = vcombine.high %v191_v51, %v195_v52  ;;  %v244_v44 = vld [vmem:[#allocation2 + $0x3f8] sm:$0xff]  ;;  %v251_v51 = vld [vmem:[#allocation2 + $0x430] sm:$0xff] }
 0x157   :  { %3179 = vmatprep.subr.bf16.mxu0 %v8014_v60  ;;  %3343 = vmatprep.subr.bf16.mxu1 %v8016_v61  ;;  %v8072_v60 = vcombine.high %v192_v54, %v196_v55  ;;  %v199_v61 = vld [vmem:[#allocation2 + $0x290] sm:$0xff]  ;;  %v248_v52 = vld [vmem:[#allocation2 + $0x418] sm:$0xff] }
 0x158   :  { %v8077_v9 = vcombine.low %v199_v61, %v203_v62 }
 0x15a   :  { %3180 = vmatpush1.bf16.msra.mxu0 %v8013_v2  ;;  %3344 = vmatpush1.bf16.msra.mxu1 %v8015_v3  ;;  %v8071_v2 = vcombine.low %v192_v54, %v196_v55  ;;  %v8078_v3 = vcombine.high %v199_v61, %v203_v62  ;;  %v252_v54 = vld [vmem:[#allocation2 + $0x438] sm:$0xff]  ;;  %v259_v61 = vld [vmem:[#allocation2 + $0x470] sm:$0xff] }
 0x15b   :  { %3181 = vmatprep.subr.bf16.mxu0 %v8022_v4  ;;  %3345 = vmatprep.subr.bf16.mxu1 %v8024_v5  ;;  %v8080_v4 = vcombine.high %v200_v63, %v204_v0  ;;  %v207_v5 = vld [vmem:[#allocation2 + $0x2d0] sm:$0xff]  ;;  %v256_v62 = vld [vmem:[#allocation2 + $0x458] sm:$0xff] }
 0x15c   :  { %v8085_v17 = vcombine.low %v207_v5, %v211_v6 }
 0x15e   :  { %3182 = vmatpush1.bf16.msra.mxu0 %v8021_v10  ;;  %3346 = vmatpush1.bf16.msra.mxu1 %v8023_v11  ;;  %v8079_v10 = vcombine.low %v200_v63, %v204_v0  ;;  %v8086_v11 = vcombine.high %v207_v5, %v211_v6  ;;  %v260_v63 = vld [vmem:[#allocation2 + $0x478] sm:$0xff]  ;;  %v267_v5 = vld [vmem:[#allocation2 + $0x4b0] sm:$0xff] }
 0x15f   :  { %3183 = vmatprep.subr.bf16.mxu0 %v8030_v13  ;;  %3347 = vmatprep.subr.bf16.mxu1 %v8032_v57  ;;  %v8088_v13 = vcombine.high %v208_v7, %v212_v8  ;;  %v215_v57 = vld [vmem:[#allocation2 + $0x310] sm:$0xff]  ;;  %v264_v6 = vld [vmem:[#allocation2 + $0x498] sm:$0xff] }
 0x160   :  { %v8093_v27 = vcombine.low %v215_v57, %v219_v14 }
 0x162   :  { %3184 = vmatpush1.bf16.msra.mxu0 %v8029_v18  ;;  %3348 = vmatpush1.bf16.msra.mxu1 %v8031_v19  ;;  %v8087_v18 = vcombine.low %v208_v7, %v212_v8  ;;  %v8094_v19 = vcombine.high %v215_v57, %v219_v14  ;;  %v268_v7 = vld [vmem:[#allocation2 + $0x4b8] sm:$0xff]  ;;  %v275_v57 = vld [vmem:[#allocation2 + $0x4f0] sm:$0xff] }
 0x163   :  { %3185 = vmatprep.subr.bf16.mxu0 %v8038_v20  ;;  %3349 = vmatprep.subr.bf16.mxu1 %v8040_v21  ;;  %v8096_v20 = vcombine.high %v216_v15, %v220_v16  ;;  %v223_v21 = vld [vmem:[#allocation2 + $0x350] sm:$0xff]  ;;  %v272_v14 = vld [vmem:[#allocation2 + $0x4d8] sm:$0xff] }
 0x164   :  { %v8101_v37 = vcombine.low %v223_v21, %v227_v22 }
 0x166   :  { %3186 = vmatpush1.bf16.msra.mxu0 %v8037_v28  ;;  %3350 = vmatpush1.bf16.msra.mxu1 %v8039_v29  ;;  %v8095_v28 = vcombine.low %v216_v15, %v220_v16  ;;  %v8102_v29 = vcombine.high %v223_v21, %v227_v22  ;;  %v276_v15 = vld [vmem:[#allocation2 + $0x4f8] sm:$0xff] }
 0x167   :  { %3187 = vmatprep.subr.bf16.mxu0 %v8046_v30  ;;  %3351 = vmatprep.subr.bf16.mxu1 %v8048_v31  ;;  %v8104_v30 = vcombine.high %v224_v24, %v228_v26  ;;  %v231_v31 = vld [vmem:[#allocation2 + $0x390] sm:$0xff]  ;;  %v280_v21 = vld [vmem:[#allocation2 + $0x518] sm:$0xff] }
 0x168   :  { %v8109_v46 = vcombine.low %v231_v31, %v235_v32  ;;  %v284_v22 = vld [vmem:[#allocation2 + $0x538] sm:$0xff] }
 0x16a   :  { %3188 = vmatpush1.bf16.msra.mxu0 %v8045_v38  ;;  %3352 = vmatpush1.bf16.msra.mxu1 %v8047_v39  ;;  %v8103_v38 = vcombine.low %v224_v24, %v228_v26  ;;  %v8110_v39 = vcombine.high %v231_v31, %v235_v32  ;;  %v8151_v26 = vcombine.low %v272_v14, %v276_v15  ;;  %v292_v31 = vld [vmem:[#allocation2 + $0x578] sm:$0xff] }
 0x16b   :  { %3189 = vmatprep.subr.bf16.mxu0 %v8054_v40  ;;  %3353 = vmatprep.subr.bf16.mxu1 %v8056_v41  ;;  %v8112_v40 = vcombine.high %v232_v34, %v236_v35  ;;  %v239_v41 = vld [vmem:[#allocation2 + $0x3d0] sm:$0xff] }
 0x16c   :  { %v8117_v55 = vcombine.low %v239_v41, %v243_v42 }
 0x16e   :  { %3190 = vmatpush1.bf16.msra.mxu0 %v8053_v47  ;;  %3354 = vmatpush1.bf16.msra.mxu1 %v8055_v48  ;;  %v8111_v47 = vcombine.low %v232_v34, %v236_v35  ;;  %v8118_v48 = vcombine.high %v239_v41, %v243_v42  ;;  %v8159_v34 = vcombine.low %v280_v21, %v284_v22  ;;  %v300_v41 = vld [vmem:[#allocation2 + $0x5b8] sm:$0xff] }
 0x16f   :  { %3191 = vmatprep.subr.bf16.mxu0 %v8062_v49  ;;  %3355 = vmatprep.subr.bf16.mxu1 %v8064_v50  ;;  %v8120_v49 = vcombine.high %v240_v43, %v244_v44  ;;  %v247_v50 = vld [vmem:[#allocation2 + $0x410] sm:$0xff] }
 0x170   :  { %v8125_v0 = vcombine.low %v247_v50, %v251_v51 }
 0x172   :  { %3192 = vmatpush1.bf16.msra.mxu0 %v8061_v56  ;;  %3356 = vmatpush1.bf16.msra.mxu1 %v8063_v58  ;;  %v8119_v56 = vcombine.low %v240_v43, %v244_v44  ;;  %v8126_v58 = vcombine.high %v247_v50, %v251_v51  ;;  %v308_v50 = vld [vmem:[#allocation2 + $0x5f8] sm:$0xff] }
 0x173   :  { %3193 = vmatprep.subr.bf16.mxu0 %v8070_v59  ;;  %3357 = vmatprep.subr.bf16.mxu1 %v8072_v60  ;;  %v8128_v59 = vcombine.high %v248_v52, %v252_v54  ;;  %v255_v60 = vld [vmem:[#allocation2 + $0x450] sm:$0xff] }
 0x174   :  { %v8133_v8 = vcombine.low %v255_v60, %v259_v61 }
 0x176   :  { %3194 = vmatpush1.bf16.msra.mxu0 %v8069_v1  ;;  %3358 = vmatpush1.bf16.msra.mxu1 %v8071_v2  ;;  %v8127_v1 = vcombine.low %v248_v52, %v252_v54  ;;  %v8134_v2 = vcombine.high %v255_v60, %v259_v61  ;;  %v316_v60 = vld [vmem:[#allocation2 + $0x638] sm:$0xff] }
 0x177   :  { %3195 = vmatprep.subr.bf16.mxu0 %v8078_v3  ;;  %3359 = vmatprep.subr.bf16.mxu1 %v8080_v4  ;;  %v8136_v3 = vcombine.high %v256_v62, %v260_v63  ;;  %v263_v4 = vld [vmem:[#allocation2 + $0x490] sm:$0xff] }
 0x178   :  { %v8141_v16 = vcombine.low %v263_v4, %v267_v5 }
 0x17a   :  { %3196 = vmatpush1.bf16.msra.mxu0 %v8077_v9  ;;  %3360 = vmatpush1.bf16.msra.mxu1 %v8079_v10  ;;  %v8135_v9 = vcombine.low %v256_v62, %v260_v63  ;;  %v8142_v10 = vcombine.high %v263_v4, %v267_v5  ;;  %v324_v4 = vld [vmem:[#allocation2 + $0x678] sm:$0xff] }
 0x17b   :  { %3197 = vmatprep.subr.bf16.mxu0 %v8086_v11  ;;  %3361 = vmatprep.subr.bf16.mxu1 %v8088_v13  ;;  %v8144_v11 = vcombine.high %v264_v6, %v268_v7  ;;  %v271_v13 = vld [vmem:[#allocation2 + $0x4d0] sm:$0xff] }
 0x17c   :  { %v8149_v24 = vcombine.low %v271_v13, %v275_v57 }
 0x17e   :  { %3198 = vmatpush1.bf16.msra.mxu0 %v8085_v17  ;;  %3362 = vmatpush1.bf16.msra.mxu1 %v8087_v18  ;;  %v8150_v17 = vcombine.high %v271_v13, %v275_v57  ;;  %v8152_v18 = vcombine.high %v272_v14, %v276_v15  ;;  %v332_v13 = vld [vmem:[#allocation2 + $0x6b8] sm:$0xff] }
 0x17f   :  { %3199 = vmatprep.subr.bf16.mxu0 %v8094_v19  ;;  %3363 = vmatprep.subr.bf16.mxu1 %v8096_v20  ;;  %v279_v19 = vld [vmem:[#allocation2 + $0x510] sm:$0xff] }
 0x180   :  { %v283_v20 = vld [vmem:[#allocation2 + $0x530] sm:$0xff] }
 0x181   :  { %v8157_v32 = vcombine.low %v279_v19, %v283_v20 }
 0x182   :  { %3200 = vmatpush1.bf16.msra.mxu0 %v8093_v27  ;;  %3364 = vmatpush1.bf16.msra.mxu1 %v8095_v28  ;;  %v8158_v27 = vcombine.high %v279_v19, %v283_v20  ;;  %v287_v28 = vld [vmem:[#allocation2 + $0x550] sm:$0xff]  ;;  %v340_v19 = vld [vmem:[#allocation2 + $0x6f8] sm:$0xff] }
 0x183   :  { %3201 = vmatprep.subr.bf16.mxu0 %v8102_v29  ;;  %3365 = vmatprep.subr.bf16.mxu1 %v8104_v30  ;;  %v291_v29 = vld [vmem:[#allocation2 + $0x570] sm:$0xff]  ;;  %v288_v30 = vld [vmem:[#allocation2 + $0x558] sm:$0xff] }
 0x184   :  { %v8166_v35 = vcombine.high %v287_v28, %v291_v29  ;;  %v8165_v42 = vcombine.low %v287_v28, %v291_v29  ;;  %v8167_v43 = vcombine.low %v288_v30, %v292_v31  ;;  %v348_v28 = vld [vmem:[#allocation2 + $0x738] sm:$0xff] }
 0x186   :  { %3202 = vmatpush1.bf16.msra.mxu0 %v8101_v37  ;;  %3366 = vmatpush1.bf16.msra.mxu1 %v8103_v38  ;;  %v8168_v37 = vcombine.high %v288_v30, %v292_v31  ;;  %v295_v38 = vld [vmem:[#allocation2 + $0x590] sm:$0xff] }
 0x187   :  { %3203 = vmatprep.subr.bf16.mxu0 %v8110_v39  ;;  %3367 = vmatprep.subr.bf16.mxu1 %v8112_v40  ;;  %v299_v39 = vld [vmem:[#allocation2 + $0x5b0] sm:$0xff]  ;;  %v296_v40 = vld [vmem:[#allocation2 + $0x598] sm:$0xff] }
 0x188   :  { %v8174_v44 = vcombine.high %v295_v38, %v299_v39  ;;  %v8173_v51 = vcombine.low %v295_v38, %v299_v39  ;;  %v8175_v52 = vcombine.low %v296_v40, %v300_v41  ;;  %v356_v38 = vld [vmem:[#allocation2 + $0x778] sm:$0xff] }
 0x18a   :  { %3204 = vmatpush1.bf16.msra.mxu0 %v8109_v46  ;;  %3368 = vmatpush1.bf16.msra.mxu1 %v8111_v47  ;;  %v8176_v46 = vcombine.high %v296_v40, %v300_v41  ;;  %v303_v47 = vld [vmem:[#allocation2 + $0x5d0] sm:$0xff] }
 0x18b   :  { %3205 = vmatprep.subr.bf16.mxu0 %v8118_v48  ;;  %3369 = vmatprep.subr.bf16.mxu1 %v8120_v49  ;;  %v307_v48 = vld [vmem:[#allocation2 + $0x5f0] sm:$0xff]  ;;  %v304_v49 = vld [vmem:[#allocation2 + $0x5d8] sm:$0xff] }
 0x18c   :  { %v8182_v54 = vcombine.high %v303_v47, %v307_v48  ;;  %v8181_v61 = vcombine.low %v303_v47, %v307_v48  ;;  %v8183_v62 = vcombine.low %v304_v49, %v308_v50  ;;  %v364_v47 = vld [vmem:[#allocation2 + $0x7b8] sm:$0xff] }
 0x18e   :  { %3206 = vmatpush1.bf16.msra.mxu0 %v8117_v55  ;;  %3370 = vmatpush1.bf16.msra.mxu1 %v8119_v56  ;;  %v8184_v55 = vcombine.high %v304_v49, %v308_v50  ;;  %v311_v56 = vld [vmem:[#allocation2 + $0x610] sm:$0xff] }
 0x18f   :  { %3216 = vmatprep.subr.bf16.mxu0 %v8126_v58  ;;  %3380 = vmatprep.subr.bf16.mxu1 %v8128_v59  ;;  %v315_v58 = vld [vmem:[#allocation2 + $0x630] sm:$0xff]  ;;  %v312_v59 = vld [vmem:[#allocation2 + $0x618] sm:$0xff] }
 0x190   :  { %v8190_v63 = vcombine.high %v311_v56, %v315_v58  ;;  %v8189_v5 = vcombine.low %v311_v56, %v315_v58  ;;  %v372_v56 = vld [vmem:[#allocation2 + $0x7f8] sm:$0xff] }
 0x191   :  { %3208 = vmatmul.mubr.bf16.vlgmr.msra.gmra.mrb[4].mxu0 %v9567_v12  ;;  %3372 = vmatmul.mubr.bf16.vlgmr.msra.gmra.mrb[4].mxu1 %v9567_v12  ;;  %v8143_v12 = vcombine.low %v264_v6, %v268_v7  ;;  %v8191_v6 = vcombine.low %v312_v59, %v316_v60 }
 0x192   :  { %3217 = vmatpush1.bf16.msra.mxu0 %v8125_v0  ;;  %3381 = vmatpush1.bf16.msra.mxu1 %v8127_v1  ;;  %v8192_v0 = vcombine.high %v312_v59, %v316_v60  ;;  %v319_v1 = vld [vmem:[#allocation2 + $0x650] sm:$0xff] }
 0x193   :  { %3218 = vmatprep.subr.bf16.mxu0 %v8134_v2  ;;  %3382 = vmatprep.subr.bf16.mxu1 %v8136_v3  ;;  %v323_v2 = vld [vmem:[#allocation2 + $0x670] sm:$0xff]  ;;  %v320_v3 = vld [vmem:[#allocation2 + $0x658] sm:$0xff] }
 0x194   :  { %3248 = vmatprep.mubr.bf16.mxu0 %v9572_v23  ;;  %3412 = vmatprep.mubr.bf16.mxu1 %v9572_v23  ;;  %v8160_v23 = vcombine.high %v280_v21, %v284_v22  ;;  %v8198_v7 = vcombine.high %v319_v1, %v323_v2  ;;  %v8197_v57 = vcombine.low %v319_v1, %v323_v2  ;;  %v380_v1 = vld [vmem:[#allocation2 + $0x838] sm:$0xff] }
 0x195   :  { %v8199_v14 = vcombine.low %v320_v3, %v324_v4 }
 0x196   :  { %3219 = vmatpush1.bf16.msra.mxu0 %v8133_v8  ;;  %3383 = vmatpush1.bf16.msra.mxu1 %v8135_v9  ;;  %v8200_v8 = vcombine.high %v320_v3, %v324_v4  ;;  %v327_v9 = vld [vmem:[#allocation2 + $0x690] sm:$0xff] }
 0x197   :  { %3220 = vmatprep.subr.bf16.mxu0 %v8142_v10  ;;  %3384 = vmatprep.subr.bf16.mxu1 %v8144_v11  ;;  %v331_v10 = vld [vmem:[#allocation2 + $0x6b0] sm:$0xff]  ;;  %v328_v11 = vld [vmem:[#allocation2 + $0x698] sm:$0xff] }
 0x198   :  { %v8206_v15 = vcombine.high %v327_v9, %v331_v10  ;;  %v8205_v20 = vcombine.low %v327_v9, %v331_v10  ;;  %v8207_v21 = vcombine.low %v328_v11, %v332_v13  ;;  %v388_v9 = vld [vmem:[#allocation2 + $0x878] sm:$0xff] }
 0x19a   :  { %3221 = vmatpush1.bf16.msra.mxu0 %v8141_v16  ;;  %3385 = vmatpush1.bf16.msra.mxu1 %v8143_v12  ;;  %v8208_v16 = vcombine.high %v328_v11, %v332_v13  ;;  %v335_v12 = vld [vmem:[#allocation2 + $0x6d0] sm:$0xff] }
 0x19b   :  { %3222 = vmatprep.subr.bf16.mxu0 %v8150_v17  ;;  %3386 = vmatprep.subr.bf16.mxu1 %v8152_v18  ;;  %v339_v17 = vld [vmem:[#allocation2 + $0x6f0] sm:$0xff]  ;;  %v336_v18 = vld [vmem:[#allocation2 + $0x6d8] sm:$0xff] }
 0x19c   :  { %v8214_v22 = vcombine.high %v335_v12, %v339_v17  ;;  %v8213_v29 = vcombine.low %v335_v12, %v339_v17  ;;  %v8215_v30 = vcombine.low %v336_v18, %v340_v19  ;;  %v396_v12 = vld [vmem:[#allocation2 + $0x8b8] sm:$0xff] }
 0x19e   :  { %3223 = vmatpush1.bf16.msra.mxu0 %v8149_v24  ;;  %3387 = vmatpush1.bf16.msra.mxu1 %v8151_v26  ;;  %v8216_v24 = vcombine.high %v336_v18, %v340_v19  ;;  %v343_v26 = vld [vmem:[#allocation2 + $0x710] sm:$0xff] }
 0x19f   :  { %3224 = vmatprep.subr.bf16.mxu0 %v8158_v27  ;;  %3388 = vmatprep.subr.bf16.mxu1 %v8160_v23  ;;  %v347_v27 = vld [vmem:[#allocation2 + $0x730] sm:$0xff]  ;;  %v344_v23 = vld [vmem:[#allocation2 + $0x718] sm:$0xff] }
 0x1a0   :  { %v8222_v31 = vcombine.high %v343_v26, %v347_v27  ;;  %v8221_v39 = vcombine.low %v343_v26, %v347_v27  ;;  %v8223_v40 = vcombine.low %v344_v23, %v348_v28  ;;  %v404_v26 = vld [vmem:[#allocation2 + $0x8f8] sm:$0xff] }
 0x1a2   :  { %3225 = vmatpush1.bf16.msra.mxu0 %v8157_v32  ;;  %3389 = vmatpush1.bf16.msra.mxu1 %v8159_v34  ;;  %v8224_v32 = vcombine.high %v344_v23, %v348_v28  ;;  %v351_v34 = vld [vmem:[#allocation2 + $0x750] sm:$0xff] }
 0x1a3   :  { %3226 = vmatprep.subr.bf16.mxu0 %v8166_v35  ;;  %3390 = vmatprep.subr.bf16.mxu1 %v8168_v37  ;;  %v355_v35 = vld [vmem:[#allocation2 + $0x770] sm:$0xff]  ;;  %v352_v37 = vld [vmem:[#allocation2 + $0x758] sm:$0xff] }
 0x1a4   :  { %v8230_v41 = vcombine.high %v351_v34, %v355_v35  ;;  %v8229_v48 = vcombine.low %v351_v34, %v355_v35  ;;  %v8231_v49 = vcombine.low %v352_v37, %v356_v38 }
 0x1a6   :  { %3227 = vmatpush1.bf16.msra.mxu0 %v8165_v42  ;;  %3391 = vmatpush1.bf16.msra.mxu1 %v8167_v43  ;;  %v8232_v42 = vcombine.high %v352_v37, %v356_v38  ;;  %v359_v43 = vld [vmem:[#allocation2 + $0x790] sm:$0xff] }
 0x1a7   :  { %3228 = vmatprep.subr.bf16.mxu0 %v8174_v44  ;;  %3392 = vmatprep.subr.bf16.mxu1 %v8176_v46  ;;  %v363_v44 = vld [vmem:[#allocation2 + $0x7b0] sm:$0xff]  ;;  %v360_v46 = vld [vmem:[#allocation2 + $0x798] sm:$0xff] }
 0x1a8   :  { %v8238_v50 = vcombine.high %v359_v43, %v363_v44  ;;  %v8237_v58 = vcombine.low %v359_v43, %v363_v44  ;;  %v8239_v59 = vcombine.low %v360_v46, %v364_v47  ;;  %v415_v38 = vld [vmem:[#allocation2 + $0x950] sm:$0xff] }
 0x1aa   :  { %3229 = vmatpush1.bf16.msra.mxu0 %v8173_v51  ;;  %3393 = vmatpush1.bf16.msra.mxu1 %v8175_v52  ;;  %v8240_v51 = vcombine.high %v360_v46, %v364_v47  ;;  %v367_v52 = vld [vmem:[#allocation2 + $0x7d0] sm:$0xff] }
 0x1ab   :  { %3230 = vmatprep.subr.bf16.mxu0 %v8182_v54  ;;  %3394 = vmatprep.subr.bf16.mxu1 %v8184_v55  ;;  %v371_v54 = vld [vmem:[#allocation2 + $0x7f0] sm:$0xff]  ;;  %v368_v55 = vld [vmem:[#allocation2 + $0x7d8] sm:$0xff] }
 0x1ac   :  { %v8246_v60 = vcombine.high %v367_v52, %v371_v54  ;;  %v8245_v2 = vcombine.low %v367_v52, %v371_v54  ;;  %v8247_v3 = vcombine.low %v368_v55, %v372_v56  ;;  %v423_v47 = vld [vmem:[#allocation2 + $0x990] sm:$0xff] }
 0x1ae   :  { %3231 = vmatpush1.bf16.msra.mxu0 %v8181_v61  ;;  %3395 = vmatpush1.bf16.msra.mxu1 %v8183_v62  ;;  %v8248_v61 = vcombine.high %v368_v55, %v372_v56  ;;  %v375_v62 = vld [vmem:[#allocation2 + $0x810] sm:$0xff] }
 0x1af   :  { %3232 = vmatprep.subr.bf16.mxu0 %v8190_v63  ;;  %3396 = vmatprep.subr.bf16.mxu1 %v8192_v0  ;;  %v379_v63 = vld [vmem:[#allocation2 + $0x830] sm:$0xff]  ;;  %v376_v0 = vld [vmem:[#allocation2 + $0x818] sm:$0xff] }
 0x1b0   :  { %v8254_v4 = vcombine.high %v375_v62, %v379_v63  ;;  %v8253_v10 = vcombine.low %v375_v62, %v379_v63  ;;  %v8255_v11 = vcombine.low %v376_v0, %v380_v1  ;;  %v431_v56 = vld [vmem:[#allocation2 + $0x9d0] sm:$0xff] }
 0x1b2   :  { %3233 = vmatpush1.bf16.msra.mxu0 %v8189_v5  ;;  %3397 = vmatpush1.bf16.msra.mxu1 %v8191_v6  ;;  %v8256_v5 = vcombine.high %v376_v0, %v380_v1  ;;  %v383_v6 = vld [vmem:[#allocation2 + $0x850] sm:$0xff] }
 0x1b3   :  { %3234 = vmatprep.subr.bf16.mxu0 %v8198_v7  ;;  %3398 = vmatprep.subr.bf16.mxu1 %v8200_v8  ;;  %v387_v7 = vld [vmem:[#allocation2 + $0x870] sm:$0xff]  ;;  %v384_v8 = vld [vmem:[#allocation2 + $0x858] sm:$0xff] }
 0x1b4   :  { %v8262_v13 = vcombine.high %v383_v6, %v387_v7  ;;  %v8261_v17 = vcombine.low %v383_v6, %v387_v7  ;;  %v8263_v18 = vcombine.low %v384_v8, %v388_v9  ;;  %v439_v1 = vld [vmem:[#allocation2 + $0xa10] sm:$0xff] }
 0x1b6   :  { %3235 = vmatpush1.bf16.msra.mxu0 %v8197_v57  ;;  %3399 = vmatpush1.bf16.msra.mxu1 %v8199_v14  ;;  %v8264_v57 = vcombine.high %v384_v8, %v388_v9  ;;  %v391_v14 = vld [vmem:[#allocation2 + $0x890] sm:$0xff] }
 0x1b7   :  { %3236 = vmatprep.subr.bf16.mxu0 %v8206_v15  ;;  %3400 = vmatprep.subr.bf16.mxu1 %v8208_v16  ;;  %v395_v15 = vld [vmem:[#allocation2 + $0x8b0] sm:$0xff]  ;;  %v392_v16 = vld [vmem:[#allocation2 + $0x898] sm:$0xff] }
 0x1b8   :  { %v8270_v19 = vcombine.high %v391_v14, %v395_v15  ;;  %v8269_v27 = vcombine.low %v391_v14, %v395_v15  ;;  %v447_v9 = vld [vmem:[#allocation2 + $0xa50] sm:$0xff] }
 0x1ba   :  { %3237 = vmatpush1.bf16.msra.mxu0 %v8205_v20  ;;  %3401 = vmatpush1.bf16.msra.mxu1 %v8207_v21  ;;  %v8272_v20 = vcombine.high %v392_v16, %v396_v12  ;;  %v399_v21 = vld [vmem:[#allocation2 + $0x8d0] sm:$0xff] }
 0x1bb   :  { %3238 = vmatprep.subr.bf16.mxu0 %v8214_v22  ;;  %3402 = vmatprep.subr.bf16.mxu1 %v8216_v24  ;;  %v403_v22 = vld [vmem:[#allocation2 + $0x8f0] sm:$0xff]  ;;  %v400_v24 = vld [vmem:[#allocation2 + $0x8d8] sm:$0xff] }
 0x1bc   :  { %v8278_v23 = vcombine.high %v399_v21, %v403_v22  ;;  %v8280_v28 = vcombine.high %v400_v24, %v404_v26  ;;  %v8277_v34 = vcombine.low %v399_v21, %v403_v22  ;;  %v8279_v35 = vcombine.low %v400_v24, %v404_v26  ;;  %v463_v26 = vld [vmem:[#allocation2 + $0xad0] sm:$0xff] }
 0x1be   :  { %3239 = vmatpush1.bf16.msra.mxu0 %v8213_v29  ;;  %3403 = vmatpush1.bf16.msra.mxu1 %v8215_v30  ;;  %v407_v29 = vld [vmem:[#allocation2 + $0x910] sm:$0xff] }
 0x1bf   :  { %3240 = vmatprep.subr.bf16.mxu0 %v8222_v31  ;;  %3404 = vmatprep.subr.bf16.mxu1 %v8224_v32  ;;  %v411_v30 = vld [vmem:[#allocation2 + $0x930] sm:$0xff]  ;;  %v408_v31 = vld [vmem:[#allocation2 + $0x918] sm:$0xff] }
 0x1c0   :  { %v412_v32 = vld [vmem:[#allocation2 + $0x938] sm:$0xff]  ;;  %v8286_v37 = vcombine.high %v407_v29, %v411_v30 }
 0x1c1   :  { %v8287_v43 = vcombine.low %v408_v31, %v412_v32 }
 0x1c2   :  { %3241 = vmatpush1.bf16.msra.mxu0 %v8221_v39  ;;  %3405 = vmatpush1.bf16.msra.mxu1 %v8223_v40  ;;  %v419_v39 = vld [vmem:[#allocation2 + $0x970] sm:$0xff]  ;;  %v416_v40 = vld [vmem:[#allocation2 + $0x958] sm:$0xff] }
 0x1c3   :  { %3242 = vmatprep.subr.bf16.mxu0 %v8230_v41  ;;  %3406 = vmatprep.subr.bf16.mxu1 %v8232_v42  ;;  %v420_v41 = vld [vmem:[#allocation2 + $0x978] sm:$0xff]  ;;  %v8285_v42 = vcombine.low %v407_v29, %v411_v30  ;;  %v8294_v44 = vcombine.high %v415_v38, %v419_v39 }
 0x1c4   :  { %v8296_v46 = vcombine.high %v416_v40, %v420_v41  ;;  %v8295_v52 = vcombine.low %v416_v40, %v420_v41  ;;  %v479_v41 = vld [vmem:[#allocation2 + $0xb50] sm:$0xff] }
 0x1c6   :  { %3243 = vmatpush1.bf16.msra.mxu0 %v8229_v48  ;;  %3407 = vmatpush1.bf16.msra.mxu1 %v8231_v49  ;;  %v427_v48 = vld [vmem:[#allocation2 + $0x9b0] sm:$0xff]  ;;  %v424_v49 = vld [vmem:[#allocation2 + $0x998] sm:$0xff] }
 0x1c7   :  { %3244 = vmatprep.subr.bf16.mxu0 %v8238_v50  ;;  %3408 = vmatprep.subr.bf16.mxu1 %v8240_v51  ;;  %v428_v50 = vld [vmem:[#allocation2 + $0x9b8] sm:$0xff]  ;;  %v8293_v51 = vcombine.low %v415_v38, %v419_v39  ;;  %v8302_v54 = vcombine.high %v423_v47, %v427_v48 }
 0x1c8   :  { %v8304_v55 = vcombine.high %v424_v49, %v428_v50  ;;  %v8303_v62 = vcombine.low %v424_v49, %v428_v50  ;;  %v487_v50 = vld [vmem:[#allocation2 + $0xb90] sm:$0xff] }
 0x1ca   :  { %3245 = vmatpush1.bf16.msra.mxu0 %v8237_v58  ;;  %3409 = vmatpush1.bf16.msra.mxu1 %v8239_v59  ;;  %v435_v58 = vld [vmem:[#allocation2 + $0x9f0] sm:$0xff]  ;;  %v432_v59 = vld [vmem:[#allocation2 + $0x9d8] sm:$0xff] }
 0x1cb   :  { %3246 = vmatprep.subr.bf16.mxu0 %v8246_v60  ;;  %3410 = vmatprep.subr.bf16.mxu1 %v8248_v61  ;;  %v436_v60 = vld [vmem:[#allocation2 + $0x9f8] sm:$0xff]  ;;  %v8301_v61 = vcombine.low %v423_v47, %v427_v48  ;;  %v8310_v63 = vcombine.high %v431_v56, %v435_v58 }
 0x1cc   :  { %v8312_v0 = vcombine.high %v432_v59, %v436_v60  ;;  %v8311_v6 = vcombine.low %v432_v59, %v436_v60  ;;  %v495_v60 = vld [vmem:[#allocation2 + $0xbd0] sm:$0xff] }
 0x1ce   :  { %3247 = vmatpush1.bf16.msra.mxu0 %v8245_v2  ;;  %3411 = vmatpush1.bf16.msra.mxu1 %v8247_v3  ;;  %v443_v2 = vld [vmem:[#allocation2 + $0xa30] sm:$0xff]  ;;  %v440_v3 = vld [vmem:[#allocation2 + $0xa18] sm:$0xff] }
 0x1cf   :  { %3257 = vmatprep.subr.bf16.mxu0 %v8254_v4  ;;  %3421 = vmatprep.subr.bf16.mxu1 %v8256_v5  ;;  %v444_v4 = vld [vmem:[#allocation2 + $0xa38] sm:$0xff]  ;;  %v8309_v5 = vcombine.low %v431_v56, %v435_v58  ;;  %v8318_v7 = vcombine.high %v439_v1, %v443_v2 }
 0x1d0   :  { %v8320_v8 = vcombine.high %v440_v3, %v444_v4  ;;  %v8319_v14 = vcombine.low %v440_v3, %v444_v4  ;;  %v503_v4 = vld [vmem:[#allocation2 + $0xc10] sm:$0xff] }
 0x1d1   :  { %3249 = vmatmul.mubr.bf16.vlgmr.msra.gmra.mrb[4].mxu0 %v9584_v25  ;;  %3413 = vmatmul.mubr.bf16.vlgmr.msra.gmra.mrb[4].mxu1 %v9584_v25  ;;  %v8271_v25 = vcombine.low %v392_v16, %v396_v12  ;;  %v455_v12 = vld [vmem:[#allocation2 + $0xa90] sm:$0xff] }
 0x1d2   :  { %3258 = vmatpush1.bf16.msra.mxu0 %v8253_v10  ;;  %3422 = vmatpush1.bf16.msra.mxu1 %v8255_v11  ;;  %v451_v10 = vld [vmem:[#allocation2 + $0xa70] sm:$0xff]  ;;  %v448_v11 = vld [vmem:[#allocation2 + $0xa58] sm:$0xff] }
 0x1d3   :  { %3259 = vmatprep.subr.bf16.mxu0 %v8262_v13  ;;  %3423 = vmatprep.subr.bf16.mxu1 %v8264_v57  ;;  %v452_v13 = vld [vmem:[#allocation2 + $0xa78] sm:$0xff]  ;;  %v8317_v57 = vcombine.low %v439_v1, %v443_v2  ;;  %v8326_v15 = vcombine.high %v447_v9, %v451_v10 }
 0x1d4   :  { %3289 = vmatprep.mubr.bf16.mxu0 %v9586_v33  ;;  %3453 = vmatprep.mubr.bf16.mxu1 %v9586_v33  ;;  %v8288_v33 = vcombine.high %v408_v31, %v412_v32  ;;  %v8328_v16 = vcombine.high %v448_v11, %v452_v13  ;;  %v8327_v21 = vcombine.low %v448_v11, %v452_v13  ;;  %v471_v32 = vld [vmem:[#allocation2 + $0xb10] sm:$0xff] }
 0x1d5   :  { %v511_v13 = vld [vmem:[#allocation2 + $0xc50] sm:$0xff] }
 0x1d6   :  { %3260 = vmatpush1.bf16.msra.mxu0 %v8261_v17  ;;  %3424 = vmatpush1.bf16.msra.mxu1 %v8263_v18  ;;  %v459_v17 = vld [vmem:[#allocation2 + $0xab0] sm:$0xff]  ;;  %v456_v18 = vld [vmem:[#allocation2 + $0xa98] sm:$0xff] }
 0x1d7   :  { %3261 = vmatprep.subr.bf16.mxu0 %v8270_v19  ;;  %3425 = vmatprep.subr.bf16.mxu1 %v8272_v20  ;;  %v460_v19 = vld [vmem:[#allocation2 + $0xab8] sm:$0xff]  ;;  %v8325_v20 = vcombine.low %v447_v9, %v451_v10  ;;  %v8334_v22 = vcombine.high %v455_v12, %v459_v17 }
 0x1d8   :  { %v8336_v24 = vcombine.high %v456_v18, %v460_v19  ;;  %v8335_v29 = vcombine.low %v456_v18, %v460_v19  ;;  %v519_v19 = vld [vmem:[#allocation2 + $0xc90] sm:$0xff] }
 0x1da   :  { %3262 = vmatpush1.bf16.msra.mxu0 %v8269_v27  ;;  %3426 = vmatpush1.bf16.msra.mxu1 %v8271_v25  ;;  %v467_v27 = vld [vmem:[#allocation2 + $0xaf0] sm:$0xff]  ;;  %v464_v25 = vld [vmem:[#allocation2 + $0xad8] sm:$0xff] }
 0x1db   :  { %3263 = vmatprep.subr.bf16.mxu0 %v8278_v23  ;;  %3427 = vmatprep.subr.bf16.mxu1 %v8280_v28  ;;  %v468_v23 = vld [vmem:[#allocation2 + $0xaf8] sm:$0xff]  ;;  %v8333_v28 = vcombine.low %v455_v12, %v459_v17  ;;  %v8342_v30 = vcombine.high %v463_v26, %v467_v27 }
 0x1dc   :  { %v8344_v31 = vcombine.high %v464_v25, %v468_v23  ;;  %v8343_v38 = vcombine.low %v464_v25, %v468_v23  ;;  %v527_v23 = vld [vmem:[#allocation2 + $0xcd0] sm:$0xff] }
 0x1de   :  { %3264 = vmatpush1.bf16.msra.mxu0 %v8277_v34  ;;  %3428 = vmatpush1.bf16.msra.mxu1 %v8279_v35  ;;  %v475_v34 = vld [vmem:[#allocation2 + $0xb30] sm:$0xff]  ;;  %v472_v35 = vld [vmem:[#allocation2 + $0xb18] sm:$0xff] }
 0x1df   :  { %3265 = vmatprep.subr.bf16.mxu0 %v8286_v37  ;;  %3429 = vmatprep.subr.bf16.mxu1 %v8288_v33  ;;  %v476_v37 = vld [vmem:[#allocation2 + $0xb38] sm:$0xff]  ;;  %v8341_v33 = vcombine.low %v463_v26, %v467_v27  ;;  %v8350_v39 = vcombine.high %v471_v32, %v475_v34 }
 0x1e0   :  { %v8352_v40 = vcombine.high %v472_v35, %v476_v37  ;;  %v8351_v47 = vcombine.low %v472_v35, %v476_v37  ;;  %v535_v35 = vld [vmem:[#allocation2 + $0xd10] sm:$0xff] }
 0x1e1   :  { %v539_v37 = vld [vmem:[#allocation2 + $0xd30] sm:$0xff] }
 0x1e2   :  { %3266 = vmatpush1.bf16.msra.mxu0 %v8285_v42  ;;  %3430 = vmatpush1.bf16.msra.mxu1 %v8287_v43  ;;  %v483_v42 = vld [vmem:[#allocation2 + $0xb70] sm:$0xff]  ;;  %v480_v43 = vld [vmem:[#allocation2 + $0xb58] sm:$0xff] }
 0x1e3   :  { %3267 = vmatprep.subr.bf16.mxu0 %v8294_v44  ;;  %3431 = vmatprep.subr.bf16.mxu1 %v8296_v46  ;;  %v484_v44 = vld [vmem:[#allocation2 + $0xb78] sm:$0xff]  ;;  %v8349_v46 = vcombine.low %v471_v32, %v475_v34  ;;  %v8358_v48 = vcombine.high %v479_v41, %v483_v42 }
 0x1e4   :  { %v8360_v49 = vcombine.high %v480_v43, %v484_v44  ;;  %v8359_v56 = vcombine.low %v480_v43, %v484_v44  ;;  %v543_v43 = vld [vmem:[#allocation2 + $0xd50] sm:$0xff] }
 0x1e5   :  { %v547_v44 = vld [vmem:[#allocation2 + $0xd70] sm:$0xff] }
 0x1e6   :  { %3268 = vmatpush1.bf16.msra.mxu0 %v8293_v51  ;;  %3432 = vmatpush1.bf16.msra.mxu1 %v8295_v52  ;;  %v491_v51 = vld [vmem:[#allocation2 + $0xbb0] sm:$0xff]  ;;  %v488_v52 = vld [vmem:[#allocation2 + $0xb98] sm:$0xff] }
 0x1e7   :  { %3269 = vmatprep.subr.bf16.mxu0 %v8302_v54  ;;  %3433 = vmatprep.subr.bf16.mxu1 %v8304_v55  ;;  %v492_v54 = vld [vmem:[#allocation2 + $0xbb8] sm:$0xff]  ;;  %v8357_v55 = vcombine.low %v479_v41, %v483_v42  ;;  %v8366_v58 = vcombine.high %v487_v50, %v491_v51  ;;  %v8414_v42 = vcombine.high %v535_v35, %v539_v37 }
 0x1e8   :  { %v8368_v59 = vcombine.high %v488_v52, %v492_v54  ;;  %v8367_v1 = vcombine.low %v488_v52, %v492_v54  ;;  %v551_v54 = vld [vmem:[#allocation2 + $0xd90] sm:$0xff] }
 0x1ea   :  { %3270 = vmatpush1.bf16.msra.mxu0 %v8301_v61  ;;  %3434 = vmatpush1.bf16.msra.mxu1 %v8303_v62  ;;  %v499_v61 = vld [vmem:[#allocation2 + $0xbf0] sm:$0xff]  ;;  %v496_v62 = vld [vmem:[#allocation2 + $0xbd8] sm:$0xff] }
 0x1eb   :  { %3271 = vmatprep.subr.bf16.mxu0 %v8310_v63  ;;  %3435 = vmatprep.subr.bf16.mxu1 %v8312_v0  ;;  %v500_v63 = vld [vmem:[#allocation2 + $0xbf8] sm:$0xff]  ;;  %v8365_v0 = vcombine.low %v487_v50, %v491_v51  ;;  %v8374_v2 = vcombine.high %v495_v60, %v499_v61  ;;  %v8422_v51 = vcombine.high %v543_v43, %v547_v44 }
 0x1ec   :  { %v8376_v3 = vcombine.high %v496_v62, %v500_v63  ;;  %v8375_v9 = vcombine.low %v496_v62, %v500_v63 }
 0x1ee   :  { %3272 = vmatpush1.bf16.msra.mxu0 %v8309_v5  ;;  %3436 = vmatpush1.bf16.msra.mxu1 %v8311_v6  ;;  %v507_v5 = vld [vmem:[#allocation2 + $0xc30] sm:$0xff]  ;;  %v504_v6 = vld [vmem:[#allocation2 + $0xc18] sm:$0xff] }
 0x1ef   :  { %3273 = vmatprep.subr.bf16.mxu0 %v8318_v7  ;;  %3437 = vmatprep.subr.bf16.mxu1 %v8320_v8  ;;  %v508_v7 = vld [vmem:[#allocation2 + $0xc38] sm:$0xff]  ;;  %v8373_v8 = vcombine.low %v495_v60, %v499_v61  ;;  %v8382_v10 = vcombine.high %v503_v4, %v507_v5  ;;  %v9625_v60 = vld [vmem:[#allocation4] sm:$0xff]  ;;  %v8421_v61 = vcombine.low %v543_v43, %v547_v44  ;;  %v3543_v43 = vld [vmem:[#allocation6 + $0xc0] sm:$0xff] }
 0x1f0   :  { %v8384_v11 = vcombine.high %v504_v6, %v508_v7  ;;  %v8383_v12 = vcombine.low %v504_v6, %v508_v7  ;;  %v560_v7 = vld [vmem:[#allocation2 + $0xdd8] sm:$0xff]  ;;  %v3547_v44 = vld [vmem:[#allocation6 + $0xe0] sm:$0xff] }
 0x1f2   :  { %3274 = vmatpush1.bf16.msra.mxu0 %v8317_v57  ;;  %3438 = vmatpush1.bf16.msra.mxu1 %v8319_v14  ;;  %v515_v57 = vld [vmem:[#allocation2 + $0xc70] sm:$0xff]  ;;  %v512_v14 = vld [vmem:[#allocation2 + $0xc58] sm:$0xff] }
 0x1f3   :  { %3275 = vmatprep.subr.bf16.mxu0 %v8326_v15  ;;  %3439 = vmatprep.subr.bf16.mxu1 %v8328_v16  ;;  %v516_v15 = vld [vmem:[#allocation2 + $0xc78] sm:$0xff]  ;;  %v8381_v16 = vcombine.low %v503_v4, %v507_v5  ;;  %v8390_v17 = vcombine.high %v511_v13, %v515_v57 }
 0x1f4   :  { %v8392_v18 = vcombine.high %v512_v14, %v516_v15  ;;  %v8391_v26 = vcombine.low %v512_v14, %v516_v15 }
 0x1f6   :  { %3276 = vmatpush1.bf16.msra.mxu0 %v8325_v20  ;;  %3440 = vmatpush1.bf16.msra.mxu1 %v8327_v21  ;;  %v523_v20 = vld [vmem:[#allocation2 + $0xcb0] sm:$0xff]  ;;  %v520_v21 = vld [vmem:[#allocation2 + $0xc98] sm:$0xff] }
 0x1f7   :  { %3277 = vmatprep.subr.bf16.mxu0 %v8334_v22  ;;  %3441 = vmatprep.subr.bf16.mxu1 %v8336_v24  ;;  %v524_v22 = vld [vmem:[#allocation2 + $0xcb8] sm:$0xff]  ;;  %v8389_v24 = vcombine.low %v511_v13, %v515_v57  ;;  %v8398_v27 = vcombine.high %v519_v19, %v523_v20 }
 0x1f8   :  { %v8400_v25 = vcombine.high %v520_v21, %v524_v22 }
 0x1fa   :  { %3278 = vmatpush1.bf16.msra.mxu0 %v8333_v28  ;;  %3442 = vmatpush1.bf16.msra.mxu1 %v8335_v29  ;;  %v531_v28 = vld [vmem:[#allocation2 + $0xcf0] sm:$0xff]  ;;  %v528_v29 = vld [vmem:[#allocation2 + $0xcd8] sm:$0xff] }
 0x1fb   :  { %3279 = vmatprep.subr.bf16.mxu0 %v8342_v30  ;;  %3443 = vmatprep.subr.bf16.mxu1 %v8344_v31  ;;  %v532_v30 = vld [vmem:[#allocation2 + $0xcf8] sm:$0xff]  ;;  %v8397_v31 = vcombine.low %v519_v19, %v523_v20  ;;  %v8406_v32 = vcombine.high %v527_v23, %v531_v28  ;;  %v3520_v20 = vld [vmem:[#allocation6 + $0x8] sm:$0xff] }
 0x1fc   :  { %v8408_v34 = vcombine.high %v528_v29, %v532_v30  ;;  %v8407_v41 = vcombine.low %v528_v29, %v532_v30  ;;  %v3528_v30 = vld [vmem:[#allocation6 + $0x48] sm:$0xff] }
 0x1fe   :  { %3280 = vmatpush1.bf16.msra.mxu0 %v8341_v33  ;;  %3444 = vmatpush1.bf16.msra.mxu1 %v8343_v38  ;;  %v536_v33 = vld [vmem:[#allocation2 + $0xd18] sm:$0xff] }
 0x1ff   :  { %3281 = vmatprep.subr.bf16.mxu0 %v8350_v39  ;;  %3445 = vmatprep.subr.bf16.mxu1 %v8352_v40  ;;  %v540_v38 = vld [vmem:[#allocation2 + $0xd38] sm:$0xff]  ;;  %v567_v39 = vlaneseq  ;;  %v8405_v40 = vcombine.low %v527_v23, %v531_v28  ;;  %v3527_v23 = vld [vmem:[#allocation6 + $0x40] sm:$0xff] }
 0x200   :  { %v8415_v50 = vcombine.low %v536_v33, %v540_v38  ;;  %v3531_v28 = vld [vmem:[#allocation6 + $0x60] sm:$0xff] }
 0x202   :  { %3282 = vmatpush1.bf16.msra.mxu0 %v8349_v46  ;;  %3446 = vmatpush1.bf16.msra.mxu1 %v8351_v47  ;;  %v9622_v46 = vshrl.u32 %v567_v39, 7  ;;  %v544_v47 = vld [vmem:[#allocation2 + $0xd58] sm:$0xff]  ;;  %v3540_v39 = vld [vmem:[#allocation6 + $0xa8] sm:$0xff] }
 0x203   :  { %3283 = vmatprep.subr.bf16.mxu0 %v8358_v48  ;;  %3447 = vmatprep.subr.bf16.mxu1 %v8360_v49  ;;  %v548_v48 = vld [vmem:[#allocation2 + $0xd78] sm:$0xff]  ;;  %v8413_v49 = vcombine.low %v535_v35, %v539_v37  ;;  %v3539_v35 = vld [vmem:[#allocation6 + $0xa0] sm:$0xff] }
 0x204   :  { %v8424_v52 = vcombine.high %v544_v47, %v548_v48  ;;  %v8423_v62 = vcombine.low %v544_v47, %v548_v48  ;;  %v3544_v47 = vld [vmem:[#allocation6 + $0xc8] sm:$0xff] }
 0x205   :  { %v3548_v48 = vld [vmem:[#allocation6 + $0xe8] sm:$0xff] }
 0x206   :  { %3284 = vmatpush1.bf16.msra.mxu0 %v8357_v55  ;;  %3448 = vmatpush1.bf16.msra.mxu1 %v8359_v56  ;;  %v555_v55 = vld [vmem:[#allocation2 + $0xdb0] sm:$0xff]  ;;  %v573_v56 = vsub.s32 1, %v9622_v46 }
 0x207   :  { %3285 = vmatprep.subr.bf16.mxu0 %v8366_v58  ;;  %3449 = vmatprep.subr.bf16.mxu1 %v8368_v59  ;;  %v552_v58 = vld [vmem:[#allocation2 + $0xd98] sm:$0xff]  ;;  %v8430_v63 = vcombine.high %v551_v54, %v555_v55 }
 0x208   :  { %v556_v59 = vld [vmem:[#allocation2 + $0xdb8] sm:$0xff]  ;;  %v574_v5 = vrot.slane %v9625_v60, %v573_v56 }
 0x209   :  { %v8431_v14 = vcombine.low %v552_v58, %v556_v59 }
 0x20a   :  { %3286 = vmatpush1.bf16.msra.mxu0 %v8365_v0  ;;  %3450 = vmatpush1.bf16.msra.mxu1 %v8367_v1  ;;  %v8432_v1 = vcombine.high %v552_v58, %v556_v59  ;;  %v3556_v58 = vld [vmem:[#allocation6 + $0x128] sm:$0xff]  ;;  %v8465_v59 = vcombine.low %v3543_v43, %v3547_v44 }
 0x20b   :  { %3287 = vmatprep.subr.bf16.mxu0 %v8374_v2  ;;  %3451 = vmatprep.subr.bf16.mxu1 %v8376_v3  ;;  %v559_v2 = vld [vmem:[#allocation2 + $0xdd0] sm:$0xff] }
 0x20c   :  { %v563_v3 = vld [vmem:[#allocation2 + $0xdf0] sm:$0xff] }
 0x20d   :  { %v8438_v15 = vcombine.high %v559_v2, %v563_v3 }
 0x20e   :  { %3288 = vmatpush1.bf16.msra.mxu0 %v8373_v8  ;;  %3452 = vmatpush1.bf16.msra.mxu1 %v8375_v9  ;;  %v564_v8 = vld [vmem:[#allocation2 + $0xdf8] sm:$0xff] }
 0x20f   :  { %3298 = vmatprep.subr.bf16.mxu0 %v8382_v10  ;;  %3462 = vmatprep.subr.bf16.mxu1 %v8384_v11  ;;  %v8429_v11 = vcombine.low %v551_v54, %v555_v55  ;;  %v3555_v54 = vld [vmem:[#allocation6 + $0x120] sm:$0xff]  ;;  %v3552_v55 = vld [vmem:[#allocation6 + $0x108] sm:$0xff] }
 0x211   :  { %3290 = vmatmul.mubr.bf16.vlgmr.msra.gmra.mrb[4].mxu0 %v9595_v36  ;;  %3454 = vmatmul.mubr.bf16.vlgmr.msra.gmra.mrb[4].mxu1 %v9595_v36  ;;  %v8399_v36 = vcombine.low %v520_v21, %v524_v22  ;;  %v3524_v21 = vld [vmem:[#allocation6 + $0x28] sm:$0xff]  ;;  %v8437_v22 = vcombine.low %v559_v2, %v563_v3  ;;  %v3563_v2 = vld [vmem:[#allocation6 + $0x160] sm:$0xff] }
 0x212   :  { %3299 = vmatpush1.bf16.msra.mxu0 %v8381_v16  ;;  %3463 = vmatpush1.bf16.msra.mxu1 %v8383_v12  ;;  %v8440_v12 = vcombine.high %v560_v7, %v564_v8  ;;  %v3560_v3 = vld [vmem:[#allocation6 + $0x148] sm:$0xff] }
 0x213   :  { %3300 = vmatprep.subr.bf16.mxu0 %v8390_v17  ;;  %3464 = vmatprep.subr.bf16.mxu1 %v8392_v18  ;;  %v3519_v17 = vld [vmem:[#allocation6] sm:$0xff] }
 0x214   :  { %3330 = vmatprep.mubr.bf16.mxu0 %v9444_v53  ;;  %3494 = vmatprep.mubr.bf16.mxu1 %v9444_v53  ;;  %v8416_v53 = vcombine.high %v536_v33, %v540_v38  ;;  %v3523_v18 = vld [vmem:[#allocation6 + $0x20] sm:$0xff]  ;;  %v3536_v38 = vld [vmem:[#allocation6 + $0x88] sm:$0xff] }
 0x215   :  { %v8441_v29 = vcombine.low %v3519_v17, %v3523_v18 }
 0x216   :  { %3301 = vmatpush1.bf16.msra.mxu0 %v8389_v24  ;;  %3465 = vmatpush1.bf16.msra.mxu1 %v8391_v26  ;;  %v8439_v24 = vcombine.low %v560_v7, %v564_v8  ;;  %v8442_v26 = vcombine.high %v3519_v17, %v3523_v18  ;;  %v8475_v7 = vcombine.low %v3552_v55, %v3556_v58  ;;  %v3575_v18 = vld [vmem:[#allocation6 + $0x1c0] sm:$0xff] }
 0x217   :  { %3302 = vmatprep.subr.bf16.mxu0 %v8398_v27  ;;  %3466 = vmatprep.subr.bf16.mxu1 %v8400_v25  ;;  %v8444_v27 = vcombine.high %v3520_v20, %v3524_v21 }
 0x21a   :  { %3303 = vmatpush1.bf16.msra.mxu0 %v8397_v31  ;;  %3467 = vmatpush1.bf16.msra.mxu1 %v8399_v36  ;;  %v3532_v31 = vld [vmem:[#allocation6 + $0x68] sm:$0xff]  ;;  %v8443_v36 = vcombine.low %v3520_v20, %v3524_v21 }
 0x21b   :  { %3304 = vmatprep.subr.bf16.mxu0 %v8406_v32  ;;  %3468 = vmatprep.subr.bf16.mxu1 %v8408_v34  ;;  %v8450_v32 = vcombine.high %v3527_v23, %v3531_v28  ;;  %v3535_v34 = vld [vmem:[#allocation6 + $0x80] sm:$0xff]  ;;  %v8452_v33 = vcombine.high %v3528_v30, %v3532_v31  ;;  %v3576_v20 = vld [vmem:[#allocation6 + $0x1c8] sm:$0xff] }
 0x21c   :  { %v3580_v21 = vld [vmem:[#allocation6 + $0x1e8] sm:$0xff] }
 0x21e   :  { %3305 = vmatpush1.bf16.msra.mxu0 %v8405_v40  ;;  %3469 = vmatpush1.bf16.msra.mxu1 %v8407_v41  ;;  %v8449_v40 = vcombine.low %v3527_v23, %v3531_v28  ;;  %v8451_v41 = vcombine.low %v3528_v30, %v3532_v31  ;;  %v3587_v23 = vld [vmem:[#allocation6 + $0x220] sm:$0xff]  ;;  %v3584_v28 = vld [vmem:[#allocation6 + $0x208] sm:$0xff]  ;;  %v8499_v31 = vcombine.low %v3576_v20, %v3580_v21 }
 0x21f   :  { %3306 = vmatprep.subr.bf16.mxu0 %v8414_v42  ;;  %3470 = vmatprep.subr.bf16.mxu1 %v8416_v53  ;;  %v8458_v42 = vcombine.high %v3535_v34, %v3539_v35  ;;  %v8460_v53 = vcombine.high %v3536_v38, %v3540_v39 }
 0x222   :  { %3307 = vmatpush1.bf16.msra.mxu0 %v8413_v49  ;;  %3471 = vmatpush1.bf16.msra.mxu1 %v8415_v50  ;;  %v8457_v49 = vcombine.low %v3535_v34, %v3539_v35  ;;  %v8466_v50 = vcombine.high %v3543_v43, %v3547_v44  ;;  %v3591_v34 = vld [vmem:[#allocation6 + $0x240] sm:$0xff]  ;;  %v3600_v44 = vld [vmem:[#allocation6 + $0x288] sm:$0xff] }
 0x223   :  { %3308 = vmatprep.subr.bf16.mxu0 %v8422_v51  ;;  %3472 = vmatprep.subr.bf16.mxu1 %v8424_v52  ;;  %v8468_v51 = vcombine.high %v3544_v47, %v3548_v48  ;;  %v3551_v52 = vld [vmem:[#allocation6 + $0x100] sm:$0xff] }
 0x224   :  { %v9627_v0 = vpop.f32.mrb[0].mxu0  ;;  %v9629_v4 = vpop.f32.mrb[0].mxu1  ;;  %v3595_v35 = vld [vmem:[#allocation6 + $0x260] sm:$0xff] }
 0x225   :  { %v3006_v6 = vpop.f32.mrb[1].mxu0  ;;  %v9634_v9 = vpop.f32.mrb[1].mxu1  ;;  %v3603_v43 = vld [vmem:[#allocation6 + $0x2a0] sm:$0xff] }
 0x226   :  { %v3008_v10 = vpop.f32.mrb[2].mxu0  ;;  %3309 = vmatpush1.bf16.msra.mxu0 %v8421_v61  ;;  %v3172_v13 = vpop.f32.mrb[2].mxu1  ;;  %3473 = vmatpush1.bf16.msra.mxu1 %v8423_v62  ;;  %v9107_v19 = vadd.f32 %v3006_v6, %v574_v5  ;;  %v8467_v61 = vcombine.low %v3544_v47, %v3548_v48  ;;  %v8474_v62 = vcombine.high %v3551_v52, %v3555_v54  ;;  %v3564_v5 = vld [vmem:[#allocation6 + $0x168] sm:$0xff] }
 0x227   :  { %v3009_v57 = vpop.f32.mrb[3].mxu0  ;;  %3310 = vmatprep.subr.bf16.mxu0 %v8430_v63  ;;  %v3173_v16 = vpop.f32.mrb[3].mxu1  ;;  %3474 = vmatprep.subr.bf16.mxu1 %v8432_v1  ;;  %v8476_v63 = vcombine.high %v3552_v55, %v3556_v58  ;;  %v3559_v1 = vld [vmem:[#allocation6 + $0x140] sm:$0xff]  ;;  %v8473_v6 = vcombine.low %v3551_v52, %v3555_v54  ;;  %v8484_v10 = vcombine.high %v3560_v3, %v3564_v5  ;;  %v3604_v47 = vld [vmem:[#allocation6 + $0x2a8] sm:$0xff] }
 0x228   :  { %v3504_v25 = vmax.f32 %v9107_v19, 0.0  ;;  %v8482_v8 = vcombine.high %v3559_v1, %v3563_v2  ;;  %v3571_v13 = vld [vmem:[#allocation6 + $0x1a0] sm:$0xff]  ;;  %v3568_v57 = vld [vmem:[#allocation6 + $0x188] sm:$0xff]  ;;  %v8483_v16 = vcombine.low %v3560_v3, %v3564_v5  ;;  %v8513_v48 = vcombine.low %v3591_v34, %v3595_v35 }
 0x229   :  { %v3579_v19 = vld [vmem:[#allocation6 + $0x1e0] sm:$0xff]  ;;  %v3608_v54 = vld [vmem:[#allocation6 + $0x2c8] sm:$0xff] }
 0x22a   :  { %3311 = vmatpush1.bf16.msra.mxu0 %v8429_v11  ;;  %3475 = vmatpush1.bf16.msra.mxu1 %v8431_v14  ;;  %v9636_v37 = vpack.c.bf16 %v3504_v25, %v3504_v25  ;;  %v3567_v11 = vld [vmem:[#allocation6 + $0x180] sm:$0xff]  ;;  %v3572_v14 = vld [vmem:[#allocation6 + $0x1a8] sm:$0xff]  ;;  %v8497_v30 = vcombine.low %v3575_v18, %v3579_v19 }
 0x22b   :  { %3312 = vmatprep.subr.bf16.mxu0 %v8438_v15  ;;  %3476 = vmatprep.subr.bf16.mxu1 %v8440_v12  ;;  %v8481_v15 = vcombine.low %v3559_v1, %v3563_v2  ;;  %v8490_v12 = vcombine.high %v3567_v11, %v3571_v13  ;;  %v8492_v17 = vcombine.high %v3568_v57, %v3572_v14  ;;  %v3583_v25 = vld [vmem:[#allocation6 + $0x200] sm:$0xff]  ;;  %v3612_v55 = vld [vmem:[#allocation6 + $0x2e8] sm:$0xff] }
 0x22c   :  { %v3611_v52 = vld [vmem:[#allocation6 + $0x2e0] sm:$0xff]  ;;  %v3616_v2 = vld [vmem:[#allocation6 + $0x308] sm:$0xff] }
 0x22d   :  { %v3619_v1 = vld [vmem:[#allocation6 + $0x320] sm:$0xff]  ;;  %v3620_v3 = vld [vmem:[#allocation6 + $0x328] sm:$0xff] }
 0x22e   :  { %3313 = vmatpush1.bf16.msra.mxu0 %v8437_v22  ;;  %3477 = vmatpush1.bf16.msra.mxu1 %v8439_v24  ;;  %v8489_v22 = vcombine.low %v3567_v11, %v3571_v13  ;;  %v8491_v24 = vcombine.low %v3568_v57, %v3572_v14  ;;  %v3627_v11 = vld [vmem:[#allocation6 + $0x360] sm:$0xff]  ;;  %v3624_v13 = vld [vmem:[#allocation6 + $0x348] sm:$0xff] }
 0x22f   :  { %6633 = vmatprep.subr.bf16.mxu0 %v8442_v26  ;;  %6797 = vmatprep.subr.bf16.mxu1 %v8444_v27  ;;  %v8498_v26 = vcombine.high %v3575_v18, %v3579_v19  ;;  %v8500_v27 = vcombine.high %v3576_v20, %v3580_v21  ;;  %v3628_v57 = vld [vmem:[#allocation6 + $0x368] sm:$0xff]  ;;  %v3631_v18 = vld [vmem:[#allocation6 + $0x380] sm:$0xff]  ;;  %v581_v20 = vsub.s32 3, %v9622_v46 }
 0x230   :  { %v3635_v19 = vld [vmem:[#allocation6 + $0x3a0] sm:$0xff]  ;;  %v3632_v21 = vld [vmem:[#allocation6 + $0x388] sm:$0xff] }
 0x231   :  { %3331 = vmatmul.mubr.bf16.vlgmr.msra.gmra.mrb[4].mxu0 %v9604_v45  ;;  %3495 = vmatmul.mubr.bf16.vlgmr.msra.gmra.mrb[4].mxu1 %v9604_v45  ;;  %v8459_v45 = vcombine.low %v3536_v38, %v3540_v39  ;;  %v3596_v38 = vld [vmem:[#allocation6 + $0x268] sm:$0xff]  ;;  %v8505_v39 = vcombine.low %v3583_v25, %v3587_v23 }
 0x232   :  { %6634 = vmatpush1.bf16.msra.mxu0 %v8441_v29  ;;  %6665 = vmatprep.mubr.bf16.mxu0 %v9636_v37  ;;  %v3588_v29 = vld [vmem:[#allocation6 + $0x228] sm:$0xff] }
 0x233   :  { %6798 = vmatpush1.bf16.msra.mxu1 %v8443_v36  ;;  %6829 = vmatprep.mubr.bf16.mxu1 %v9636_v37  ;;  %v8506_v36 = vcombine.high %v3583_v25, %v3587_v23  ;;  %v8554_v25 = vcombine.high %v3631_v18, %v3635_v19 }
 0x234   :  { %6635 = vmatprep.subr.bf16.mxu0 %v8450_v32  ;;  %6799 = vmatprep.subr.bf16.mxu1 %v8452_v33  ;;  %v8508_v32 = vcombine.high %v3584_v28, %v3588_v29  ;;  %v3592_v33 = vld [vmem:[#allocation6 + $0x248] sm:$0xff] }
 0x236   :  { %6636 = vmatpush1.bf16.msra.mxu0 %v8449_v40  ;;  %v8507_v40 = vcombine.low %v3584_v28, %v3588_v29  ;;  %v3639_v28 = vld [vmem:[#allocation6 + $0x3c0] sm:$0xff] }
 0x237   :  { %6800 = vmatpush1.bf16.msra.mxu1 %v8451_v41  ;;  %6637 = vmatprep.subr.bf16.mxu0 %v8458_v42  ;;  %v8514_v41 = vcombine.high %v3591_v34, %v3595_v35  ;;  %v8516_v42 = vcombine.high %v3592_v33, %v3596_v38  ;;  %v3643_v29 = vld [vmem:[#allocation6 + $0x3e0] sm:$0xff] }
 0x238   :  { %6801 = vmatprep.subr.bf16.mxu1 %v8460_v53  ;;  %v3599_v53 = vld [vmem:[#allocation6 + $0x280] sm:$0xff] }
 0x239   :  { %v8521_v58 = vcombine.low %v3599_v53, %v3603_v43 }
 0x23a   :  { %6638 = vmatpush1.bf16.msra.mxu0 %v8457_v49  ;;  %v8515_v49 = vcombine.low %v3592_v33, %v3596_v38  ;;  %v8562_v33 = vcombine.high %v3639_v28, %v3643_v29 }
 0x23b   :  { %6802 = vmatpush1.bf16.msra.mxu1 %v8459_v45  ;;  %6639 = vmatprep.subr.bf16.mxu0 %v8466_v50  ;;  %v8522_v45 = vcombine.high %v3599_v53, %v3603_v43  ;;  %v8524_v50 = vcombine.high %v3600_v44, %v3604_v47  ;;  %v3652_v53 = vld [vmem:[#allocation6 + $0x428] sm:$0xff]  ;;  %v8561_v43 = vcombine.low %v3639_v28, %v3643_v29 }
 0x23c   :  { %6803 = vmatprep.subr.bf16.mxu1 %v8468_v51  ;;  %v3607_v51 = vld [vmem:[#allocation6 + $0x2c0] sm:$0xff]  ;;  %v3688_v28 = vld [vmem:[#allocation6 + $0x548] sm:$0xff] }
 0x23d   :  { %v8529_v5 = vcombine.low %v3607_v51, %v3611_v52  ;;  %v3692_v29 = vld [vmem:[#allocation6 + $0x568] sm:$0xff] }
 0x23e   :  { %6640 = vmatpush1.bf16.msra.mxu0 %v8465_v59  ;;  %v8523_v59 = vcombine.low %v3600_v44, %v3604_v47 }
 0x23f   :  { %6804 = vmatpush1.bf16.msra.mxu1 %v8467_v61  ;;  %6641 = vmatprep.subr.bf16.mxu0 %v8474_v62  ;;  %v8530_v61 = vcombine.high %v3607_v51, %v3611_v52  ;;  %v8532_v62 = vcombine.high %v3608_v54, %v3612_v55  ;;  %v3656_v52 = vld [vmem:[#allocation6 + $0x448] sm:$0xff] }
 0x240   :  { %6805 = vmatprep.subr.bf16.mxu1 %v8476_v63  ;;  %v3615_v63 = vld [vmem:[#allocation6 + $0x300] sm:$0xff] }
 0x241   :  { %v8537_v14 = vcombine.low %v3615_v63, %v3619_v1 }
 0x242   :  { %6642 = vmatpush1.bf16.msra.mxu0 %v8473_v6  ;;  %v8531_v6 = vcombine.low %v3608_v54, %v3612_v55  ;;  %v3660_v54 = vld [vmem:[#allocation6 + $0x468] sm:$0xff] }
 0x243   :  { %6806 = vmatpush1.bf16.msra.mxu1 %v8475_v7  ;;  %6643 = vmatprep.subr.bf16.mxu0 %v8482_v8  ;;  %v8538_v7 = vcombine.high %v3615_v63, %v3619_v1  ;;  %v8540_v8 = vcombine.high %v3616_v2, %v3620_v3  ;;  %v8580_v63 = vcombine.high %v3656_v52, %v3660_v54  ;;  %v3664_v1 = vld [vmem:[#allocation6 + $0x488] sm:$0xff] }
 0x244   :  { %6807 = vmatprep.subr.bf16.mxu1 %v8484_v10  ;;  %v3623_v10 = vld [vmem:[#allocation6 + $0x340] sm:$0xff] }
 0x246   :  { %6644 = vmatpush1.bf16.msra.mxu0 %v8481_v15  ;;  %v569_v15 = vsub.s32 0, %v9622_v46 }
 0x247   :  { %6808 = vmatpush1.bf16.msra.mxu1 %v8483_v16  ;;  %6645 = vmatprep.subr.bf16.mxu0 %v8490_v12  ;;  %v8539_v16 = vcombine.low %v3616_v2, %v3620_v3  ;;  %v8546_v12 = vcombine.high %v3623_v10, %v3627_v11  ;;  %v3668_v2 = vld [vmem:[#allocation6 + $0x4a8] sm:$0xff] }
 0x248   :  { %6809 = vmatprep.subr.bf16.mxu1 %v8492_v17  ;;  %v8548_v17 = vcombine.high %v3624_v13, %v3628_v57 }
 0x24a   :  { %6646 = vmatpush1.bf16.msra.mxu0 %v8489_v22  ;;  %v3636_v22 = vld [vmem:[#allocation6 + $0x3a8] sm:$0xff] }
 0x24b   :  { %6810 = vmatpush1.bf16.msra.mxu1 %v8491_v24  ;;  %6647 = vmatprep.subr.bf16.mxu0 %v8498_v26  ;;  %v8545_v24 = vcombine.low %v3623_v10, %v3627_v11  ;;  %v570_v26 = vrot.slane %v9625_v60, %v569_v15  ;;  %v8556_v23 = vcombine.high %v3632_v21, %v3636_v22  ;;  %v3675_v10 = vld [vmem:[#allocation6 + $0x4e0] sm:$0xff]  ;;  %v3672_v11 = vld [vmem:[#allocation6 + $0x4c8] sm:$0xff] }
 0x24c   :  { %6811 = vmatprep.subr.bf16.mxu1 %v8500_v27  ;;  %v8547_v27 = vcombine.low %v3624_v13, %v3628_v57  ;;  %v8555_v35 = vcombine.low %v3632_v21, %v3636_v22  ;;  %v3676_v13 = vld [vmem:[#allocation6 + $0x4e8] sm:$0xff] }
 0x24d   :  { %v9106_v34 = vadd.f32 %v9627_v0, %v570_v26  ;;  %v3684_v21 = vld [vmem:[#allocation6 + $0x528] sm:$0xff] }
 0x24e   :  { %6648 = vmatpush1.bf16.msra.mxu0 %v8497_v30  ;;  %v582_v30 = vrot.slane %v9625_v60, %v581_v20 }
 0x24f   :  { %6812 = vmatpush1.bf16.msra.mxu1 %v8499_v31  ;;  %6649 = vmatprep.subr.bf16.mxu0 %v8506_v36  ;;  %v3640_v31 = vld [vmem:[#allocation6 + $0x3c8] sm:$0xff]  ;;  %v3503_v44 = vmax.f32 %v9106_v34, 0.0  ;;  %v3695_v34 = vld [vmem:[#allocation6 + $0x580] sm:$0xff] }
 0x250   :  { %6813 = vmatprep.subr.bf16.mxu1 %v8508_v32  ;;  %v3644_v36 = vld [vmem:[#allocation6 + $0x3e8] sm:$0xff]  ;;  %v8553_v32 = vcombine.low %v3631_v18, %v3635_v19  ;;  %v3683_v18 = vld [vmem:[#allocation6 + $0x520] sm:$0xff] }
 0x251   :  { %v8564_v38 = vcombine.high %v3640_v31, %v3644_v36  ;;  %v8563_v47 = vcombine.low %v3640_v31, %v3644_v36  ;;  %v9652_v55 = vpack.c.bf16 %v3503_v44, %v3503_v44  ;;  %v3680_v19 = vld [vmem:[#allocation6 + $0x508] sm:$0xff] }
 0x252   :  { %6650 = vmatpush1.bf16.msra.mxu0 %v8505_v39  ;;  %v3647_v39 = vld [vmem:[#allocation6 + $0x400] sm:$0xff]  ;;  %v8603_v31 = vcombine.low %v3680_v19, %v3684_v21  ;;  %v3704_v44 = vld [vmem:[#allocation6 + $0x5c8] sm:$0xff] }
 0x253   :  { %6814 = vmatpush1.bf16.msra.mxu1 %v8507_v40  ;;  %6651 = vmatprep.subr.bf16.mxu0 %v8514_v41  ;;  %v3651_v40 = vld [vmem:[#allocation6 + $0x420] sm:$0xff]  ;;  %v9109_v41 = vadd.f32 %v9634_v9, %v582_v30 }
 0x254   :  { %6815 = vmatprep.subr.bf16.mxu1 %v8516_v42  ;;  %v3648_v42 = vld [vmem:[#allocation6 + $0x408] sm:$0xff]  ;;  %v8569_v51 = vcombine.low %v3647_v39, %v3651_v40 }
 0x255   :  { %v8572_v0 = vcombine.high %v3648_v42, %v3652_v53  ;;  %v8571_v9 = vcombine.low %v3648_v42, %v3652_v53  ;;  %v3703_v53 = vld [vmem:[#allocation6 + $0x5c0] sm:$0xff] }
 0x256   :  { %6652 = vmatpush1.bf16.msra.mxu0 %v8513_v48  ;;  %v8570_v48 = vcombine.high %v3647_v39, %v3651_v40  ;;  %v8611_v40 = vcombine.low %v3688_v28, %v3692_v29 }
 0x257   :  { %6816 = vmatpush1.bf16.msra.mxu1 %v8515_v49  ;;  %6653 = vmatprep.subr.bf16.mxu0 %v8522_v45  ;;  %v3506_v49 = vmax.f32 %v9109_v41, 0.0  ;;  %v3655_v45 = vld [vmem:[#allocation6 + $0x440] sm:$0xff] }
 0x258   :  { %6817 = vmatprep.subr.bf16.mxu1 %v8524_v50  ;;  %v3659_v50 = vld [vmem:[#allocation6 + $0x460] sm:$0xff] }
 0x259   :  { %v8577_v3 = vcombine.low %v3655_v45, %v3659_v50 }
 0x25a   :  { %6654 = vmatpush1.bf16.msra.mxu0 %v8521_v58  ;;  %v8578_v58 = vcombine.high %v3655_v45, %v3659_v50  ;;  %v3711_v50 = vld [vmem:[#allocation6 + $0x600] sm:$0xff] }
 0x25b   :  { %6818 = vmatpush1.bf16.msra.mxu1 %v8523_v59  ;;  %6655 = vmatprep.subr.bf16.mxu0 %v8530_v61  ;;  %v3663_v59 = vld [vmem:[#allocation6 + $0x480] sm:$0xff] }
 0x25c   :  { %6819 = vmatprep.subr.bf16.mxu1 %v8532_v62  ;;  %v3667_v61 = vld [vmem:[#allocation6 + $0x4a0] sm:$0xff]  ;;  %v9654_v62 = vpack.c.bf16 %v3506_v49, %v3506_v49 }
 0x25d   :  { %v8585_v57 = vcombine.low %v3663_v59, %v3667_v61 }
 0x25e   :  { %6656 = vmatpush1.bf16.msra.mxu0 %v8529_v5  ;;  %v8579_v5 = vcombine.low %v3656_v52, %v3660_v54  ;;  %v3712_v52 = vld [vmem:[#allocation6 + $0x608] sm:$0xff] }
 0x25f   :  { %6820 = vmatpush1.bf16.msra.mxu1 %v8531_v6  ;;  %6657 = vmatprep.subr.bf16.mxu0 %v8538_v7  ;;  %v8586_v6 = vcombine.high %v3663_v59, %v3667_v61  ;;  %v8588_v7 = vcombine.high %v3664_v1, %v3668_v2  ;;  %v3716_v54 = vld [vmem:[#allocation6 + $0x628] sm:$0xff] }
 0x260   :  { %6821 = vmatprep.subr.bf16.mxu1 %v8540_v8  ;;  %v3671_v8 = vld [vmem:[#allocation6 + $0x4c0] sm:$0xff]  ;;  %v8636_v61 = vcombine.high %v3712_v52, %v3716_v54 }
 0x261   :  { %v8593_v22 = vcombine.low %v3671_v8, %v3675_v10 }
 0x262   :  { %6658 = vmatpush1.bf16.msra.mxu0 %v8537_v14  ;;  %v8587_v14 = vcombine.low %v3664_v1, %v3668_v2  ;;  %v3723_v1 = vld [vmem:[#allocation6 + $0x660] sm:$0xff]  ;;  %v3720_v2 = vld [vmem:[#allocation6 + $0x648] sm:$0xff] }
 0x263   :  { %6822 = vmatpush1.bf16.msra.mxu1 %v8539_v16  ;;  %6659 = vmatprep.subr.bf16.mxu0 %v8546_v12  ;;  %v8594_v16 = vcombine.high %v3671_v8, %v3675_v10  ;;  %v8596_v12 = vcombine.high %v3672_v11, %v3676_v13  ;;  %v3727_v10 = vld [vmem:[#allocation6 + $0x680] sm:$0xff] }
 0x264   :  { %6823 = vmatprep.subr.bf16.mxu1 %v8548_v17  ;;  %v3679_v17 = vld [vmem:[#allocation6 + $0x500] sm:$0xff] }
 0x265   :  { %v8602_v26 = vcombine.high %v3679_v17, %v3683_v18  ;;  %v8601_v30 = vcombine.low %v3679_v17, %v3683_v18  ;;  %v3735_v18 = vld [vmem:[#allocation6 + $0x6c0] sm:$0xff] }
 0x266   :  { %6660 = vmatpush1.bf16.msra.mxu0 %v8545_v24  ;;  %v8595_v24 = vcombine.low %v3672_v11, %v3676_v13  ;;  %v3731_v11 = vld [vmem:[#allocation6 + $0x6a0] sm:$0xff]  ;;  %v3728_v13 = vld [vmem:[#allocation6 + $0x688] sm:$0xff] }
 0x267   :  { %6824 = vmatpush1.bf16.msra.mxu1 %v8547_v27  ;;  %6661 = vmatprep.subr.bf16.mxu0 %v8554_v25  ;;  %v8604_v27 = vcombine.high %v3680_v19, %v3684_v21  ;;  %v3687_v25 = vld [vmem:[#allocation6 + $0x540] sm:$0xff]  ;;  %v3736_v21 = vld [vmem:[#allocation6 + $0x6c8] sm:$0xff] }
 0x268   :  { %6825 = vmatprep.subr.bf16.mxu1 %v8556_v23  ;;  %v3691_v23 = vld [vmem:[#allocation6 + $0x560] sm:$0xff] }
 0x269   :  { %v8610_v36 = vcombine.high %v3687_v25, %v3691_v23  ;;  %v8609_v39 = vcombine.low %v3687_v25, %v3691_v23  ;;  %v3739_v19 = vld [vmem:[#allocation6 + $0x6e0] sm:$0xff] }
 0x26a   :  { %6662 = vmatpush1.bf16.msra.mxu0 %v8553_v32  ;;  %v8612_v32 = vcombine.high %v3688_v28, %v3692_v29  ;;  %v3743_v23 = vld [vmem:[#allocation6 + $0x700] sm:$0xff]  ;;  %v3744_v29 = vld [vmem:[#allocation6 + $0x708] sm:$0xff] }
 0x26b   :  { %6826 = vmatpush1.bf16.msra.mxu1 %v8555_v35  ;;  %6663 = vmatprep.subr.bf16.mxu0 %v8562_v33  ;;  %v3699_v35 = vld [vmem:[#allocation6 + $0x5a0] sm:$0xff]  ;;  %v3696_v33 = vld [vmem:[#allocation6 + $0x588] sm:$0xff] }
 0x26c   :  { %6827 = vmatprep.subr.bf16.mxu1 %v8564_v38  ;;  %v3700_v38 = vld [vmem:[#allocation6 + $0x5a8] sm:$0xff]  ;;  %v8618_v41 = vcombine.high %v3695_v34, %v3699_v35  ;;  %v3747_v28 = vld [vmem:[#allocation6 + $0x720] sm:$0xff] }
 0x26d   :  { %v8620_v42 = vcombine.high %v3696_v33, %v3700_v38 }
 0x26e   :  { %6664 = vmatpush1.bf16.msra.mxu0 %v8561_v43  ;;  %v3707_v43 = vld [vmem:[#allocation6 + $0x5e0] sm:$0xff] }
 0x26f   :  { %6828 = vmatpush1.bf16.msra.mxu1 %v8563_v47  ;;  %6674 = vmatprep.subr.bf16.mxu0 %v8570_v48  ;;  %v3708_v47 = vld [vmem:[#allocation6 + $0x5e8] sm:$0xff]  ;;  %v8617_v48 = vcombine.low %v3695_v34, %v3699_v35  ;;  %v8626_v49 = vcombine.high %v3703_v53, %v3707_v43  ;;  %v3751_v35 = vld [vmem:[#allocation6 + $0x740] sm:$0xff] }
 0x270   :  { %6838 = vmatprep.subr.bf16.mxu1 %v8572_v0  ;;  %v8619_v0 = vcombine.low %v3696_v33, %v3700_v38  ;;  %v8628_v45 = vcombine.high %v3704_v44, %v3708_v47  ;;  %v3755_v33 = vld [vmem:[#allocation6 + $0x760] sm:$0xff]  ;;  %v3752_v38 = vld [vmem:[#allocation6 + $0x748] sm:$0xff] }
 0x271   :  { %6666 = vmatmul.mubr.bf16.vlgmr.msra.gmra.mrb[8].mxu0 %v9652_v55 }
 0x272   :  { %6830 = vmatmul.mubr.bf16.vlgmr.msra.gmra.mrb[8].mxu1 %v9652_v55  ;;  %6675 = vmatpush1.bf16.msra.mxu0 %v8569_v51  ;;  %v3715_v51 = vld [vmem:[#allocation6 + $0x620] sm:$0xff] }
 0x273   :  { %6706 = vmatprep.mubr.bf16.mxu0 %v9654_v62  ;;  %6839 = vmatpush1.bf16.msra.mxu1 %v8571_v9  ;;  %v8625_v9 = vcombine.low %v3703_v53, %v3707_v43  ;;  %v8634_v59 = vcombine.high %v3711_v50, %v3715_v51  ;;  %v8674_v53 = vcombine.high %v3751_v35, %v3755_v33 }
 0x274   :  { %6870 = vmatprep.mubr.bf16.mxu1 %v9654_v62  ;;  %6676 = vmatprep.subr.bf16.mxu0 %v8578_v58  ;;  %v8627_v58 = vcombine.low %v3704_v44, %v3708_v47  ;;  %v3759_v44 = vld [vmem:[#allocation6 + $0x780] sm:$0xff] }
 0x275   :  { %6840 = vmatprep.subr.bf16.mxu1 %v8580_v63  ;;  %v3719_v63 = vld [vmem:[#allocation6 + $0x640] sm:$0xff] }
 0x276   :  { %6677 = vmatpush1.bf16.msra.mxu0 %v8577_v3  ;;  %v3724_v3 = vld [vmem:[#allocation6 + $0x668] sm:$0xff]  ;;  %v3763_v47 = vld [vmem:[#allocation6 + $0x7a0] sm:$0xff] }
 0x277   :  { %6841 = vmatpush1.bf16.msra.mxu1 %v8579_v5  ;;  %6678 = vmatprep.subr.bf16.mxu0 %v8586_v6  ;;  %v8633_v5 = vcombine.low %v3711_v50, %v3715_v51  ;;  %v8635_v6 = vcombine.low %v3712_v52, %v3716_v54  ;;  %v8644_v8 = vcombine.high %v3720_v2, %v3724_v3  ;;  %v3767_v54 = vld [vmem:[#allocation6 + $0x7c0] sm:$0xff] }
 0x278   :  { %6842 = vmatprep.subr.bf16.mxu1 %v8588_v7  ;;  %v8642_v7 = vcombine.high %v3719_v63, %v3723_v1  ;;  %v8682_v51 = vcombine.high %v3759_v44, %v3763_v47 }
 0x27a   :  { %6679 = vmatpush1.bf16.msra.mxu0 %v8585_v57  ;;  %v3732_v57 = vld [vmem:[#allocation6 + $0x6a8] sm:$0xff] }
 0x27b   :  { %6843 = vmatpush1.bf16.msra.mxu1 %v8587_v14  ;;  %6680 = vmatprep.subr.bf16.mxu0 %v8594_v16  ;;  %v8641_v14 = vcombine.low %v3719_v63, %v3723_v1  ;;  %v8643_v16 = vcombine.low %v3720_v2, %v3724_v3  ;;  %v8652_v17 = vcombine.high %v3728_v13, %v3732_v57  ;;  %v3775_v3 = vld [vmem:[#allocation6 + $0x800] sm:$0xff] }
 0x27c   :  { %6844 = vmatprep.subr.bf16.mxu1 %v8596_v12  ;;  %v8650_v12 = vcombine.high %v3727_v10, %v3731_v11 }
 0x27e   :  { %6681 = vmatpush1.bf16.msra.mxu0 %v8593_v22  ;;  %v3740_v22 = vld [vmem:[#allocation6 + $0x6e8] sm:$0xff] }
 0x27f   :  { %6845 = vmatpush1.bf16.msra.mxu1 %v8595_v24  ;;  %6682 = vmatprep.subr.bf16.mxu0 %v8602_v26  ;;  %v8649_v24 = vcombine.low %v3727_v10, %v3731_v11  ;;  %v8651_v26 = vcombine.low %v3728_v13, %v3732_v57  ;;  %v8660_v25 = vcombine.high %v3736_v21, %v3740_v22 }
 0x280   :  { %6846 = vmatprep.subr.bf16.mxu1 %v8604_v27  ;;  %v8658_v27 = vcombine.high %v3735_v18, %v3739_v19 }
 0x282   :  { %6683 = vmatpush1.bf16.msra.mxu0 %v8601_v30  ;;  %v3748_v30 = vld [vmem:[#allocation6 + $0x728] sm:$0xff] }
 0x283   :  { %6847 = vmatpush1.bf16.msra.mxu1 %v8603_v31  ;;  %6684 = vmatprep.subr.bf16.mxu0 %v8610_v36  ;;  %v8657_v31 = vcombine.low %v3735_v18, %v3739_v19  ;;  %v8659_v36 = vcombine.low %v3736_v21, %v3740_v22  ;;  %v8668_v34 = vcombine.high %v3744_v29, %v3748_v30 }
 0x284   :  { %6848 = vmatprep.subr.bf16.mxu1 %v8612_v32  ;;  %v8666_v32 = vcombine.high %v3743_v23, %v3747_v28 }
 0x286   :  { %6685 = vmatpush1.bf16.msra.mxu0 %v8609_v39  ;;  %v3756_v39 = vld [vmem:[#allocation6 + $0x768] sm:$0xff] }
 0x287   :  { %6849 = vmatpush1.bf16.msra.mxu1 %v8611_v40  ;;  %6686 = vmatprep.subr.bf16.mxu0 %v8618_v41  ;;  %v8665_v40 = vcombine.low %v3743_v23, %v3747_v28  ;;  %v577_v41 = vsub.s32 2, %v9622_v46  ;;  %v8676_v43 = vcombine.high %v3752_v38, %v3756_v39  ;;  %v8675_v50 = vcombine.low %v3752_v38, %v3756_v39 }
 0x288   :  { %6850 = vmatprep.subr.bf16.mxu1 %v8620_v42  ;;  %v8667_v42 = vcombine.low %v3744_v29, %v3748_v30 }
 0x28a   :  { %6687 = vmatpush1.bf16.msra.mxu0 %v8617_v48  ;;  %v3760_v48 = vld [vmem:[#allocation6 + $0x788] sm:$0xff] }
 0x28b   :  { %6851 = vmatpush1.bf16.msra.mxu1 %v8619_v0  ;;  %6688 = vmatprep.subr.bf16.mxu0 %v8626_v49  ;;  %v3764_v0 = vld [vmem:[#allocation6 + $0x7a8] sm:$0xff]  ;;  %v8673_v49 = vcombine.low %v3751_v35, %v3755_v33 }
 0x28c   :  { %6852 = vmatprep.subr.bf16.mxu1 %v8628_v45  ;;  %v578_v45 = vrot.slane %v9625_v60, %v577_v41  ;;  %v8684_v52 = vcombine.high %v3760_v48, %v3764_v0  ;;  %v8683_v1 = vcombine.low %v3760_v48, %v3764_v0 }
 0x28e   :  { %6689 = vmatpush1.bf16.msra.mxu0 %v8625_v9  ;;  %v3771_v9 = vld [vmem:[#allocation6 + $0x7e0] sm:$0xff]  ;;  %v9108_v63 = vadd.f32 %v9629_v4, %v578_v45 }
 0x28f   :  { %6853 = vmatpush1.bf16.msra.mxu1 %v8627_v58  ;;  %6690 = vmatprep.subr.bf16.mxu0 %v8634_v59  ;;  %v3768_v58 = vld [vmem:[#allocation6 + $0x7c8] sm:$0xff]  ;;  %v8690_v2 = vcombine.high %v3767_v54, %v3771_v9  ;;  %v3783_v4 = vld [vmem:[#allocation6 + $0x840] sm:$0xff] }
 0x290   :  { %6854 = vmatprep.subr.bf16.mxu1 %v8636_v61  ;;  %v3772_v59 = vld [vmem:[#allocation6 + $0x7e8] sm:$0xff]  ;;  %v8681_v61 = vcombine.low %v3759_v44, %v3763_v47  ;;  %v3505_v10 = vmax.f32 %v9108_v63, 0.0  ;;  %v3819_v45 = vld [vmem:[#allocation6 + $0x960] sm:$0xff] }
 0x291   :  { %v8692_v60 = vcombine.high %v3768_v58, %v3772_v59  ;;  %v8691_v11 = vcombine.low %v3768_v58, %v3772_v59  ;;  %v3823_v59 = vld [vmem:[#allocation6 + $0x980] sm:$0xff]  ;;  %v3824_v63 = vld [vmem:[#allocation6 + $0x988] sm:$0xff] }
 0x292   :  { %6691 = vmatpush1.bf16.msra.mxu0 %v8633_v5  ;;  %v3779_v5 = vld [vmem:[#allocation6 + $0x820] sm:$0xff]  ;;  %v9665_v18 = vpack.c.bf16 %v3505_v10, %v3505_v10  ;;  %v3836_v10 = vld [vmem:[#allocation6 + $0x9e8] sm:$0xff] }
 0x293   :  { %6855 = vmatpush1.bf16.msra.mxu1 %v8635_v6  ;;  %6692 = vmatprep.subr.bf16.mxu0 %v8642_v7  ;;  %v3776_v6 = vld [vmem:[#allocation6 + $0x808] sm:$0xff]  ;;  %v8698_v13 = vcombine.high %v3775_v3, %v3779_v5 }
 0x294   :  { %6856 = vmatprep.subr.bf16.mxu1 %v8644_v8  ;;  %v3780_v7 = vld [vmem:[#allocation6 + $0x828] sm:$0xff]  ;;  %v8689_v8 = vcombine.low %v3767_v54, %v3771_v9 }
 0x295   :  { %v8700_v57 = vcombine.high %v3776_v6, %v3780_v7  ;;  %v8699_v19 = vcombine.low %v3776_v6, %v3780_v7  ;;  %v3831_v6 = vld [vmem:[#allocation6 + $0x9c0] sm:$0xff] }
 0x296   :  { %6693 = vmatpush1.bf16.msra.mxu0 %v8641_v14  ;;  %v3787_v14 = vld [vmem:[#allocation6 + $0x860] sm:$0xff] }
 0x297   :  { %6857 = vmatpush1.bf16.msra.mxu1 %v8643_v16  ;;  %6694 = vmatprep.subr.bf16.mxu0 %v8650_v12  ;;  %v3784_v16 = vld [vmem:[#allocation6 + $0x848] sm:$0xff]  ;;  %v8706_v21 = vcombine.high %v3783_v4, %v3787_v14  ;;  %v8705_v23 = vcombine.low %v3783_v4, %v3787_v14  ;;  %v3835_v7 = vld [vmem:[#allocation6 + $0x9e0] sm:$0xff] }
 0x298   :  { %6858 = vmatprep.subr.bf16.mxu1 %v8652_v17  ;;  %v3788_v12 = vld [vmem:[#allocation6 + $0x868] sm:$0xff]  ;;  %v8697_v17 = vcombine.low %v3775_v3, %v3779_v5  ;;  %v3839_v14 = vld [vmem:[#allocation6 + $0xa00] sm:$0xff] }
 0x299   :  { %v8708_v22 = vcombine.high %v3784_v16, %v3788_v12  ;;  %v8707_v28 = vcombine.low %v3784_v16, %v3788_v12  ;;  %v3843_v16 = vld [vmem:[#allocation6 + $0xa20] sm:$0xff]  ;;  %v3840_v12 = vld [vmem:[#allocation6 + $0xa08] sm:$0xff] }
 0x29a   :  { %6695 = vmatpush1.bf16.msra.mxu0 %v8649_v24  ;;  %v3791_v24 = vld [vmem:[#allocation6 + $0x880] sm:$0xff] }
 0x29b   :  { %6859 = vmatpush1.bf16.msra.mxu1 %v8651_v26  ;;  %6696 = vmatprep.subr.bf16.mxu0 %v8658_v27  ;;  %v3795_v26 = vld [vmem:[#allocation6 + $0x8a0] sm:$0xff]  ;;  %v3792_v27 = vld [vmem:[#allocation6 + $0x888] sm:$0xff] }
 0x29c   :  { %6860 = vmatprep.subr.bf16.mxu1 %v8660_v25  ;;  %v3796_v25 = vld [vmem:[#allocation6 + $0x8a8] sm:$0xff]  ;;  %v8714_v29 = vcombine.high %v3791_v24, %v3795_v26  ;;  %v8713_v35 = vcombine.low %v3791_v24, %v3795_v26  ;;  %v3847_v26 = vld [vmem:[#allocation6 + $0xa40] sm:$0xff] }
 0x29d   :  { %v8716_v30 = vcombine.high %v3792_v27, %v3796_v25  ;;  %v8715_v33 = vcombine.low %v3792_v27, %v3796_v25  ;;  %v3851_v27 = vld [vmem:[#allocation6 + $0xa60] sm:$0xff]  ;;  %v3848_v25 = vld [vmem:[#allocation6 + $0xa48] sm:$0xff] }
 0x29e   :  { %6697 = vmatpush1.bf16.msra.mxu0 %v8657_v31  ;;  %v3799_v31 = vld [vmem:[#allocation6 + $0x8c0] sm:$0xff] }
 0x29f   :  { %6861 = vmatpush1.bf16.msra.mxu1 %v8659_v36  ;;  %6698 = vmatprep.subr.bf16.mxu0 %v8666_v32  ;;  %v3803_v36 = vld [vmem:[#allocation6 + $0x8e0] sm:$0xff]  ;;  %v3800_v32 = vld [vmem:[#allocation6 + $0x8c8] sm:$0xff] }
 0x2a0   :  { %6862 = vmatprep.subr.bf16.mxu1 %v8668_v34  ;;  %v3804_v34 = vld [vmem:[#allocation6 + $0x8e8] sm:$0xff]  ;;  %v8722_v38 = vcombine.high %v3799_v31, %v3803_v36  ;;  %v8721_v44 = vcombine.low %v3799_v31, %v3803_v36  ;;  %v3855_v36 = vld [vmem:[#allocation6 + $0xa80] sm:$0xff] }
 0x2a1   :  { %v8724_v39 = vcombine.high %v3800_v32, %v3804_v34  ;;  %v8723_v47 = vcombine.low %v3800_v32, %v3804_v34  ;;  %v3859_v32 = vld [vmem:[#allocation6 + $0xaa0] sm:$0xff]  ;;  %v3856_v34 = vld [vmem:[#allocation6 + $0xa88] sm:$0xff] }
 0x2a2   :  { %6699 = vmatpush1.bf16.msra.mxu0 %v8665_v40  ;;  %v3807_v40 = vld [vmem:[#allocation6 + $0x900] sm:$0xff] }
 0x2a3   :  { %6863 = vmatpush1.bf16.msra.mxu1 %v8667_v42  ;;  %6700 = vmatprep.subr.bf16.mxu0 %v8674_v53  ;;  %v3811_v42 = vld [vmem:[#allocation6 + $0x920] sm:$0xff]  ;;  %v3808_v53 = vld [vmem:[#allocation6 + $0x908] sm:$0xff] }
 0x2a4   :  { %6864 = vmatprep.subr.bf16.mxu1 %v8676_v43  ;;  %v3812_v43 = vld [vmem:[#allocation6 + $0x928] sm:$0xff]  ;;  %v8730_v48 = vcombine.high %v3807_v40, %v3811_v42 }
 0x2a5   :  { %v8732_v0 = vcombine.high %v3808_v53, %v3812_v43  ;;  %v8731_v54 = vcombine.low %v3808_v53, %v3812_v43  ;;  %v3867_v53 = vld [vmem:[#allocation6 + $0xae0] sm:$0xff]  ;;  %v3864_v43 = vld [vmem:[#allocation6 + $0xac8] sm:$0xff] }
 0x2a6   :  { %6701 = vmatpush1.bf16.msra.mxu0 %v8673_v49  ;;  %v3815_v49 = vld [vmem:[#allocation6 + $0x940] sm:$0xff] }
 0x2a7   :  { %6865 = vmatpush1.bf16.msra.mxu1 %v8675_v50  ;;  %6702 = vmatprep.subr.bf16.mxu0 %v8682_v51  ;;  %v3816_v50 = vld [vmem:[#allocation6 + $0x948] sm:$0xff]  ;;  %v8738_v9 = vcombine.high %v3815_v49, %v3819_v45 }
 0x2a8   :  { %6866 = vmatprep.subr.bf16.mxu1 %v8684_v52  ;;  %v3820_v51 = vld [vmem:[#allocation6 + $0x968] sm:$0xff]  ;;  %v8729_v52 = vcombine.low %v3807_v40, %v3811_v42  ;;  %v3863_v42 = vld [vmem:[#allocation6 + $0xac0] sm:$0xff] }
 0x2a9   :  { %v8740_v58 = vcombine.high %v3816_v50, %v3820_v51 }
 0x2aa   :  { %6703 = vmatpush1.bf16.msra.mxu0 %v8681_v61  ;;  %v3827_v61 = vld [vmem:[#allocation6 + $0x9a0] sm:$0xff] }
 0x2ab   :  { %6867 = vmatpush1.bf16.msra.mxu1 %v8683_v1  ;;  %6704 = vmatprep.subr.bf16.mxu0 %v8690_v2  ;;  %v3828_v1 = vld [vmem:[#allocation6 + $0x9a8] sm:$0xff]  ;;  %v8737_v2 = vcombine.low %v3815_v49, %v3819_v45  ;;  %v8746_v3 = vcombine.high %v3823_v59, %v3827_v61  ;;  %v3871_v45 = vld [vmem:[#allocation6 + $0xb00] sm:$0xff] }
 0x2ac   :  { %6868 = vmatprep.subr.bf16.mxu1 %v8692_v60  ;;  %v8739_v60 = vcombine.low %v3816_v50, %v3820_v51  ;;  %v8748_v5 = vcombine.high %v3824_v63, %v3828_v1  ;;  %v3875_v50 = vld [vmem:[#allocation6 + $0xb20] sm:$0xff]  ;;  %v3872_v51 = vld [vmem:[#allocation6 + $0xb08] sm:$0xff] }
 0x2ae   :  { %6705 = vmatpush1.bf16.msra.mxu0 %v8689_v8  ;;  %v3832_v8 = vld [vmem:[#allocation6 + $0x9c8] sm:$0xff] }
 0x2af   :  { %6869 = vmatpush1.bf16.msra.mxu1 %v8691_v11  ;;  %6715 = vmatprep.subr.bf16.mxu0 %v8698_v13  ;;  %v8745_v11 = vcombine.low %v3823_v59, %v3827_v61  ;;  %v8747_v13 = vcombine.low %v3824_v63, %v3828_v1  ;;  %v8756_v4 = vcombine.high %v3832_v8, %v3836_v10  ;;  %v3879_v61 = vld [vmem:[#allocation6 + $0xb40] sm:$0xff]  ;;  %v3880_v1 = vld [vmem:[#allocation6 + $0xb48] sm:$0xff] }
 0x2b0   :  { %6879 = vmatprep.subr.bf16.mxu1 %v8700_v57  ;;  %v8754_v57 = vcombine.high %v3831_v6, %v3835_v7  ;;  %v3883_v63 = vld [vmem:[#allocation6 + $0xb60] sm:$0xff] }
 0x2b1   :  { %6707 = vmatmul.mubr.bf16.vlgmr.msra.gmra.mrb[8].mxu0 %v9665_v18 }
 0x2b2   :  { %6871 = vmatmul.mubr.bf16.vlgmr.msra.gmra.mrb[8].mxu1 %v9665_v18  ;;  %6716 = vmatpush1.bf16.msra.mxu0 %v8697_v17  ;;  %v3844_v17 = vld [vmem:[#allocation6 + $0xa28] sm:$0xff] }
 0x2b3   :  { %6880 = vmatpush1.bf16.msra.mxu1 %v8699_v19  ;;  %6717 = vmatprep.subr.bf16.mxu0 %v8706_v21  ;;  %v8753_v19 = vcombine.low %v3831_v6, %v3835_v7  ;;  %v8755_v21 = vcombine.low %v3832_v8, %v3836_v10  ;;  %v8764_v24 = vcombine.high %v3840_v12, %v3844_v17  ;;  %v3887_v7 = vld [vmem:[#allocation6 + $0xb80] sm:$0xff]  ;;  %v3888_v10 = vld [vmem:[#allocation6 + $0xb88] sm:$0xff] }
 0x2b4   :  { %6881 = vmatprep.subr.bf16.mxu1 %v8708_v22  ;;  %v8762_v22 = vcombine.high %v3839_v14, %v3843_v16  ;;  %v3891_v8 = vld [vmem:[#allocation6 + $0xba0] sm:$0xff] }
 0x2b6   :  { %6718 = vmatpush1.bf16.msra.mxu0 %v8705_v23  ;;  %v3852_v23 = vld [vmem:[#allocation6 + $0xa68] sm:$0xff] }
 0x2b7   :  { %6882 = vmatpush1.bf16.msra.mxu1 %v8707_v28  ;;  %6719 = vmatprep.subr.bf16.mxu0 %v8714_v29  ;;  %v8761_v28 = vcombine.low %v3839_v14, %v3843_v16  ;;  %v8763_v29 = vcombine.low %v3840_v12, %v3844_v17  ;;  %v8772_v31 = vcombine.high %v3848_v25, %v3852_v23  ;;  %v3895_v16 = vld [vmem:[#allocation6 + $0xbc0] sm:$0xff]  ;;  %v3896_v17 = vld [vmem:[#allocation6 + $0xbc8] sm:$0xff] }
 0x2b8   :  { %6883 = vmatprep.subr.bf16.mxu1 %v8716_v30  ;;  %v8770_v30 = vcombine.high %v3847_v26, %v3851_v27  ;;  %v3899_v12 = vld [vmem:[#allocation6 + $0xbe0] sm:$0xff] }
 0x2ba   :  { %6720 = vmatpush1.bf16.msra.mxu0 %v8713_v35  ;;  %v3860_v35 = vld [vmem:[#allocation6 + $0xaa8] sm:$0xff] }
 0x2bb   :  { %6884 = vmatpush1.bf16.msra.mxu1 %v8715_v33  ;;  %6721 = vmatprep.subr.bf16.mxu0 %v8722_v38  ;;  %v8769_v33 = vcombine.low %v3847_v26, %v3851_v27  ;;  %v8771_v38 = vcombine.low %v3848_v25, %v3852_v23  ;;  %v8780_v40 = vcombine.high %v3856_v34, %v3860_v35  ;;  %v3903_v27 = vld [vmem:[#allocation6 + $0xc00] sm:$0xff]  ;;  %v3904_v23 = vld [vmem:[#allocation6 + $0xc08] sm:$0xff] }
 0x2bc   :  { %6885 = vmatprep.subr.bf16.mxu1 %v8724_v39  ;;  %v8778_v39 = vcombine.high %v3855_v36, %v3859_v32  ;;  %v3907_v25 = vld [vmem:[#allocation6 + $0xc20] sm:$0xff] }
 0x2be   :  { %6722 = vmatpush1.bf16.msra.mxu0 %v8721_v44  ;;  %v3868_v44 = vld [vmem:[#allocation6 + $0xae8] sm:$0xff] }
 0x2bf   :  { %6886 = vmatpush1.bf16.msra.mxu1 %v8723_v47  ;;  %6723 = vmatprep.subr.bf16.mxu0 %v8730_v48  ;;  %v8777_v47 = vcombine.low %v3855_v36, %v3859_v32  ;;  %v8779_v48 = vcombine.low %v3856_v34, %v3860_v35  ;;  %v8788_v49 = vcombine.high %v3864_v43, %v3868_v44  ;;  %v585_v32 = vsub.s32 4, %v9622_v46 }
 0x2c0   :  { %6887 = vmatprep.subr.bf16.mxu1 %v8732_v0  ;;  %v8786_v0 = vcombine.high %v3863_v42, %v3867_v53  ;;  %v589_v34 = vsub.s32 5, %v9622_v46  ;;  %v597_v35 = vsub.s32 7, %v9622_v46 }
 0x2c2   :  { %6724 = vmatpush1.bf16.msra.mxu0 %v8729_v52  ;;  %v3876_v52 = vld [vmem:[#allocation6 + $0xb28] sm:$0xff] }
 0x2c3   :  { %6888 = vmatpush1.bf16.msra.mxu1 %v8731_v54  ;;  %6725 = vmatprep.subr.bf16.mxu0 %v8738_v9  ;;  %v8785_v54 = vcombine.low %v3863_v42, %v3867_v53  ;;  %v8787_v9 = vcombine.low %v3864_v43, %v3868_v44  ;;  %v8796_v59 = vcombine.high %v3872_v51, %v3876_v52 }
 0x2c4   :  { %6889 = vmatprep.subr.bf16.mxu1 %v8740_v58  ;;  %v8794_v58 = vcombine.high %v3871_v45, %v3875_v50 }
 0x2c6   :  { %6726 = vmatpush1.bf16.msra.mxu0 %v8737_v2  ;;  %v3884_v2 = vld [vmem:[#allocation6 + $0xb68] sm:$0xff] }
 0x2c7   :  { %6890 = vmatpush1.bf16.msra.mxu1 %v8739_v60  ;;  %6727 = vmatprep.subr.bf16.mxu0 %v8746_v3  ;;  %v8793_v60 = vcombine.low %v3871_v45, %v3875_v50  ;;  %v8795_v3 = vcombine.low %v3872_v51, %v3876_v52  ;;  %v8804_v6 = vcombine.high %v3880_v1, %v3884_v2 }
 0x2c8   :  { %6891 = vmatprep.subr.bf16.mxu1 %v8748_v5  ;;  %v8802_v5 = vcombine.high %v3879_v61, %v3883_v63 }
 0x2ca   :  { %6728 = vmatpush1.bf16.msra.mxu0 %v8745_v11  ;;  %v3892_v11 = vld [vmem:[#allocation6 + $0xba8] sm:$0xff] }
 0x2cb   :  { %6892 = vmatpush1.bf16.msra.mxu1 %v8747_v13  ;;  %6729 = vmatprep.subr.bf16.mxu0 %v8754_v57  ;;  %v8801_v13 = vcombine.low %v3879_v61, %v3883_v63  ;;  %v8803_v57 = vcombine.low %v3880_v1, %v3884_v2  ;;  %v8812_v14 = vcombine.high %v3888_v10, %v3892_v11  ;;  %v3912_v61 = vld [vmem:[#allocation6 + $0xc48] sm:$0xff] }
 0x2cc   :  { %6893 = vmatprep.subr.bf16.mxu1 %v8756_v4  ;;  %v8810_v4 = vcombine.high %v3887_v7, %v3891_v8  ;;  %v3916_v63 = vld [vmem:[#allocation6 + $0xc68] sm:$0xff]  ;;  %v8825_v2 = vcombine.low %v3903_v27, %v3907_v25 }
 0x2ce   :  { %6730 = vmatpush1.bf16.msra.mxu0 %v8753_v19  ;;  %v3900_v19 = vld [vmem:[#allocation6 + $0xbe8] sm:$0xff] }
 0x2cf   :  { %6894 = vmatpush1.bf16.msra.mxu1 %v8755_v21  ;;  %6731 = vmatprep.subr.bf16.mxu0 %v8762_v22  ;;  %v8809_v21 = vcombine.low %v3887_v7, %v3891_v8  ;;  %v8811_v22 = vcombine.low %v3888_v10, %v3892_v11  ;;  %v8820_v26 = vcombine.high %v3896_v17, %v3900_v19  ;;  %v3923_v8 = vld [vmem:[#allocation6 + $0xca0] sm:$0xff]  ;;  %v3920_v10 = vld [vmem:[#allocation6 + $0xc88] sm:$0xff] }
 0x2d0   :  { %6895 = vmatprep.subr.bf16.mxu1 %v8764_v24  ;;  %v8818_v24 = vcombine.high %v3895_v16, %v3899_v12  ;;  %v8836_v7 = vcombine.high %v3912_v61, %v3916_v63  ;;  %v3924_v11 = vld [vmem:[#allocation6 + $0xca8] sm:$0xff] }
 0x2d2   :  { %6732 = vmatpush1.bf16.msra.mxu0 %v8761_v28  ;;  %v3908_v28 = vld [vmem:[#allocation6 + $0xc28] sm:$0xff] }
 0x2d3   :  { %6896 = vmatpush1.bf16.msra.mxu1 %v8763_v29  ;;  %6733 = vmatprep.subr.bf16.mxu0 %v8770_v30  ;;  %v8817_v29 = vcombine.low %v3895_v16, %v3899_v12  ;;  %v8819_v30 = vcombine.low %v3896_v17, %v3900_v19  ;;  %v8828_v36 = vcombine.high %v3904_v23, %v3908_v28  ;;  %v3927_v12 = vld [vmem:[#allocation6 + $0xcc0] sm:$0xff]  ;;  %v3928_v19 = vld [vmem:[#allocation6 + $0xcc8] sm:$0xff] }
 0x2d4   :  { %6897 = vmatprep.subr.bf16.mxu1 %v8772_v31  ;;  %v8826_v31 = vcombine.high %v3903_v27, %v3907_v25  ;;  %v8844_v16 = vcombine.high %v3920_v10, %v3924_v11  ;;  %v3931_v17 = vld [vmem:[#allocation6 + $0xce0] sm:$0xff] }
 0x2d5   :  { %v3935_v25 = vld [vmem:[#allocation6 + $0xd00] sm:$0xff] }
 0x2d6   :  { %6734 = vmatpush1.bf16.msra.mxu0 %v8769_v33  ;;  %v9672_v33 = vld [vmem:[#allocation4] sm:$0xff] }
 0x2d7   :  { %6898 = vmatpush1.bf16.msra.mxu1 %v8771_v38  ;;  %6735 = vmatprep.subr.bf16.mxu0 %v8778_v39  ;;  %v586_v38 = vrot.slane %v9672_v33, %v585_v32  ;;  %v590_v39 = vrot.slane %v9672_v33, %v589_v34 }
 0x2d8   :  { %6899 = vmatprep.subr.bf16.mxu1 %v8780_v40  ;;  %v598_v40 = vrot.slane %v9672_v33, %v597_v35 }
 0x2da   :  { %6736 = vmatpush1.bf16.msra.mxu0 %v8777_v47 }
 0x2db   :  { %6900 = vmatpush1.bf16.msra.mxu1 %v8779_v48  ;;  %6737 = vmatprep.subr.bf16.mxu0 %v8786_v0 }
 0x2dc   :  { %6901 = vmatprep.subr.bf16.mxu1 %v8788_v49 }
 0x2de   :  { %6738 = vmatpush1.bf16.msra.mxu0 %v8785_v54 }
 0x2df   :  { %6902 = vmatpush1.bf16.msra.mxu1 %v8787_v9  ;;  %6739 = vmatprep.subr.bf16.mxu0 %v8794_v58  ;;  %v3911_v9 = vld [vmem:[#allocation6 + $0xc40] sm:$0xff] }
 0x2e0   :  { %6903 = vmatprep.subr.bf16.mxu1 %v8796_v59  ;;  %v3915_v59 = vld [vmem:[#allocation6 + $0xc60] sm:$0xff] }
 0x2e2   :  { %6740 = vmatpush1.bf16.msra.mxu0 %v8793_v60  ;;  %v8827_v60 = vcombine.low %v3904_v23, %v3908_v28  ;;  %v3939_v23 = vld [vmem:[#allocation6 + $0xd20] sm:$0xff]  ;;  %v3936_v28 = vld [vmem:[#allocation6 + $0xd08] sm:$0xff] }
 0x2e3   :  { %6904 = vmatpush1.bf16.msra.mxu1 %v8795_v3  ;;  %6741 = vmatprep.subr.bf16.mxu0 %v8802_v5  ;;  %v3919_v5 = vld [vmem:[#allocation6 + $0xc80] sm:$0xff] }
 0x2e4   :  { %6905 = vmatprep.subr.bf16.mxu1 %v8804_v6  ;;  %v8834_v6 = vcombine.high %v3911_v9, %v3915_v59 }
 0x2e6   :  { %6742 = vmatpush1.bf16.msra.mxu0 %v8801_v13 }
 0x2e7   :  { %6906 = vmatpush1.bf16.msra.mxu1 %v8803_v57  ;;  %6743 = vmatprep.subr.bf16.mxu0 %v8810_v4  ;;  %v8833_v57 = vcombine.low %v3911_v9, %v3915_v59  ;;  %v8835_v4 = vcombine.low %v3912_v61, %v3916_v63  ;;  %v3959_v59 = vld [vmem:[#allocation6 + $0xdc0] sm:$0xff]  ;;  %v3960_v63 = vld [vmem:[#allocation6 + $0xdc8] sm:$0xff] }
 0x2e8   :  { %6907 = vmatprep.subr.bf16.mxu1 %v8812_v14  ;;  %v8842_v14 = vcombine.high %v3919_v5, %v3923_v8  ;;  %v3963_v61 = vld [vmem:[#allocation6 + $0xde0] sm:$0xff] }
 0x2ea   :  { %6744 = vmatpush1.bf16.msra.mxu0 %v8809_v21  ;;  %v3932_v21 = vld [vmem:[#allocation6 + $0xce8] sm:$0xff] }
 0x2eb   :  { %6908 = vmatpush1.bf16.msra.mxu1 %v8811_v22  ;;  %6745 = vmatprep.subr.bf16.mxu0 %v8818_v24  ;;  %v8841_v22 = vcombine.low %v3919_v5, %v3923_v8  ;;  %v8843_v24 = vcombine.low %v3920_v10, %v3924_v11  ;;  %v8852_v27 = vcombine.high %v3928_v19, %v3932_v21  ;;  %v3967_v8 = vld [vmem:[#allocation6 + $0xe00] sm:$0xff]  ;;  %v3968_v11 = vld [vmem:[#allocation6 + $0xe08] sm:$0xff] }
 0x2ec   :  { %6909 = vmatprep.subr.bf16.mxu1 %v8820_v26  ;;  %v8850_v26 = vcombine.high %v3927_v12, %v3931_v17  ;;  %v3971_v10 = vld [vmem:[#allocation6 + $0xe20] sm:$0xff] }
 0x2ee   :  { %6746 = vmatpush1.bf16.msra.mxu0 %v8817_v29  ;;  %v3940_v29 = vld [vmem:[#allocation6 + $0xd28] sm:$0xff] }
 0x2ef   :  { %6910 = vmatpush1.bf16.msra.mxu1 %v8819_v30  ;;  %6756 = vmatprep.subr.bf16.mxu0 %v8826_v31  ;;  %v8849_v30 = vcombine.low %v3927_v12, %v3931_v17  ;;  %v8851_v31 = vcombine.low %v3928_v19, %v3932_v21  ;;  %v3975_v17 = vld [vmem:[#allocation6 + $0xe40] sm:$0xff]  ;;  %v3976_v21 = vld [vmem:[#allocation6 + $0xe48] sm:$0xff] }
 0x2f0   :  { %6920 = vmatprep.subr.bf16.mxu1 %v8828_v36  ;;  %v8858_v36 = vcombine.high %v3935_v25, %v3939_v23  ;;  %v3979_v19 = vld [vmem:[#allocation6 + $0xe60] sm:$0xff] }
 0x304   :  { %v3332_v42 = vpop.f32.mrb[4].mxu0  ;;  %v9683_v43 = vpop.f32.mrb[4].mxu1 }
 0x305   :  { %v9110_v53 = vadd.f32 %v3332_v42, %v586_v38  ;;  %v3334_v44 = vpop.f32.mrb[5].mxu0  ;;  %v3498_v48 = vpop.f32.mrb[5].mxu1  ;;  %v8860_v38 = vcombine.high %v3936_v28, %v3940_v29  ;;  %v3944_v42 = vld [vmem:[#allocation6 + $0xd48] sm:$0xff] }
 0x306   :  { %v9111_v47 = vadd.f32 %v3334_v44, %v590_v39  ;;  %v3336_v0 = vpop.f32.mrb[6].mxu0  ;;  %v9113_v45 = vadd.f32 %v3498_v48, %v598_v40  ;;  %v3500_v50 = vpop.f32.mrb[6].mxu1  ;;  %v3943_v39 = vld [vmem:[#allocation6 + $0xd40] sm:$0xff]  ;;  %v8857_v44 = vcombine.low %v3935_v25, %v3939_v23 }
 0x307   :  { %v3507_v49 = vmax.f32 %v9110_v53, 0.0  ;;  %v3337_v51 = vpop.f32.mrb[7].mxu0  ;;  %v3501_v54 = vpop.f32.mrb[7].mxu1  ;;  %v3947_v40 = vld [vmem:[#allocation6 + $0xd60] sm:$0xff]  ;;  %v3948_v53 = vld [vmem:[#allocation6 + $0xd68] sm:$0xff] }
 0x308   :  { %v3508_v52 = vmax.f32 %v9111_v47, 0.0  ;;  %v3510_v58 = vmax.f32 %v9113_v45, 0.0  ;;  %v8859_v47 = vcombine.low %v3936_v28, %v3940_v29  ;;  %v8866_v48 = vcombine.high %v3943_v39, %v3947_v40  ;;  %v3955_v45 = vld [vmem:[#allocation6 + $0xda0] sm:$0xff]  ;;  %v3952_v50 = vld [vmem:[#allocation6 + $0xd88] sm:$0xff] }
 0x309   :  { %v9687_v3 = vpack.c.bf16 %v3507_v49, %v3507_v49  ;;  %v8868_v0 = vcombine.high %v3944_v42, %v3948_v53  ;;  %v3951_v49 = vld [vmem:[#allocation6 + $0xd80] sm:$0xff]  ;;  %v3956_v51 = vld [vmem:[#allocation6 + $0xda8] sm:$0xff]  ;;  %v8867_v54 = vcombine.low %v3944_v42, %v3948_v53 }
 0x30a   :  { %v9685_v1 = vpack.c.bf16 %v3508_v52, %v3508_v52  ;;  %v9691_v13 = vpack.c.bf16 %v3510_v58, %v3510_v58  ;;  %v8865_v52 = vcombine.low %v3943_v39, %v3947_v40  ;;  %v8874_v9 = vcombine.high %v3951_v49, %v3955_v45  ;;  %v3983_v23 = vld [vmem:[#allocation6 + $0xe80] sm:$0xff]  ;;  %v3984_v29 = vld [vmem:[#allocation6 + $0xe88] sm:$0xff] }
 0x30b   :  { %v8876_v58 = vcombine.high %v3952_v50, %v3956_v51  ;;  %v8875_v5 = vcombine.low %v3952_v50, %v3956_v51  ;;  %v3987_v28 = vld [vmem:[#allocation6 + $0xea0] sm:$0xff]  ;;  %v3992_v53 = vld [vmem:[#allocation6 + $0xec8] sm:$0xff] }
 0x30c   :  { %6747 = vmatprep.mubr.bf16.mxu0 %v9685_v1  ;;  %6911 = vmatprep.mubr.bf16.mxu1 %v9685_v1  ;;  %v3991_v40 = vld [vmem:[#allocation6 + $0xec0] sm:$0xff]  ;;  %v4000_v51 = vld [vmem:[#allocation6 + $0xf08] sm:$0xff] }
 0x30d   :  { %6748 = vmatmul.mubr.bf16.vlgmr.msra.gmra.mrb[8].mxu0 %v9687_v3  ;;  %6912 = vmatmul.mubr.bf16.vlgmr.msra.gmra.mrb[8].mxu1 %v9687_v3  ;;  %v3995_v42 = vld [vmem:[#allocation6 + $0xee0] sm:$0xff] }
 0x30e   :  { %6757 = vmatpush1.bf16.msra.mxu0 %v8825_v2  ;;  %6921 = vmatpush1.bf16.msra.mxu1 %v8827_v60  ;;  %v3964_v2 = vld [vmem:[#allocation6 + $0xde8] sm:$0xff]  ;;  %v8873_v60 = vcombine.low %v3951_v49, %v3955_v45  ;;  %v3999_v45 = vld [vmem:[#allocation6 + $0xf00] sm:$0xff] }
 0x30f   :  { %6788 = vmatprep.mubr.bf16.mxu0 %v9691_v13  ;;  %6952 = vmatprep.mubr.bf16.mxu1 %v9691_v13  ;;  %v4003_v50 = vld [vmem:[#allocation6 + $0xf20] sm:$0xff] }
 0x310   :  { %6758 = vmatprep.subr.bf16.mxu0 %v8834_v6  ;;  %6922 = vmatprep.subr.bf16.mxu1 %v8836_v7  ;;  %v8882_v6 = vcombine.high %v3959_v59, %v3963_v61  ;;  %v8884_v7 = vcombine.high %v3960_v63, %v3964_v2 }
 0x312   :  { %6759 = vmatpush1.bf16.msra.mxu0 %v8833_v57  ;;  %6923 = vmatpush1.bf16.msra.mxu1 %v8835_v4  ;;  %v3972_v57 = vld [vmem:[#allocation6 + $0xe28] sm:$0xff]  ;;  %v8881_v4 = vcombine.low %v3959_v59, %v3963_v61  ;;  %v4007_v61 = vld [vmem:[#allocation6 + $0xf40] sm:$0xff] }
 0x313   :  { %6760 = vmatprep.subr.bf16.mxu0 %v8842_v14  ;;  %6924 = vmatprep.subr.bf16.mxu1 %v8844_v16  ;;  %v8883_v14 = vcombine.low %v3960_v63, %v3964_v2  ;;  %v8890_v16 = vcombine.high %v3967_v8, %v3971_v10  ;;  %v8892_v12 = vcombine.high %v3968_v11, %v3972_v57  ;;  %v4011_v63 = vld [vmem:[#allocation6 + $0xf60] sm:$0xff]  ;;  %v4008_v2 = vld [vmem:[#allocation6 + $0xf48] sm:$0xff] }
 0x316   :  { %6761 = vmatpush1.bf16.msra.mxu0 %v8841_v22  ;;  %6925 = vmatpush1.bf16.msra.mxu1 %v8843_v24  ;;  %v3980_v22 = vld [vmem:[#allocation6 + $0xe68] sm:$0xff]  ;;  %v8889_v24 = vcombine.low %v3967_v8, %v3971_v10  ;;  %v8930_v8 = vcombine.high %v4007_v61, %v4011_v63 }
 0x317   :  { %6762 = vmatprep.subr.bf16.mxu0 %v8850_v26  ;;  %6926 = vmatprep.subr.bf16.mxu1 %v8852_v27  ;;  %v8891_v26 = vcombine.low %v3968_v11, %v3972_v57  ;;  %v8898_v27 = vcombine.high %v3975_v17, %v3979_v19  ;;  %v8900_v25 = vcombine.high %v3976_v21, %v3980_v22  ;;  %v4015_v11 = vld [vmem:[#allocation6 + $0xf80] sm:$0xff] }
 0x318   :  { %v4019_v57 = vld [vmem:[#allocation6 + $0xfa0] sm:$0xff] }
 0x31a   :  { %6763 = vmatpush1.bf16.msra.mxu0 %v8849_v30  ;;  %6927 = vmatpush1.bf16.msra.mxu1 %v8851_v31  ;;  %v3988_v30 = vld [vmem:[#allocation6 + $0xea8] sm:$0xff]  ;;  %v8897_v31 = vcombine.low %v3975_v17, %v3979_v19  ;;  %v8938_v19 = vcombine.high %v4015_v11, %v4019_v57 }
 0x31b   :  { %6764 = vmatprep.subr.bf16.mxu0 %v8858_v36  ;;  %6928 = vmatprep.subr.bf16.mxu1 %v8860_v38  ;;  %v8899_v36 = vcombine.low %v3976_v21, %v3980_v22  ;;  %v8906_v38 = vcombine.high %v3983_v23, %v3987_v28  ;;  %v8908_v39 = vcombine.high %v3984_v29, %v3988_v30  ;;  %v4023_v22 = vld [vmem:[#allocation6 + $0xfc0] sm:$0xff] }
 0x31e   :  { %6765 = vmatpush1.bf16.msra.mxu0 %v8857_v44  ;;  %6929 = vmatpush1.bf16.msra.mxu1 %v8859_v47  ;;  %v3996_v44 = vld [vmem:[#allocation6 + $0xee8] sm:$0xff]  ;;  %v8905_v47 = vcombine.low %v3983_v23, %v3987_v28 }
 0x31f   :  { %6766 = vmatprep.subr.bf16.mxu0 %v8866_v48  ;;  %6930 = vmatprep.subr.bf16.mxu1 %v8868_v0  ;;  %v8907_v48 = vcombine.low %v3984_v29, %v3988_v30  ;;  %v8914_v0 = vcombine.high %v3991_v40, %v3995_v42  ;;  %v8916_v49 = vcombine.high %v3992_v53, %v3996_v44 }
 0x322   :  { %6767 = vmatpush1.bf16.msra.mxu0 %v8865_v52  ;;  %6931 = vmatpush1.bf16.msra.mxu1 %v8867_v54  ;;  %v4004_v52 = vld [vmem:[#allocation6 + $0xf28] sm:$0xff]  ;;  %v8913_v54 = vcombine.low %v3991_v40, %v3995_v42 }
 0x323   :  { %6768 = vmatprep.subr.bf16.mxu0 %v8874_v9  ;;  %6932 = vmatprep.subr.bf16.mxu1 %v8876_v58  ;;  %v8915_v9 = vcombine.low %v3992_v53, %v3996_v44  ;;  %v8922_v58 = vcombine.high %v3999_v45, %v4003_v50  ;;  %v8924_v59 = vcombine.high %v4000_v51, %v4004_v52 }
 0x326   :  { %6769 = vmatpush1.bf16.msra.mxu0 %v8873_v60  ;;  %6933 = vmatpush1.bf16.msra.mxu1 %v8875_v5  ;;  %v4012_v60 = vld [vmem:[#allocation6 + $0xf68] sm:$0xff]  ;;  %v8921_v5 = vcombine.low %v3999_v45, %v4003_v50 }
 0x327   :  { %6770 = vmatprep.subr.bf16.mxu0 %v8882_v6  ;;  %6934 = vmatprep.subr.bf16.mxu1 %v8884_v7  ;;  %v8923_v6 = vcombine.low %v4000_v51, %v4004_v52  ;;  %v593_v7 = vsub.s32 6, %v9622_v46  ;;  %v8932_v10 = vcombine.high %v4008_v2, %v4012_v60 }
 0x329   :  { %v594_v17 = vrot.slane %v9672_v33, %v593_v7  ;;  %v3525_v33 = vld [vmem:[#allocation6 + $0x30] sm:$0xff] }
 0x32a   :  { %6771 = vmatpush1.bf16.msra.mxu0 %v8881_v4  ;;  %6935 = vmatpush1.bf16.msra.mxu1 %v8883_v14  ;;  %v4016_v4 = vld [vmem:[#allocation6 + $0xf88] sm:$0xff] }
 0x32b   :  { %6772 = vmatprep.subr.bf16.mxu0 %v8890_v16  ;;  %6936 = vmatprep.subr.bf16.mxu1 %v8892_v12  ;;  %v4020_v14 = vld [vmem:[#allocation6 + $0xfa8] sm:$0xff]  ;;  %v8929_v16 = vcombine.low %v4007_v61, %v4011_v63  ;;  %v8931_v12 = vcombine.low %v4008_v2, %v4012_v60  ;;  %v9112_v28 = vadd.f32 %v9683_v43, %v594_v17  ;;  %v3530_v43 = vld [vmem:[#allocation6 + $0x58] sm:$0xff] }
 0x32c   :  { %v8940_v21 = vcombine.high %v4016_v4, %v4020_v14  ;;  %v8939_v23 = vcombine.low %v4016_v4, %v4020_v14  ;;  %v3558_v17 = vld [vmem:[#allocation6 + $0x138] sm:$0xff] }
 0x32d   :  { %v3509_v42 = vmax.f32 %v9112_v28, 0.0 }
 0x32e   :  { %6773 = vmatpush1.bf16.msra.mxu0 %v8889_v24  ;;  %6937 = vmatpush1.bf16.msra.mxu1 %v8891_v26  ;;  %v4027_v24 = vld [vmem:[#allocation6 + $0xfe0] sm:$0xff]  ;;  %v4024_v26 = vld [vmem:[#allocation6 + $0xfc8] sm:$0xff] }
 0x32f   :  { %6774 = vmatprep.subr.bf16.mxu0 %v8898_v27  ;;  %6938 = vmatprep.subr.bf16.mxu1 %v8900_v25  ;;  %v4028_v27 = vld [vmem:[#allocation6 + $0xfe8] sm:$0xff]  ;;  %v8937_v25 = vcombine.low %v4015_v11, %v4019_v57  ;;  %v8946_v29 = vcombine.high %v4023_v22, %v4027_v24  ;;  %v9702_v45 = vpack.c.bf16 %v3509_v42, %v3509_v42 }
 0x330   :  { %v8948_v30 = vcombine.high %v4024_v26, %v4028_v27  ;;  %v8947_v40 = vcombine.low %v4024_v26, %v4028_v27  ;;  %v3561_v26 = vld [vmem:[#allocation6 + $0x150] sm:$0xff] }
 0x331   :  { %v3565_v27 = vld [vmem:[#allocation6 + $0x170] sm:$0xff] }
 0x332   :  { %6775 = vmatpush1.bf16.msra.mxu0 %v8897_v31  ;;  %6939 = vmatpush1.bf16.msra.mxu1 %v8899_v36  ;;  %v3521_v31 = vld [vmem:[#allocation6 + $0x10] sm:$0xff]  ;;  %v3522_v36 = vld [vmem:[#allocation6 + $0x18] sm:$0xff] }
 0x333   :  { %6776 = vmatprep.subr.bf16.mxu0 %v8906_v38  ;;  %6940 = vmatprep.subr.bf16.mxu1 %v8908_v39  ;;  %v3526_v38 = vld [vmem:[#allocation6 + $0x38] sm:$0xff]  ;;  %v8945_v39 = vcombine.low %v4023_v22, %v4027_v24  ;;  %v8446_v53 = vcombine.high %v3521_v31, %v3525_v33 }
 0x334   :  { %v8448_v44 = vcombine.high %v3522_v36, %v3526_v38  ;;  %v8447_v50 = vcombine.low %v3522_v36, %v3526_v38  ;;  %v3573_v36 = vld [vmem:[#allocation6 + $0x1b0] sm:$0xff]  ;;  %v3570_v38 = vld [vmem:[#allocation6 + $0x198] sm:$0xff] }
 0x336   :  { %6777 = vmatpush1.bf16.msra.mxu0 %v8905_v47  ;;  %6941 = vmatpush1.bf16.msra.mxu1 %v8907_v48  ;;  %v3529_v47 = vld [vmem:[#allocation6 + $0x50] sm:$0xff] }
 0x337   :  { %6778 = vmatprep.subr.bf16.mxu0 %v8914_v0  ;;  %6942 = vmatprep.subr.bf16.mxu1 %v8916_v49  ;;  %v3533_v48 = vld [vmem:[#allocation6 + $0x70] sm:$0xff]  ;;  %v3534_v0 = vld [vmem:[#allocation6 + $0x78] sm:$0xff]  ;;  %v8445_v49 = vcombine.low %v3521_v31, %v3525_v33 }
 0x338   :  { %v8454_v51 = vcombine.high %v3529_v47, %v3533_v48  ;;  %v8456_v52 = vcombine.high %v3530_v43, %v3534_v0  ;;  %v8453_v61 = vcombine.low %v3529_v47, %v3533_v48  ;;  %v8455_v63 = vcombine.low %v3530_v43, %v3534_v0  ;;  %v3569_v33 = vld [vmem:[#allocation6 + $0x190] sm:$0xff]  ;;  %v3578_v43 = vld [vmem:[#allocation6 + $0x1d8] sm:$0xff] }
 0x339   :  { %v3577_v47 = vld [vmem:[#allocation6 + $0x1d0] sm:$0xff]  ;;  %v3582_v0 = vld [vmem:[#allocation6 + $0x1f8] sm:$0xff] }
 0x33a   :  { %6779 = vmatpush1.bf16.msra.mxu0 %v8913_v54  ;;  %6943 = vmatpush1.bf16.msra.mxu1 %v8915_v9  ;;  %v3537_v54 = vld [vmem:[#allocation6 + $0x90] sm:$0xff] }
 0x33b   :  { %6780 = vmatprep.subr.bf16.mxu0 %v8922_v58  ;;  %6944 = vmatprep.subr.bf16.mxu1 %v8924_v59  ;;  %v3541_v9 = vld [vmem:[#allocation6 + $0xb0] sm:$0xff]  ;;  %v3538_v58 = vld [vmem:[#allocation6 + $0x98] sm:$0xff] }
 0x33c   :  { %v3542_v59 = vld [vmem:[#allocation6 + $0xb8] sm:$0xff]  ;;  %v8462_v2 = vcombine.high %v3537_v54, %v3541_v9  ;;  %v8461_v11 = vcombine.low %v3537_v54, %v3541_v9  ;;  %v3581_v48 = vld [vmem:[#allocation6 + $0x1f0] sm:$0xff] }
 0x33d   :  { %v8464_v60 = vcombine.high %v3538_v58, %v3542_v59  ;;  %v8463_v57 = vcombine.low %v3538_v58, %v3542_v59  ;;  %v3585_v54 = vld [vmem:[#allocation6 + $0x210] sm:$0xff]  ;;  %v3586_v58 = vld [vmem:[#allocation6 + $0x218] sm:$0xff] }
 0x33e   :  { %6781 = vmatpush1.bf16.msra.mxu0 %v8921_v5  ;;  %6945 = vmatpush1.bf16.msra.mxu1 %v8923_v6  ;;  %v3545_v5 = vld [vmem:[#allocation6 + $0xd0] sm:$0xff]  ;;  %v3590_v59 = vld [vmem:[#allocation6 + $0x238] sm:$0xff] }
 0x33f   :  { %6782 = vmatprep.subr.bf16.mxu0 %v8930_v8  ;;  %6946 = vmatprep.subr.bf16.mxu1 %v8932_v10  ;;  %v3549_v6 = vld [vmem:[#allocation6 + $0xf0] sm:$0xff]  ;;  %v3546_v8 = vld [vmem:[#allocation6 + $0xd8] sm:$0xff] }
 0x340   :  { %v3550_v10 = vld [vmem:[#allocation6 + $0xf8] sm:$0xff]  ;;  %v8470_v4 = vcombine.high %v3545_v5, %v3549_v6  ;;  %v3589_v9 = vld [vmem:[#allocation6 + $0x230] sm:$0xff] }
 0x341   :  { %v8472_v14 = vcombine.high %v3546_v8, %v3550_v10 }
 0x342   :  { %6783 = vmatpush1.bf16.msra.mxu0 %v8929_v16  ;;  %6947 = vmatpush1.bf16.msra.mxu1 %v8931_v12  ;;  %v3553_v16 = vld [vmem:[#allocation6 + $0x110] sm:$0xff] }
 0x343   :  { %6784 = vmatprep.subr.bf16.mxu0 %v8938_v19  ;;  %6948 = vmatprep.subr.bf16.mxu1 %v8940_v21  ;;  %v3557_v12 = vld [vmem:[#allocation6 + $0x130] sm:$0xff]  ;;  %v8469_v19 = vcombine.low %v3545_v5, %v3549_v6  ;;  %v8471_v21 = vcombine.low %v3546_v8, %v3550_v10  ;;  %v3594_v8 = vld [vmem:[#allocation6 + $0x258] sm:$0xff] }
 0x344   :  { %v8478_v22 = vcombine.high %v3553_v16, %v3557_v12  ;;  %v8477_v28 = vcombine.low %v3553_v16, %v3557_v12  ;;  %v3593_v5 = vld [vmem:[#allocation6 + $0x250] sm:$0xff]  ;;  %v3598_v10 = vld [vmem:[#allocation6 + $0x278] sm:$0xff] }
 0x345   :  { %v3597_v6 = vld [vmem:[#allocation6 + $0x270] sm:$0xff] }
 0x346   :  { %6785 = vmatpush1.bf16.msra.mxu0 %v8937_v25  ;;  %6949 = vmatpush1.bf16.msra.mxu1 %v8939_v23  ;;  %v3562_v25 = vld [vmem:[#allocation6 + $0x158] sm:$0xff]  ;;  %v3601_v16 = vld [vmem:[#allocation6 + $0x290] sm:$0xff] }
 0x347   :  { %6786 = vmatprep.subr.bf16.mxu0 %v8946_v29  ;;  %6950 = vmatprep.subr.bf16.mxu1 %v8948_v30  ;;  %v3566_v23 = vld [vmem:[#allocation6 + $0x178] sm:$0xff]  ;;  %v8486_v30 = vcombine.high %v3561_v26, %v3565_v27  ;;  %v3605_v12 = vld [vmem:[#allocation6 + $0x2b0] sm:$0xff] }
 0x348   :  { %v8488_v31 = vcombine.high %v3562_v25, %v3566_v23  ;;  %v8487_v42 = vcombine.low %v3562_v25, %v3566_v23  ;;  %v3610_v25 = vld [vmem:[#allocation6 + $0x2d8] sm:$0xff] }
 0x349   :  { %v3614_v23 = vld [vmem:[#allocation6 + $0x2f8] sm:$0xff] }
 0x34a   :  { %6787 = vmatpush1.bf16.msra.mxu0 %v8945_v39  ;;  %6951 = vmatpush1.bf16.msra.mxu1 %v8947_v40  ;;  %v3574_v39 = vld [vmem:[#allocation6 + $0x1b8] sm:$0xff]  ;;  %v8485_v40 = vcombine.low %v3561_v26, %v3565_v27  ;;  %v3609_v26 = vld [vmem:[#allocation6 + $0x2d0] sm:$0xff] }
 0x34b   :  { %6961 = vmatprep.subr.bf16.mxu0 %v8446_v53  ;;  %7125 = vmatprep.subr.bf16.mxu1 %v8448_v44  ;;  %v8494_v53 = vcombine.high %v3569_v33, %v3573_v36  ;;  %v8496_v44 = vcombine.high %v3570_v38, %v3574_v39  ;;  %v3613_v27 = vld [vmem:[#allocation6 + $0x2f0] sm:$0xff] }
 0x34d   :  { %6789 = vmatmul.mubr.bf16.vlgmr.msra.gmra.mrb[8].mxu0 %v9702_v45  ;;  %6953 = vmatmul.mubr.bf16.vlgmr.msra.gmra.mrb[8].mxu1 %v9702_v45 }
 0x34e   :  { %6962 = vmatpush1.bf16.msra.mxu0 %v8445_v49  ;;  %6993 = vmatprep.mubr.bf16.mxu0 %v9636_v37  ;;  %v8493_v49 = vcombine.low %v3569_v33, %v3573_v36  ;;  %v3617_v33 = vld [vmem:[#allocation6 + $0x310] sm:$0xff] }
 0x34f   :  { %7126 = vmatpush1.bf16.msra.mxu1 %v8447_v50  ;;  %7157 = vmatprep.mubr.bf16.mxu1 %v9636_v37  ;;  %v3554_v37 = vld [vmem:[#allocation6 + $0x118] sm:$0xff]  ;;  %v8495_v50 = vcombine.low %v3570_v38, %v3574_v39  ;;  %v3621_v36 = vld [vmem:[#allocation6 + $0x330] sm:$0xff] }
 0x350   :  { %6963 = vmatprep.subr.bf16.mxu0 %v8454_v51  ;;  %7127 = vmatprep.subr.bf16.mxu1 %v8456_v52  ;;  %v8480_v24 = vcombine.high %v3554_v37, %v3558_v17  ;;  %v8479_v29 = vcombine.low %v3554_v37, %v3558_v17  ;;  %v8502_v51 = vcombine.high %v3577_v47, %v3581_v48  ;;  %v3602_v37 = vld [vmem:[#allocation6 + $0x298] sm:$0xff] }
 0x351   :  { %v8504_v52 = vcombine.high %v3578_v43, %v3582_v0  ;;  %v3606_v17 = vld [vmem:[#allocation6 + $0x2b8] sm:$0xff] }
 0x352   :  { %6964 = vmatpush1.bf16.msra.mxu0 %v8453_v61  ;;  %v8501_v61 = vcombine.low %v3577_v47, %v3581_v48  ;;  %v3618_v38 = vld [vmem:[#allocation6 + $0x318] sm:$0xff]  ;;  %v3625_v47 = vld [vmem:[#allocation6 + $0x350] sm:$0xff] }
 0x353   :  { %7128 = vmatpush1.bf16.msra.mxu1 %v8455_v63  ;;  %6965 = vmatprep.subr.bf16.mxu0 %v8462_v2  ;;  %v8503_v63 = vcombine.low %v3578_v43, %v3582_v0  ;;  %v8510_v2 = vcombine.high %v3585_v54, %v3589_v9  ;;  %v3622_v39 = vld [vmem:[#allocation6 + $0x338] sm:$0xff]  ;;  %v3629_v48 = vld [vmem:[#allocation6 + $0x370] sm:$0xff] }
 0x354   :  { %7129 = vmatprep.subr.bf16.mxu1 %v8464_v60  ;;  %v8512_v60 = vcombine.high %v3586_v58, %v3590_v59  ;;  %v3626_v43 = vld [vmem:[#allocation6 + $0x358] sm:$0xff] }
 0x355   :  { %v3630_v0 = vld [vmem:[#allocation6 + $0x378] sm:$0xff] }
 0x356   :  { %6966 = vmatpush1.bf16.msra.mxu0 %v8461_v11  ;;  %v8509_v11 = vcombine.low %v3585_v54, %v3589_v9  ;;  %v3633_v54 = vld [vmem:[#allocation6 + $0x390] sm:$0xff] }
 0x357   :  { %7130 = vmatpush1.bf16.msra.mxu1 %v8463_v57  ;;  %6967 = vmatprep.subr.bf16.mxu0 %v8470_v4  ;;  %v8511_v57 = vcombine.low %v3586_v58, %v3590_v59  ;;  %v8518_v4 = vcombine.high %v3593_v5, %v3597_v6  ;;  %v3637_v9 = vld [vmem:[#allocation6 + $0x3b0] sm:$0xff]  ;;  %v3634_v58 = vld [vmem:[#allocation6 + $0x398] sm:$0xff] }
 0x358   :  { %7131 = vmatprep.subr.bf16.mxu1 %v8472_v14  ;;  %v8520_v14 = vcombine.high %v3594_v8, %v3598_v10  ;;  %v3638_v59 = vld [vmem:[#allocation6 + $0x3b8] sm:$0xff] }
 0x35a   :  { %6968 = vmatpush1.bf16.msra.mxu0 %v8469_v19  ;;  %v8517_v19 = vcombine.low %v3593_v5, %v3597_v6  ;;  %v3641_v5 = vld [vmem:[#allocation6 + $0x3d0] sm:$0xff] }
 0x35b   :  { %7132 = vmatpush1.bf16.msra.mxu1 %v8471_v21  ;;  %6969 = vmatprep.subr.bf16.mxu0 %v8478_v22  ;;  %v8519_v21 = vcombine.low %v3594_v8, %v3598_v10  ;;  %v8526_v22 = vcombine.high %v3601_v16, %v3605_v12  ;;  %v3645_v6 = vld [vmem:[#allocation6 + $0x3f0] sm:$0xff]  ;;  %v3642_v8 = vld [vmem:[#allocation6 + $0x3d8] sm:$0xff] }
 0x35c   :  { %7133 = vmatprep.subr.bf16.mxu1 %v8480_v24  ;;  %v8528_v24 = vcombine.high %v3602_v37, %v3606_v17  ;;  %v3646_v10 = vld [vmem:[#allocation6 + $0x3f8] sm:$0xff] }
 0x35e   :  { %6970 = vmatpush1.bf16.msra.mxu0 %v8477_v28  ;;  %v8525_v28 = vcombine.low %v3601_v16, %v3605_v12  ;;  %v3649_v16 = vld [vmem:[#allocation6 + $0x410] sm:$0xff] }
 0x35f   :  { %7134 = vmatpush1.bf16.msra.mxu1 %v8479_v29  ;;  %6971 = vmatprep.subr.bf16.mxu0 %v8486_v30  ;;  %v8527_v29 = vcombine.low %v3602_v37, %v3606_v17  ;;  %v8534_v30 = vcombine.high %v3609_v26, %v3613_v27  ;;  %v3653_v12 = vld [vmem:[#allocation6 + $0x430] sm:$0xff]  ;;  %v3650_v37 = vld [vmem:[#allocation6 + $0x418] sm:$0xff] }
 0x360   :  { %7135 = vmatprep.subr.bf16.mxu1 %v8488_v31  ;;  %v8536_v31 = vcombine.high %v3610_v25, %v3614_v23  ;;  %v3654_v17 = vld [vmem:[#allocation6 + $0x438] sm:$0xff] }
 0x362   :  { %6972 = vmatpush1.bf16.msra.mxu0 %v8485_v40  ;;  %v8533_v40 = vcombine.low %v3609_v26, %v3613_v27  ;;  %v3657_v26 = vld [vmem:[#allocation6 + $0x450] sm:$0xff] }
 0x363   :  { %7136 = vmatpush1.bf16.msra.mxu1 %v8487_v42  ;;  %6973 = vmatprep.subr.bf16.mxu0 %v8494_v53  ;;  %v8535_v42 = vcombine.low %v3610_v25, %v3614_v23  ;;  %v8542_v53 = vcombine.high %v3617_v33, %v3621_v36  ;;  %v3661_v27 = vld [vmem:[#allocation6 + $0x470] sm:$0xff]  ;;  %v8573_v25 = vcombine.low %v3649_v16, %v3653_v12  ;;  %v3658_v23 = vld [vmem:[#allocation6 + $0x458] sm:$0xff] }
 0x364   :  { %7137 = vmatprep.subr.bf16.mxu1 %v8496_v44  ;;  %v8544_v44 = vcombine.high %v3618_v38, %v3622_v39 }
 0x366   :  { %6974 = vmatpush1.bf16.msra.mxu0 %v8493_v49  ;;  %v8541_v49 = vcombine.low %v3617_v33, %v3621_v36  ;;  %v3669_v33 = vld [vmem:[#allocation6 + $0x4b0] sm:$0xff] }
 0x367   :  { %7138 = vmatpush1.bf16.msra.mxu1 %v8495_v50  ;;  %6975 = vmatprep.subr.bf16.mxu0 %v8502_v51  ;;  %v8543_v50 = vcombine.low %v3618_v38, %v3622_v39  ;;  %v8550_v51 = vcombine.high %v3625_v47, %v3629_v48  ;;  %v3666_v38 = vld [vmem:[#allocation6 + $0x498] sm:$0xff] }
 0x368   :  { %7139 = vmatprep.subr.bf16.mxu1 %v8504_v52  ;;  %v8552_v52 = vcombine.high %v3626_v43, %v3630_v0  ;;  %v3670_v39 = vld [vmem:[#allocation6 + $0x4b8] sm:$0xff] }
 0x36a   :  { %6976 = vmatpush1.bf16.msra.mxu0 %v8501_v61  ;;  %v8549_v61 = vcombine.low %v3625_v47, %v3629_v48  ;;  %v3673_v47 = vld [vmem:[#allocation6 + $0x4d0] sm:$0xff] }
 0x36b   :  { %7140 = vmatpush1.bf16.msra.mxu1 %v8503_v63  ;;  %6977 = vmatprep.subr.bf16.mxu0 %v8510_v2  ;;  %v8551_v63 = vcombine.low %v3626_v43, %v3630_v0  ;;  %v8558_v2 = vcombine.high %v3633_v54, %v3637_v9  ;;  %v3677_v48 = vld [vmem:[#allocation6 + $0x4f0] sm:$0xff]  ;;  %v3674_v43 = vld [vmem:[#allocation6 + $0x4d8] sm:$0xff] }
 0x36c   :  { %7141 = vmatprep.subr.bf16.mxu1 %v8512_v60  ;;  %v8560_v60 = vcombine.high %v3634_v58, %v3638_v59  ;;  %v3678_v0 = vld [vmem:[#allocation6 + $0x4f8] sm:$0xff] }
 0x36e   :  { %6978 = vmatpush1.bf16.msra.mxu0 %v8509_v11  ;;  %v8557_v11 = vcombine.low %v3633_v54, %v3637_v9  ;;  %v3685_v54 = vld [vmem:[#allocation6 + $0x530] sm:$0xff]  ;;  %v3682_v9 = vld [vmem:[#allocation6 + $0x518] sm:$0xff] }
 0x36f   :  { %7142 = vmatpush1.bf16.msra.mxu1 %v8511_v57  ;;  %6979 = vmatprep.subr.bf16.mxu0 %v8518_v4  ;;  %v8559_v57 = vcombine.low %v3634_v58, %v3638_v59  ;;  %v8566_v4 = vcombine.high %v3641_v5, %v3645_v6  ;;  %v3686_v58 = vld [vmem:[#allocation6 + $0x538] sm:$0xff]  ;;  %v8599_v59 = vcombine.low %v3674_v43, %v3678_v0 }
 0x370   :  { %7143 = vmatprep.subr.bf16.mxu1 %v8520_v14  ;;  %v8568_v14 = vcombine.high %v3642_v8, %v3646_v10 }
 0x372   :  { %6980 = vmatpush1.bf16.msra.mxu0 %v8517_v19  ;;  %v8565_v19 = vcombine.low %v3641_v5, %v3645_v6  ;;  %v3690_v5 = vld [vmem:[#allocation6 + $0x558] sm:$0xff] }
 0x373   :  { %7144 = vmatpush1.bf16.msra.mxu1 %v8519_v21  ;;  %6981 = vmatprep.subr.bf16.mxu0 %v8526_v22  ;;  %v8567_v21 = vcombine.low %v3642_v8, %v3646_v10  ;;  %v8574_v22 = vcombine.high %v3649_v16, %v3653_v12  ;;  %v3694_v6 = vld [vmem:[#allocation6 + $0x578] sm:$0xff]  ;;  %v8607_v10 = vcombine.low %v3682_v9, %v3686_v58 }
 0x374   :  { %7145 = vmatprep.subr.bf16.mxu1 %v8528_v24  ;;  %v8576_v24 = vcombine.high %v3650_v37, %v3654_v17  ;;  %v3698_v16 = vld [vmem:[#allocation6 + $0x598] sm:$0xff] }
 0x375   :  { %v3702_v12 = vld [vmem:[#allocation6 + $0x5b8] sm:$0xff] }
 0x376   :  { %6982 = vmatpush1.bf16.msra.mxu0 %v8525_v28  ;;  %v3662_v28 = vld [vmem:[#allocation6 + $0x478] sm:$0xff] }
 0x377   :  { %7146 = vmatpush1.bf16.msra.mxu1 %v8527_v29  ;;  %6983 = vmatprep.subr.bf16.mxu0 %v8534_v30  ;;  %v8575_v29 = vcombine.low %v3650_v37, %v3654_v17  ;;  %v8582_v30 = vcombine.high %v3657_v26, %v3661_v27  ;;  %v8584_v36 = vcombine.high %v3658_v23, %v3662_v28 }
 0x378   :  { %7147 = vmatprep.subr.bf16.mxu1 %v8536_v31  ;;  %v3665_v31 = vld [vmem:[#allocation6 + $0x490] sm:$0xff]  ;;  %v8615_v17 = vcombine.low %v3690_v5, %v3694_v6 }
 0x37a   :  { %6984 = vmatpush1.bf16.msra.mxu0 %v8533_v40  ;;  %v8581_v40 = vcombine.low %v3657_v26, %v3661_v27  ;;  %v3706_v26 = vld [vmem:[#allocation6 + $0x5d8] sm:$0xff] }
 0x37b   :  { %7148 = vmatpush1.bf16.msra.mxu1 %v8535_v42  ;;  %6985 = vmatprep.subr.bf16.mxu0 %v8542_v53  ;;  %v8583_v42 = vcombine.low %v3658_v23, %v3662_v28  ;;  %v8590_v53 = vcombine.high %v3665_v31, %v3669_v33  ;;  %v3710_v27 = vld [vmem:[#allocation6 + $0x5f8] sm:$0xff]  ;;  %v8623_v23 = vcombine.low %v3698_v16, %v3702_v12 }
 0x37c   :  { %7149 = vmatprep.subr.bf16.mxu1 %v8544_v44  ;;  %v8592_v44 = vcombine.high %v3666_v38, %v3670_v39 }
 0x37e   :  { %6986 = vmatpush1.bf16.msra.mxu0 %v8541_v49  ;;  %v8589_v49 = vcombine.low %v3665_v31, %v3669_v33  ;;  %v3717_v31 = vld [vmem:[#allocation6 + $0x630] sm:$0xff]  ;;  %v3714_v33 = vld [vmem:[#allocation6 + $0x618] sm:$0xff] }
 0x37f   :  { %7150 = vmatpush1.bf16.msra.mxu1 %v8543_v50  ;;  %6987 = vmatprep.subr.bf16.mxu0 %v8550_v51  ;;  %v8598_v50 = vcombine.high %v3673_v47, %v3677_v48  ;;  %v8600_v51 = vcombine.high %v3674_v43, %v3678_v0 }
 0x380   :  { %7151 = vmatprep.subr.bf16.mxu1 %v8552_v52  ;;  %v3681_v52 = vld [vmem:[#allocation6 + $0x510] sm:$0xff] }
 0x381   :  { %v8605_v8 = vcombine.low %v3681_v52, %v3685_v54 }
 0x382   :  { %6988 = vmatpush1.bf16.msra.mxu0 %v8549_v61  ;;  %v8606_v61 = vcombine.high %v3681_v52, %v3685_v54  ;;  %v3730_v52 = vld [vmem:[#allocation6 + $0x698] sm:$0xff] }
 0x383   :  { %7152 = vmatpush1.bf16.msra.mxu1 %v8551_v63  ;;  %6989 = vmatprep.subr.bf16.mxu0 %v8558_v2  ;;  %v8608_v63 = vcombine.high %v3682_v9, %v3686_v58  ;;  %v3689_v2 = vld [vmem:[#allocation6 + $0x550] sm:$0xff]  ;;  %v3734_v54 = vld [vmem:[#allocation6 + $0x6b8] sm:$0xff] }
 0x384   :  { %7153 = vmatprep.subr.bf16.mxu1 %v8560_v60  ;;  %v3693_v60 = vld [vmem:[#allocation6 + $0x570] sm:$0xff] }
 0x385   :  { %v8613_v37 = vcombine.low %v3689_v2, %v3693_v60 }
 0x386   :  { %6990 = vmatpush1.bf16.msra.mxu0 %v8557_v11  ;;  %v8614_v11 = vcombine.high %v3689_v2, %v3693_v60  ;;  %v3738_v2 = vld [vmem:[#allocation6 + $0x6d8] sm:$0xff] }
 0x387   :  { %7154 = vmatpush1.bf16.msra.mxu1 %v8559_v57  ;;  %6991 = vmatprep.subr.bf16.mxu0 %v8566_v4  ;;  %v8616_v57 = vcombine.high %v3690_v5, %v3694_v6  ;;  %v3697_v4 = vld [vmem:[#allocation6 + $0x590] sm:$0xff]  ;;  %v3742_v60 = vld [vmem:[#allocation6 + $0x6f8] sm:$0xff]  ;;  %v8655_v6 = vcombine.low %v3730_v52, %v3734_v54 }
 0x388   :  { %7155 = vmatprep.subr.bf16.mxu1 %v8568_v14  ;;  %v3701_v14 = vld [vmem:[#allocation6 + $0x5b0] sm:$0xff] }
 0x38a   :  { %6992 = vmatpush1.bf16.msra.mxu0 %v8565_v19  ;;  %v8622_v19 = vcombine.high %v3697_v4, %v3701_v14 }
 0x38b   :  { %7156 = vmatpush1.bf16.msra.mxu1 %v8567_v21  ;;  %7002 = vmatprep.subr.bf16.mxu0 %v8574_v22  ;;  %v8624_v21 = vcombine.high %v3698_v16, %v3702_v12  ;;  %v3705_v22 = vld [vmem:[#allocation6 + $0x5d0] sm:$0xff]  ;;  %v8663_v12 = vcombine.low %v3738_v2, %v3742_v60 }
 0x38c   :  { %7166 = vmatprep.subr.bf16.mxu1 %v8576_v24  ;;  %v3709_v24 = vld [vmem:[#allocation6 + $0x5f0] sm:$0xff] }
 0x38d   :  { %6994 = vmatmul.mubr.bf16.vlgmr.msra.gmra.mrb[12].mxu0 %v9652_v55  ;;  %v8630_v28 = vcombine.high %v3705_v22, %v3709_v24 }
 0x38e   :  { %7158 = vmatmul.mubr.bf16.vlgmr.msra.gmra.mrb[12].mxu1 %v9652_v55  ;;  %7003 = vmatpush1.bf16.msra.mxu0 %v8573_v25  ;;  %v8591_v55 = vcombine.low %v3666_v38, %v3670_v39  ;;  %v8621_v25 = vcombine.low %v3697_v4, %v3701_v14  ;;  %v8629_v38 = vcombine.low %v3705_v22, %v3709_v24  ;;  %v3746_v4 = vld [vmem:[#allocation6 + $0x718] sm:$0xff] }
 0x38f   :  { %7034 = vmatprep.mubr.bf16.mxu0 %v9654_v62  ;;  %7167 = vmatpush1.bf16.msra.mxu1 %v8575_v29  ;;  %v8632_v29 = vcombine.high %v3706_v26, %v3710_v27  ;;  %v8631_v39 = vcombine.low %v3706_v26, %v3710_v27  ;;  %v3750_v14 = vld [vmem:[#allocation6 + $0x738] sm:$0xff] }
 0x390   :  { %7198 = vmatprep.mubr.bf16.mxu1 %v9654_v62  ;;  %7004 = vmatprep.subr.bf16.mxu0 %v8582_v30  ;;  %v8597_v62 = vcombine.low %v3673_v47, %v3677_v48  ;;  %v3713_v30 = vld [vmem:[#allocation6 + $0x610] sm:$0xff]  ;;  %v3722_v47 = vld [vmem:[#allocation6 + $0x658] sm:$0xff]  ;;  %v8671_v27 = vcombine.low %v3746_v4, %v3750_v14 }
 0x391   :  { %7168 = vmatprep.subr.bf16.mxu1 %v8584_v36  ;;  %v3718_v36 = vld [vmem:[#allocation6 + $0x638] sm:$0xff]  ;;  %v8637_v43 = vcombine.low %v3713_v30, %v3717_v31 }
 0x392   :  { %7005 = vmatpush1.bf16.msra.mxu0 %v8581_v40  ;;  %v8638_v40 = vcombine.high %v3713_v30, %v3717_v31  ;;  %v3726_v48 = vld [vmem:[#allocation6 + $0x678] sm:$0xff]  ;;  %v8639_v0 = vcombine.low %v3714_v33, %v3718_v36 }
 0x393   :  { %7169 = vmatpush1.bf16.msra.mxu1 %v8583_v42  ;;  %7006 = vmatprep.subr.bf16.mxu0 %v8590_v53  ;;  %v8640_v42 = vcombine.high %v3714_v33, %v3718_v36  ;;  %v3721_v53 = vld [vmem:[#allocation6 + $0x650] sm:$0xff]  ;;  %v8647_v58 = vcombine.low %v3722_v47, %v3726_v48  ;;  %v3754_v22 = vld [vmem:[#allocation6 + $0x758] sm:$0xff] }
 0x394   :  { %7170 = vmatprep.subr.bf16.mxu1 %v8592_v44  ;;  %v3725_v44 = vld [vmem:[#allocation6 + $0x670] sm:$0xff]  ;;  %v3758_v24 = vld [vmem:[#allocation6 + $0x778] sm:$0xff] }
 0x395   :  { %v8645_v9 = vcombine.low %v3721_v53, %v3725_v44  ;;  %v3762_v30 = vld [vmem:[#allocation6 + $0x798] sm:$0xff]  ;;  %v8679_v36 = vcombine.low %v3754_v22, %v3758_v24 }
 0x396   :  { %7007 = vmatpush1.bf16.msra.mxu0 %v8589_v49  ;;  %v8646_v49 = vcombine.high %v3721_v53, %v3725_v44  ;;  %v3766_v31 = vld [vmem:[#allocation6 + $0x7b8] sm:$0xff] }
 0x397   :  { %7171 = vmatpush1.bf16.msra.mxu1 %v8591_v55  ;;  %7008 = vmatprep.subr.bf16.mxu0 %v8598_v50  ;;  %v8648_v55 = vcombine.high %v3722_v47, %v3726_v48  ;;  %v3729_v50 = vld [vmem:[#allocation6 + $0x690] sm:$0xff]  ;;  %v3770_v53 = vld [vmem:[#allocation6 + $0x7d8] sm:$0xff]  ;;  %v8687_v48 = vcombine.low %v3762_v30, %v3766_v31 }
 0x398   :  { %7172 = vmatprep.subr.bf16.mxu1 %v8600_v51  ;;  %v3733_v51 = vld [vmem:[#allocation6 + $0x6b0] sm:$0xff]  ;;  %v3774_v44 = vld [vmem:[#allocation6 + $0x7f8] sm:$0xff] }
 0x399   :  { %v8653_v5 = vcombine.low %v3729_v50, %v3733_v51 }
 0x39a   :  { %7009 = vmatpush1.bf16.msra.mxu0 %v8597_v62  ;;  %v8654_v62 = vcombine.high %v3729_v50, %v3733_v51  ;;  %v3778_v50 = vld [vmem:[#allocation6 + $0x818] sm:$0xff] }
 0x39b   :  { %7173 = vmatpush1.bf16.msra.mxu1 %v8599_v59  ;;  %7010 = vmatprep.subr.bf16.mxu0 %v8606_v61  ;;  %v8656_v59 = vcombine.high %v3730_v52, %v3734_v54  ;;  %v3737_v61 = vld [vmem:[#allocation6 + $0x6d0] sm:$0xff]  ;;  %v3782_v51 = vld [vmem:[#allocation6 + $0x838] sm:$0xff]  ;;  %v8695_v54 = vcombine.low %v3770_v53, %v3774_v44 }
 0x39c   :  { %7174 = vmatprep.subr.bf16.mxu1 %v8608_v63  ;;  %v3741_v63 = vld [vmem:[#allocation6 + $0x6f0] sm:$0xff] }
 0x39d   :  { %v8661_v16 = vcombine.low %v3737_v61, %v3741_v63 }
 0x39e   :  { %7011 = vmatpush1.bf16.msra.mxu0 %v8605_v8  ;;  %v8662_v8 = vcombine.high %v3737_v61, %v3741_v63  ;;  %v3786_v63 = vld [vmem:[#allocation6 + $0x858] sm:$0xff] }
 0x39f   :  { %7175 = vmatpush1.bf16.msra.mxu1 %v8607_v10  ;;  %7012 = vmatprep.subr.bf16.mxu0 %v8614_v11  ;;  %v8664_v10 = vcombine.high %v3738_v2, %v3742_v60  ;;  %v3745_v11 = vld [vmem:[#allocation6 + $0x710] sm:$0xff]  ;;  %v3790_v2 = vld [vmem:[#allocation6 + $0x878] sm:$0xff]  ;;  %v8703_v60 = vcombine.low %v3778_v50, %v3782_v51 }
 0x3a0   :  { %7176 = vmatprep.subr.bf16.mxu1 %v8616_v57  ;;  %v3749_v57 = vld [vmem:[#allocation6 + $0x730] sm:$0xff] }
 0x3a1   :  { %v8669_v26 = vcombine.low %v3745_v11, %v3749_v57 }
 0x3a2   :  { %7013 = vmatpush1.bf16.msra.mxu0 %v8613_v37  ;;  %v8670_v37 = vcombine.high %v3745_v11, %v3749_v57  ;;  %v3794_v11 = vld [vmem:[#allocation6 + $0x898] sm:$0xff] }
 0x3a3   :  { %7177 = vmatpush1.bf16.msra.mxu1 %v8615_v17  ;;  %7014 = vmatprep.subr.bf16.mxu0 %v8622_v19  ;;  %v8672_v17 = vcombine.high %v3746_v4, %v3750_v14  ;;  %v3753_v19 = vld [vmem:[#allocation6 + $0x750] sm:$0xff]  ;;  %v3798_v57 = vld [vmem:[#allocation6 + $0x8b8] sm:$0xff]  ;;  %v8711_v14 = vcombine.low %v3786_v63, %v3790_v2 }
 0x3a4   :  { %7178 = vmatprep.subr.bf16.mxu1 %v8624_v21  ;;  %v3757_v21 = vld [vmem:[#allocation6 + $0x770] sm:$0xff] }
 0x3a5   :  { %v8677_v33 = vcombine.low %v3753_v19, %v3757_v21 }
 0x3a6   :  { %7015 = vmatpush1.bf16.msra.mxu0 %v8621_v25  ;;  %v8678_v25 = vcombine.high %v3753_v19, %v3757_v21  ;;  %v3802_v19 = vld [vmem:[#allocation6 + $0x8d8] sm:$0xff] }
 0x3a7   :  { %7179 = vmatpush1.bf16.msra.mxu1 %v8623_v23  ;;  %7016 = vmatprep.subr.bf16.mxu0 %v8630_v28  ;;  %v8680_v23 = vcombine.high %v3754_v22, %v3758_v24  ;;  %v3761_v28 = vld [vmem:[#allocation6 + $0x790] sm:$0xff]  ;;  %v3806_v21 = vld [vmem:[#allocation6 + $0x8f8] sm:$0xff] }
 0x3a8   :  { %7180 = vmatprep.subr.bf16.mxu1 %v8632_v29  ;;  %v3765_v29 = vld [vmem:[#allocation6 + $0x7b0] sm:$0xff] }
 0x3a9   :  { %v8685_v47 = vcombine.low %v3761_v28, %v3765_v29 }
 0x3aa   :  { %7017 = vmatpush1.bf16.msra.mxu0 %v8629_v38  ;;  %v8686_v38 = vcombine.high %v3761_v28, %v3765_v29  ;;  %v3814_v28 = vld [vmem:[#allocation6 + $0x938] sm:$0xff]  ;;  %v8727_v29 = vcombine.low %v3802_v19, %v3806_v21 }
 0x3ab   :  { %7181 = vmatpush1.bf16.msra.mxu1 %v8631_v39  ;;  %7018 = vmatprep.subr.bf16.mxu0 %v8638_v40  ;;  %v8688_v39 = vcombine.high %v3762_v30, %v3766_v31  ;;  %v3769_v40 = vld [vmem:[#allocation6 + $0x7d0] sm:$0xff] }
 0x3ac   :  { %7182 = vmatprep.subr.bf16.mxu1 %v8640_v42  ;;  %v3773_v42 = vld [vmem:[#allocation6 + $0x7f0] sm:$0xff] }
 0x3ad   :  { %v8693_v52 = vcombine.low %v3769_v40, %v3773_v42 }
 0x3ae   :  { %7019 = vmatpush1.bf16.msra.mxu0 %v8637_v43  ;;  %v8694_v43 = vcombine.high %v3769_v40, %v3773_v42 }
 0x3af   :  { %7183 = vmatpush1.bf16.msra.mxu1 %v8639_v0  ;;  %7020 = vmatprep.subr.bf16.mxu0 %v8646_v49  ;;  %v8696_v0 = vcombine.high %v3770_v53, %v3774_v44  ;;  %v3777_v49 = vld [vmem:[#allocation6 + $0x810] sm:$0xff] }
 0x3b0   :  { %7184 = vmatprep.subr.bf16.mxu1 %v8648_v55  ;;  %v3781_v55 = vld [vmem:[#allocation6 + $0x830] sm:$0xff] }
 0x3b1   :  { %v8701_v61 = vcombine.low %v3777_v49, %v3781_v55 }
 0x3b2   :  { %7021 = vmatpush1.bf16.msra.mxu0 %v8645_v9  ;;  %v8702_v9 = vcombine.high %v3777_v49, %v3781_v55 }
 0x3b3   :  { %7185 = vmatpush1.bf16.msra.mxu1 %v8647_v58  ;;  %7022 = vmatprep.subr.bf16.mxu0 %v8654_v62  ;;  %v8704_v58 = vcombine.high %v3778_v50, %v3782_v51  ;;  %v3785_v62 = vld [vmem:[#allocation6 + $0x850] sm:$0xff] }
 0x3b4   :  { %7186 = vmatprep.subr.bf16.mxu1 %v8656_v59  ;;  %v3789_v59 = vld [vmem:[#allocation6 + $0x870] sm:$0xff] }
 0x3b5   :  { %v8709_v4 = vcombine.low %v3785_v62, %v3789_v59 }
 0x3b6   :  { %7023 = vmatpush1.bf16.msra.mxu0 %v8653_v5  ;;  %v8710_v5 = vcombine.high %v3785_v62, %v3789_v59 }
 0x3b7   :  { %7187 = vmatpush1.bf16.msra.mxu1 %v8655_v6  ;;  %7024 = vmatprep.subr.bf16.mxu0 %v8662_v8  ;;  %v3793_v6 = vld [vmem:[#allocation6 + $0x890] sm:$0xff] }
 0x3b8   :  { %7188 = vmatprep.subr.bf16.mxu1 %v8664_v10  ;;  %v3797_v8 = vld [vmem:[#allocation6 + $0x8b0] sm:$0xff]  ;;  %v8712_v10 = vcombine.high %v3786_v63, %v3790_v2 }
 0x3b9   :  { %v8717_v22 = vcombine.low %v3793_v6, %v3797_v8  ;;  %v3841_v2 = vld [vmem:[#allocation6 + $0xa10] sm:$0xff] }
 0x3ba   :  { %7025 = vmatpush1.bf16.msra.mxu0 %v8661_v16  ;;  %v8718_v16 = vcombine.high %v3793_v6, %v3797_v8  ;;  %v3846_v6 = vld [vmem:[#allocation6 + $0xa38] sm:$0xff] }
 0x3bb   :  { %7189 = vmatpush1.bf16.msra.mxu1 %v8663_v12  ;;  %7026 = vmatprep.subr.bf16.mxu0 %v8670_v37  ;;  %v8720_v12 = vcombine.high %v3794_v11, %v3798_v57  ;;  %v3801_v37 = vld [vmem:[#allocation6 + $0x8d0] sm:$0xff] }
 0x3bc   :  { %7190 = vmatprep.subr.bf16.mxu1 %v8672_v17  ;;  %v3805_v17 = vld [vmem:[#allocation6 + $0x8f0] sm:$0xff] }
 0x3bd   :  { %v8726_v24 = vcombine.high %v3801_v37, %v3805_v17 }
 0x3be   :  { %7027 = vmatpush1.bf16.msra.mxu0 %v8669_v26  ;;  %v8728_v26 = vcombine.high %v3802_v19, %v3806_v21 }
 0x3bf   :  { %7191 = vmatpush1.bf16.msra.mxu1 %v8671_v27  ;;  %7028 = vmatprep.subr.bf16.mxu0 %v8678_v25  ;;  %v3809_v27 = vld [vmem:[#allocation6 + $0x910] sm:$0xff] }
 0x3c0   :  { %7192 = vmatprep.subr.bf16.mxu1 %v8680_v23  ;;  %v3813_v25 = vld [vmem:[#allocation6 + $0x930] sm:$0xff]  ;;  %v3810_v23 = vld [vmem:[#allocation6 + $0x918] sm:$0xff] }
 0x3c1   :  { %v8734_v30 = vcombine.high %v3809_v27, %v3813_v25  ;;  %v8736_v31 = vcombine.high %v3810_v23, %v3814_v28  ;;  %v8733_v40 = vcombine.low %v3809_v27, %v3813_v25  ;;  %v8735_v42 = vcombine.low %v3810_v23, %v3814_v28 }
 0x3c2   :  { %7029 = vmatpush1.bf16.msra.mxu0 %v8677_v33  ;;  %v3817_v33 = vld [vmem:[#allocation6 + $0x950] sm:$0xff] }
 0x3c3   :  { %7193 = vmatpush1.bf16.msra.mxu1 %v8679_v36  ;;  %7030 = vmatprep.subr.bf16.mxu0 %v8686_v38  ;;  %v3821_v36 = vld [vmem:[#allocation6 + $0x970] sm:$0xff]  ;;  %v3818_v38 = vld [vmem:[#allocation6 + $0x958] sm:$0xff] }
 0x3c4   :  { %7194 = vmatprep.subr.bf16.mxu1 %v8688_v39  ;;  %v3822_v39 = vld [vmem:[#allocation6 + $0x978] sm:$0xff]  ;;  %v8742_v53 = vcombine.high %v3817_v33, %v3821_v36  ;;  %v8741_v49 = vcombine.low %v3817_v33, %v3821_v36 }
 0x3c5   :  { %v8744_v44 = vcombine.high %v3818_v38, %v3822_v39  ;;  %v8743_v55 = vcombine.low %v3818_v38, %v3822_v39 }
 0x3c6   :  { %7031 = vmatpush1.bf16.msra.mxu0 %v8685_v47  ;;  %v3825_v47 = vld [vmem:[#allocation6 + $0x990] sm:$0xff] }
 0x3c7   :  { %7195 = vmatpush1.bf16.msra.mxu1 %v8687_v48  ;;  %7032 = vmatprep.subr.bf16.mxu0 %v8694_v43  ;;  %v3829_v48 = vld [vmem:[#allocation6 + $0x9b0] sm:$0xff]  ;;  %v3826_v43 = vld [vmem:[#allocation6 + $0x998] sm:$0xff] }
 0x3c8   :  { %7196 = vmatprep.subr.bf16.mxu1 %v8696_v0  ;;  %v3830_v0 = vld [vmem:[#allocation6 + $0x9b8] sm:$0xff]  ;;  %v8750_v50 = vcombine.high %v3825_v47, %v3829_v48  ;;  %v8749_v62 = vcombine.low %v3825_v47, %v3829_v48 }
 0x3c9   :  { %v8752_v51 = vcombine.high %v3826_v43, %v3830_v0  ;;  %v8751_v59 = vcombine.low %v3826_v43, %v3830_v0 }
 0x3ca   :  { %7033 = vmatpush1.bf16.msra.mxu0 %v8693_v52  ;;  %v3833_v52 = vld [vmem:[#allocation6 + $0x9d0] sm:$0xff] }
 0x3cb   :  { %7197 = vmatpush1.bf16.msra.mxu1 %v8695_v54  ;;  %7043 = vmatprep.subr.bf16.mxu0 %v8702_v9  ;;  %v3837_v54 = vld [vmem:[#allocation6 + $0x9f0] sm:$0xff]  ;;  %v3834_v9 = vld [vmem:[#allocation6 + $0x9d8] sm:$0xff] }
 0x3cc   :  { %7207 = vmatprep.subr.bf16.mxu1 %v8704_v58  ;;  %v3838_v58 = vld [vmem:[#allocation6 + $0x9f8] sm:$0xff]  ;;  %v8757_v8 = vcombine.low %v3833_v52, %v3837_v54 }
 0x3cd   :  { %7035 = vmatmul.mubr.bf16.vlgmr.msra.gmra.mrb[12].mxu0 %v9665_v18  ;;  %v8760_v63 = vcombine.high %v3834_v9, %v3838_v58 }
 0x3ce   :  { %7199 = vmatmul.mubr.bf16.vlgmr.msra.gmra.mrb[12].mxu1 %v9665_v18  ;;  %7044 = vmatpush1.bf16.msra.mxu0 %v8701_v61  ;;  %v8719_v18 = vcombine.low %v3794_v11, %v3798_v57  ;;  %v8758_v61 = vcombine.high %v3833_v52, %v3837_v54 }
 0x3cf   :  { %7075 = vmatprep.mubr.bf16.mxu0 %v9685_v1  ;;  %7208 = vmatpush1.bf16.msra.mxu1 %v8703_v60  ;;  %v3845_v60 = vld [vmem:[#allocation6 + $0xa30] sm:$0xff] }
 0x3d0   :  { %7239 = vmatprep.mubr.bf16.mxu1 %v9685_v1  ;;  %7045 = vmatprep.subr.bf16.mxu0 %v8710_v5  ;;  %v8725_v1 = vcombine.low %v3801_v37, %v3805_v17  ;;  %v3842_v5 = vld [vmem:[#allocation6 + $0xa18] sm:$0xff]  ;;  %v8766_v11 = vcombine.high %v3841_v2, %v3845_v60  ;;  %v8765_v37 = vcombine.low %v3841_v2, %v3845_v60 }
 0x3d1   :  { %7209 = vmatprep.subr.bf16.mxu1 %v8712_v10  ;;  %v8759_v10 = vcombine.low %v3834_v9, %v3838_v58  ;;  %v8768_v57 = vcombine.high %v3842_v5, %v3846_v6  ;;  %v8767_v17 = vcombine.low %v3842_v5, %v3846_v6 }
 0x3d2   :  { %7046 = vmatpush1.bf16.msra.mxu0 %v8709_v4  ;;  %v3849_v4 = vld [vmem:[#allocation6 + $0xa50] sm:$0xff] }
 0x3d3   :  { %7210 = vmatpush1.bf16.msra.mxu1 %v8711_v14  ;;  %7047 = vmatprep.subr.bf16.mxu0 %v8718_v16  ;;  %v3853_v14 = vld [vmem:[#allocation6 + $0xa70] sm:$0xff]  ;;  %v3850_v16 = vld [vmem:[#allocation6 + $0xa58] sm:$0xff] }
 0x3d4   :  { %7211 = vmatprep.subr.bf16.mxu1 %v8720_v12  ;;  %v3854_v12 = vld [vmem:[#allocation6 + $0xa78] sm:$0xff]  ;;  %v8774_v19 = vcombine.high %v3849_v4, %v3853_v14  ;;  %v8773_v27 = vcombine.low %v3849_v4, %v3853_v14 }
 0x3d5   :  { %v8776_v21 = vcombine.high %v3850_v16, %v3854_v12  ;;  %v8775_v25 = vcombine.low %v3850_v16, %v3854_v12 }
 0x3d6   :  { %7048 = vmatpush1.bf16.msra.mxu0 %v8717_v22  ;;  %v3857_v22 = vld [vmem:[#allocation6 + $0xa90] sm:$0xff] }
 0x3d7   :  { %7212 = vmatpush1.bf16.msra.mxu1 %v8719_v18  ;;  %7049 = vmatprep.subr.bf16.mxu0 %v8726_v24  ;;  %v3861_v18 = vld [vmem:[#allocation6 + $0xab0] sm:$0xff]  ;;  %v3858_v24 = vld [vmem:[#allocation6 + $0xa98] sm:$0xff] }
 0x3d8   :  { %7213 = vmatprep.subr.bf16.mxu1 %v8728_v26  ;;  %v3862_v26 = vld [vmem:[#allocation6 + $0xab8] sm:$0xff]  ;;  %v8782_v23 = vcombine.high %v3857_v22, %v3861_v18  ;;  %v8781_v33 = vcombine.low %v3857_v22, %v3861_v18 }
 0x3d9   :  { %v8784_v28 = vcombine.high %v3858_v24, %v3862_v26  ;;  %v8783_v36 = vcombine.low %v3858_v24, %v3862_v26 }
 0x3da   :  { %7050 = vmatpush1.bf16.msra.mxu0 %v8725_v1  ;;  %v3865_v1 = vld [vmem:[#allocation6 + $0xad0] sm:$0xff] }
 0x3db   :  { %7214 = vmatpush1.bf16.msra.mxu1 %v8727_v29  ;;  %7051 = vmatprep.subr.bf16.mxu0 %v8734_v30  ;;  %v3869_v29 = vld [vmem:[#allocation6 + $0xaf0] sm:$0xff]  ;;  %v3866_v30 = vld [vmem:[#allocation6 + $0xad8] sm:$0xff] }
 0x3dc   :  { %7215 = vmatprep.subr.bf16.mxu1 %v8736_v31  ;;  %v3870_v31 = vld [vmem:[#allocation6 + $0xaf8] sm:$0xff]  ;;  %v8790_v38 = vcombine.high %v3865_v1, %v3869_v29  ;;  %v8789_v47 = vcombine.low %v3865_v1, %v3869_v29 }
 0x3dd   :  { %v8792_v39 = vcombine.high %v3866_v30, %v3870_v31  ;;  %v8791_v48 = vcombine.low %v3866_v30, %v3870_v31  ;;  %v3918_v1 = vld [vmem:[#allocation6 + $0xc78] sm:$0xff]  ;;  %v3921_v31 = vld [vmem:[#allocation6 + $0xc90] sm:$0xff] }
 0x3de   :  { %7052 = vmatpush1.bf16.msra.mxu0 %v8733_v40  ;;  %v3873_v40 = vld [vmem:[#allocation6 + $0xb10] sm:$0xff] }
 0x3df   :  { %7216 = vmatpush1.bf16.msra.mxu1 %v8735_v42  ;;  %7053 = vmatprep.subr.bf16.mxu0 %v8742_v53  ;;  %v3877_v42 = vld [vmem:[#allocation6 + $0xb30] sm:$0xff]  ;;  %v3874_v53 = vld [vmem:[#allocation6 + $0xb18] sm:$0xff] }
 0x3e0   :  { %7217 = vmatprep.subr.bf16.mxu1 %v8744_v44  ;;  %v3878_v44 = vld [vmem:[#allocation6 + $0xb38] sm:$0xff]  ;;  %v8798_v43 = vcombine.high %v3873_v40, %v3877_v42  ;;  %v8797_v52 = vcombine.low %v3873_v40, %v3877_v42 }
 0x3e1   :  { %v8800_v0 = vcombine.high %v3874_v53, %v3878_v44  ;;  %v8799_v54 = vcombine.low %v3874_v53, %v3878_v44 }
 0x3e2   :  { %7054 = vmatpush1.bf16.msra.mxu0 %v8741_v49  ;;  %v3881_v49 = vld [vmem:[#allocation6 + $0xb50] sm:$0xff] }
 0x3e3   :  { %7218 = vmatpush1.bf16.msra.mxu1 %v8743_v55  ;;  %7055 = vmatprep.subr.bf16.mxu0 %v8750_v50  ;;  %v3885_v55 = vld [vmem:[#allocation6 + $0xb70] sm:$0xff]  ;;  %v3882_v50 = vld [vmem:[#allocation6 + $0xb58] sm:$0xff] }
 0x3e4   :  { %7219 = vmatprep.subr.bf16.mxu1 %v8752_v51  ;;  %v3886_v51 = vld [vmem:[#allocation6 + $0xb78] sm:$0xff]  ;;  %v8806_v9 = vcombine.high %v3881_v49, %v3885_v55  ;;  %v8805_v2 = vcombine.low %v3881_v49, %v3885_v55 }
 0x3e5   :  { %v8808_v58 = vcombine.high %v3882_v50, %v3886_v51  ;;  %v8807_v60 = vcombine.low %v3882_v50, %v3886_v51  ;;  %v3937_v51 = vld [vmem:[#allocation6 + $0xd10] sm:$0xff] }
 0x3e6   :  { %7056 = vmatpush1.bf16.msra.mxu0 %v8749_v62  ;;  %v3889_v62 = vld [vmem:[#allocation6 + $0xb90] sm:$0xff] }
 0x3e7   :  { %7220 = vmatpush1.bf16.msra.mxu1 %v8751_v59  ;;  %7057 = vmatprep.subr.bf16.mxu0 %v8758_v61  ;;  %v3893_v59 = vld [vmem:[#allocation6 + $0xbb0] sm:$0xff]  ;;  %v3890_v61 = vld [vmem:[#allocation6 + $0xb98] sm:$0xff] }
 0x3e8   :  { %7221 = vmatprep.subr.bf16.mxu1 %v8760_v63  ;;  %v3894_v63 = vld [vmem:[#allocation6 + $0xbb8] sm:$0xff]  ;;  %v8814_v5 = vcombine.high %v3889_v62, %v3893_v59  ;;  %v8813_v4 = vcombine.low %v3889_v62, %v3893_v59 }
 0x3e9   :  { %v8816_v6 = vcombine.high %v3890_v61, %v3894_v63  ;;  %v8815_v14 = vcombine.low %v3890_v61, %v3894_v63  ;;  %v3945_v61 = vld [vmem:[#allocation6 + $0xd50] sm:$0xff] }
 0x3ea   :  { %7058 = vmatpush1.bf16.msra.mxu0 %v8757_v8  ;;  %v3897_v8 = vld [vmem:[#allocation6 + $0xbd0] sm:$0xff] }
 0x3eb   :  { %7222 = vmatpush1.bf16.msra.mxu1 %v8759_v10  ;;  %7059 = vmatprep.subr.bf16.mxu0 %v8766_v11  ;;  %v3901_v10 = vld [vmem:[#allocation6 + $0xbf0] sm:$0xff]  ;;  %v3898_v11 = vld [vmem:[#allocation6 + $0xbd8] sm:$0xff] }
 0x3ec   :  { %7223 = vmatprep.subr.bf16.mxu1 %v8768_v57  ;;  %v3902_v57 = vld [vmem:[#allocation6 + $0xbf8] sm:$0xff]  ;;  %v8822_v16 = vcombine.high %v3897_v8, %v3901_v10  ;;  %v8821_v22 = vcombine.low %v3897_v8, %v3901_v10  ;;  %v3949_v63 = vld [vmem:[#allocation6 + $0xd70] sm:$0xff] }
 0x3ed   :  { %v8824_v12 = vcombine.high %v3898_v11, %v3902_v57  ;;  %v8823_v18 = vcombine.low %v3898_v11, %v3902_v57  ;;  %v8870_v8 = vcombine.high %v3945_v61, %v3949_v63  ;;  %v3953_v11 = vld [vmem:[#allocation6 + $0xd90] sm:$0xff] }
 0x3ee   :  { %7060 = vmatpush1.bf16.msra.mxu0 %v8765_v37  ;;  %v3905_v37 = vld [vmem:[#allocation6 + $0xc10] sm:$0xff] }
 0x3ef   :  { %7224 = vmatpush1.bf16.msra.mxu1 %v8767_v17  ;;  %7061 = vmatprep.subr.bf16.mxu0 %v8774_v19  ;;  %v3909_v17 = vld [vmem:[#allocation6 + $0xc30] sm:$0xff]  ;;  %v3906_v19 = vld [vmem:[#allocation6 + $0xc18] sm:$0xff] }
 0x3f0   :  { %7225 = vmatprep.subr.bf16.mxu1 %v8776_v21  ;;  %v3910_v21 = vld [vmem:[#allocation6 + $0xc38] sm:$0xff]  ;;  %v8830_v24 = vcombine.high %v3905_v37, %v3909_v17  ;;  %v3957_v57 = vld [vmem:[#allocation6 + $0xdb0] sm:$0xff] }
 0x3f1   :  { %v8832_v26 = vcombine.high %v3906_v19, %v3910_v21  ;;  %v8831_v29 = vcombine.low %v3906_v19, %v3910_v21 }
 0x3f2   :  { %7062 = vmatpush1.bf16.msra.mxu0 %v8773_v27  ;;  %v3913_v27 = vld [vmem:[#allocation6 + $0xc50] sm:$0xff] }
 0x3f3   :  { %7226 = vmatpush1.bf16.msra.mxu1 %v8775_v25  ;;  %7063 = vmatprep.subr.bf16.mxu0 %v8782_v23  ;;  %v3917_v25 = vld [vmem:[#allocation6 + $0xc70] sm:$0xff]  ;;  %v8829_v23 = vcombine.low %v3905_v37, %v3909_v17  ;;  %v8878_v37 = vcombine.high %v3953_v11, %v3957_v57 }
 0x3f4   :  { %7227 = vmatprep.subr.bf16.mxu1 %v8784_v28  ;;  %v3914_v28 = vld [vmem:[#allocation6 + $0xc58] sm:$0xff]  ;;  %v8838_v30 = vcombine.high %v3913_v27, %v3917_v25  ;;  %v8837_v40 = vcombine.low %v3913_v27, %v3917_v25 }
 0x3f5   :  { %v8839_v42 = vcombine.low %v3914_v28, %v3918_v1  ;;  %v3962_v27 = vld [vmem:[#allocation6 + $0xdd8] sm:$0xff] }
 0x3f6   :  { %7064 = vmatpush1.bf16.msra.mxu0 %v8781_v33  ;;  %v3925_v33 = vld [vmem:[#allocation6 + $0xcb0] sm:$0xff]  ;;  %v3966_v25 = vld [vmem:[#allocation6 + $0xdf8] sm:$0xff] }
 0x3f7   :  { %7228 = vmatpush1.bf16.msra.mxu1 %v8783_v36  ;;  %7065 = vmatprep.subr.bf16.mxu0 %v8790_v38  ;;  %v8840_v36 = vcombine.high %v3914_v28, %v3918_v1  ;;  %v3922_v38 = vld [vmem:[#allocation6 + $0xc98] sm:$0xff]  ;;  %v8846_v53 = vcombine.high %v3921_v31, %v3925_v33  ;;  %v8845_v49 = vcombine.low %v3921_v31, %v3925_v33 }
 0x3f8   :  { %7229 = vmatprep.subr.bf16.mxu1 %v8792_v39  ;;  %v3926_v39 = vld [vmem:[#allocation6 + $0xcb8] sm:$0xff]  ;;  %v8877_v1 = vcombine.low %v3953_v11, %v3957_v57 }
 0x3f9   :  { %v8848_v44 = vcombine.high %v3922_v38, %v3926_v39 }
 0x3fa   :  { %7066 = vmatpush1.bf16.msra.mxu0 %v8789_v47  ;;  %v3929_v47 = vld [vmem:[#allocation6 + $0xcd0] sm:$0xff] }
 0x3fb   :  { %7230 = vmatpush1.bf16.msra.mxu1 %v8791_v48  ;;  %7067 = vmatprep.subr.bf16.mxu0 %v8798_v43  ;;  %v3933_v48 = vld [vmem:[#allocation6 + $0xcf0] sm:$0xff]  ;;  %v3930_v43 = vld [vmem:[#allocation6 + $0xcd8] sm:$0xff] }
 0x3fc   :  { %7231 = vmatprep.subr.bf16.mxu1 %v8800_v0  ;;  %v3934_v0 = vld [vmem:[#allocation6 + $0xcf8] sm:$0xff]  ;;  %v8854_v55 = vcombine.high %v3929_v47, %v3933_v48 }
 0x3fd   :  { %v8856_v50 = vcombine.high %v3930_v43, %v3934_v0 }
 0x3fe   :  { %7068 = vmatpush1.bf16.msra.mxu0 %v8797_v52  ;;  %v3941_v52 = vld [vmem:[#allocation6 + $0xd30] sm:$0xff] }
 0x3ff   :  { %7232 = vmatpush1.bf16.msra.mxu1 %v8799_v54  ;;  %7069 = vmatprep.subr.bf16.mxu0 %v8806_v9  ;;  %v3938_v54 = vld [vmem:[#allocation6 + $0xd18] sm:$0xff]  ;;  %v8862_v62 = vcombine.high %v3937_v51, %v3941_v52 }
 0x400   :  { %7233 = vmatprep.subr.bf16.mxu1 %v8808_v58  ;;  %v3942_v9 = vld [vmem:[#allocation6 + $0xd38] sm:$0xff]  ;;  %v8855_v58 = vcombine.low %v3930_v43, %v3934_v0  ;;  %v3977_v43 = vld [vmem:[#allocation6 + $0xe50] sm:$0xff] }
 0x401   :  { %v8864_v59 = vcombine.high %v3938_v54, %v3942_v9  ;;  %v3981_v0 = vld [vmem:[#allocation6 + $0xe70] sm:$0xff] }
 0x402   :  { %7070 = vmatpush1.bf16.msra.mxu0 %v8805_v2  ;;  %v3946_v2 = vld [vmem:[#allocation6 + $0xd58] sm:$0xff] }
 0x403   :  { %7234 = vmatpush1.bf16.msra.mxu1 %v8807_v60  ;;  %7071 = vmatprep.subr.bf16.mxu0 %v8814_v5  ;;  %v3950_v60 = vld [vmem:[#allocation6 + $0xd78] sm:$0xff]  ;;  %v8861_v5 = vcombine.low %v3937_v51, %v3941_v52  ;;  %v8902_v51 = vcombine.high %v3977_v43, %v3981_v0 }
 0x404   :  { %7235 = vmatprep.subr.bf16.mxu1 %v8816_v6  ;;  %v8863_v6 = vcombine.low %v3938_v54, %v3942_v9  ;;  %v8872_v10 = vcombine.high %v3946_v2, %v3950_v60  ;;  %v3985_v54 = vld [vmem:[#allocation6 + $0xe90] sm:$0xff] }
 0x405   :  { %v3989_v9 = vld [vmem:[#allocation6 + $0xeb0] sm:$0xff] }
 0x406   :  { %7072 = vmatpush1.bf16.msra.mxu0 %v8813_v4  ;;  %v3954_v4 = vld [vmem:[#allocation6 + $0xd98] sm:$0xff] }
 0x407   :  { %7236 = vmatpush1.bf16.msra.mxu1 %v8815_v14  ;;  %7073 = vmatprep.subr.bf16.mxu0 %v8822_v16  ;;  %v3958_v14 = vld [vmem:[#allocation6 + $0xdb8] sm:$0xff]  ;;  %v8869_v16 = vcombine.low %v3945_v61, %v3949_v63  ;;  %v8910_v61 = vcombine.high %v3985_v54, %v3989_v9 }
 0x408   :  { %7237 = vmatprep.subr.bf16.mxu1 %v8824_v12  ;;  %v8871_v12 = vcombine.low %v3946_v2, %v3950_v60  ;;  %v8880_v21 = vcombine.high %v3954_v4, %v3958_v14  ;;  %v8879_v31 = vcombine.low %v3954_v4, %v3958_v14  ;;  %v3993_v2 = vld [vmem:[#allocation6 + $0xed0] sm:$0xff] }
 0x409   :  { %v3997_v60 = vld [vmem:[#allocation6 + $0xef0] sm:$0xff] }
 0x40a   :  { %7074 = vmatpush1.bf16.msra.mxu0 %v8821_v22  ;;  %v3961_v22 = vld [vmem:[#allocation6 + $0xdd0] sm:$0xff]  ;;  %v8918_v11 = vcombine.high %v3993_v2, %v3997_v60 }
 0x40b   :  { %7238 = vmatpush1.bf16.msra.mxu1 %v8823_v18  ;;  %7084 = vmatprep.subr.bf16.mxu0 %v8830_v24  ;;  %v3965_v18 = vld [vmem:[#allocation6 + $0xdf0] sm:$0xff] }
 0x40c   :  { %7248 = vmatprep.subr.bf16.mxu1 %v8832_v26  ;;  %v8886_v33 = vcombine.high %v3961_v22, %v3965_v18  ;;  %v4001_v4 = vld [vmem:[#allocation6 + $0xf10] sm:$0xff] }
 0x40d   :  { %7076 = vmatmul.mubr.bf16.vlgmr.msra.gmra.mrb[12].mxu0 %v9687_v3  ;;  %v4005_v14 = vld [vmem:[#allocation6 + $0xf30] sm:$0xff] }
 0x40e   :  { %7240 = vmatmul.mubr.bf16.vlgmr.msra.gmra.mrb[12].mxu1 %v9687_v3  ;;  %7085 = vmatpush1.bf16.msra.mxu0 %v8829_v23  ;;  %v8847_v3 = vcombine.low %v3922_v38, %v3926_v39  ;;  %v3969_v38 = vld [vmem:[#allocation6 + $0xe10] sm:$0xff] }
 0x40f   :  { %7116 = vmatprep.mubr.bf16.mxu0 %v9691_v13  ;;  %7249 = vmatpush1.bf16.msra.mxu1 %v8831_v29  ;;  %v3973_v39 = vld [vmem:[#allocation6 + $0xe30] sm:$0xff] }
 0x410   :  { %7280 = vmatprep.mubr.bf16.mxu1 %v9691_v13  ;;  %7086 = vmatprep.subr.bf16.mxu0 %v8838_v30  ;;  %v8853_v13 = vcombine.low %v3929_v47, %v3933_v48  ;;  %v8894_v47 = vcombine.high %v3969_v38, %v3973_v39 }
 0x411   :  { %7250 = vmatprep.subr.bf16.mxu1 %v8840_v36  ;;  %v8888_v36 = vcombine.high %v3962_v27, %v3966_v25 }
 0x412   :  { %7087 = vmatpush1.bf16.msra.mxu0 %v8837_v40  ;;  %v3970_v40 = vld [vmem:[#allocation6 + $0xe18] sm:$0xff] }
 0x413   :  { %7251 = vmatpush1.bf16.msra.mxu1 %v8839_v42  ;;  %7088 = vmatprep.subr.bf16.mxu0 %v8846_v53  ;;  %v3974_v42 = vld [vmem:[#allocation6 + $0xe38] sm:$0xff]  ;;  %v8885_v53 = vcombine.low %v3961_v22, %v3965_v18  ;;  %v8926_v22 = vcombine.high %v4001_v4, %v4005_v14 }
 0x414   :  { %7252 = vmatprep.subr.bf16.mxu1 %v8848_v44  ;;  %v8887_v44 = vcombine.low %v3962_v27, %v3966_v25  ;;  %v8896_v48 = vcombine.high %v3970_v40, %v3974_v42  ;;  %v4009_v27 = vld [vmem:[#allocation6 + $0xf50] sm:$0xff] }
 0x415   :  { %v4013_v25 = vld [vmem:[#allocation6 + $0xf70] sm:$0xff] }
 0x416   :  { %7089 = vmatpush1.bf16.msra.mxu0 %v8845_v49  ;;  %v3978_v49 = vld [vmem:[#allocation6 + $0xe58] sm:$0xff] }
 0x417   :  { %7253 = vmatpush1.bf16.msra.mxu1 %v8847_v3  ;;  %7090 = vmatprep.subr.bf16.mxu0 %v8854_v55  ;;  %v3982_v3 = vld [vmem:[#allocation6 + $0xe78] sm:$0xff]  ;;  %v8893_v55 = vcombine.low %v3969_v38, %v3973_v39 }
 0x418   :  { %7254 = vmatprep.subr.bf16.mxu1 %v8856_v50  ;;  %v8895_v50 = vcombine.low %v3970_v40, %v3974_v42  ;;  %v8904_v52 = vcombine.high %v3978_v49, %v3982_v3  ;;  %v4018_v38 = vld [vmem:[#allocation6 + $0xf98] sm:$0xff]  ;;  %v9728_v40 = vld [vmem:[#allocation7] sm:$0xff]  ;;  %v8933_v42 = vcombine.low %v4009_v27, %v4013_v25 }
 0x419   :  { %v4022_v39 = vld [vmem:[#allocation6 + $0xfb8] sm:$0xff] }
 0x41a   :  { %7091 = vmatpush1.bf16.msra.mxu0 %v8853_v13  ;;  %v3986_v13 = vld [vmem:[#allocation6 + $0xe98] sm:$0xff] }
 0x41b   :  { %7255 = vmatpush1.bf16.msra.mxu1 %v8855_v58  ;;  %7092 = vmatprep.subr.bf16.mxu0 %v8862_v62  ;;  %v3990_v58 = vld [vmem:[#allocation6 + $0xeb8] sm:$0xff]  ;;  %v8901_v62 = vcombine.low %v3977_v43, %v3981_v0  ;;  %v4029_v43 = vld [vmem:[#allocation6 + $0xff0] sm:$0xff]  ;;  %v4040_v0 = vrot.slane %v9728_v40, %v573_v56 }
 0x41c   :  { %7256 = vmatprep.subr.bf16.mxu1 %v8864_v59  ;;  %v8903_v59 = vcombine.low %v3978_v49, %v3982_v3  ;;  %v8912_v63 = vcombine.high %v3986_v13, %v3990_v58  ;;  %v4026_v49 = vld [vmem:[#allocation6 + $0xfd8] sm:$0xff] }
 0x41d   :  { %v4030_v3 = vld [vmem:[#allocation6 + $0xff8] sm:$0xff] }
 0x41e   :  { %7093 = vmatpush1.bf16.msra.mxu0 %v8861_v5  ;;  %v3994_v5 = vld [vmem:[#allocation6 + $0xed8] sm:$0xff] }
 0x41f   :  { %7257 = vmatpush1.bf16.msra.mxu1 %v8863_v6  ;;  %7094 = vmatprep.subr.bf16.mxu0 %v8870_v8  ;;  %v3998_v6 = vld [vmem:[#allocation6 + $0xef8] sm:$0xff]  ;;  %v8909_v8 = vcombine.low %v3985_v54, %v3989_v9  ;;  %v8952_v54 = vcombine.high %v4026_v49, %v4030_v3 }
 0x420   :  { %v9720_v17 = vpop.f32.mrb[8].mxu0  ;;  %v9722_v19 = vpop.f32.mrb[8].mxu1  ;;  %7258 = vmatprep.subr.bf16.mxu1 %v8872_v10  ;;  %v8911_v10 = vcombine.low %v3986_v13, %v3990_v58  ;;  %v8920_v57 = vcombine.high %v3994_v5, %v3998_v6  ;;  %v8951_v58 = vcombine.low %v4026_v49, %v4030_v3  ;;  %v9264_v49 = vld [vmem:[#allocation9 + $0x180] sm:$0xff]   ;;  %v9265_v3 = vld [vmem:[#allocation9 + $0x148] sm:$0xff]  }
 0x421   :  { %v9724_v24 = vpop.f32.mrb[9].mxu0  ;;  %v9726_v26 = vpop.f32.mrb[9].mxu1 }
 0x422   :  { %v6794_v23 = vpop.f32.mrb[10].mxu0  ;;  %v6958_v28 = vpop.f32.mrb[10].mxu1  ;;  %7095 = vmatpush1.bf16.msra.mxu0 %v8869_v16  ;;  %v4002_v16 = vld [vmem:[#allocation6 + $0xf18] sm:$0xff]  ;;  %v9115_v9 = vadd.f32 %v9724_v24, %v4040_v0 }
 0x423   :  { %7259 = vmatpush1.bf16.msra.mxu1 %v8871_v12  ;;  %v6795_v29 = vpop.f32.mrb[11].mxu0  ;;  %v6959_v30 = vpop.f32.mrb[11].mxu1  ;;  %7096 = vmatprep.subr.bf16.mxu0 %v8878_v37  ;;  %v4006_v12 = vld [vmem:[#allocation6 + $0xf38] sm:$0xff]  ;;  %v8917_v37 = vcombine.low %v3993_v2, %v3997_v60  ;;  %v9232_v2 = vld [vmem:[#allocation9 + $0x80] sm:$0xff]   ;;  %v9233_v60 = vld [vmem:[#allocation9 + $0x48] sm:$0xff]  }
 0x424   :  { %7260 = vmatprep.subr.bf16.mxu1 %v8880_v21  ;;  %v8919_v21 = vcombine.low %v3994_v5, %v3998_v6  ;;  %v8928_v18 = vcombine.high %v4002_v16, %v4006_v12  ;;  %v4010_v23 = vld [vmem:[#allocation6 + $0xf58] sm:$0xff]  ;;  %v8927_v29 = vcombine.low %v4002_v16, %v4006_v12  ;;  %v8934_v30 = vcombine.high %v4009_v27, %v4013_v25  ;;  %v9235_v6 = vld [vmem:[#allocation9 + $0x8] sm:$0xff]   ;;  %v9242_v16 = vld [vmem:[#allocation9 + $0xd8] sm:$0xff]  }
 0x425   :  { %v4014_v28 = vld [vmem:[#allocation6 + $0xf78] sm:$0xff]  ;;  %v9244_v12 = vld [vmem:[#allocation9 + $0x98] sm:$0xff]   ;;  %v9249_v27 = vld [vmem:[#allocation9 + $0x68] sm:$0xff]  }
 0x426   :  { %7097 = vmatpush1.bf16.msra.mxu0 %v8877_v1  ;;  %v8925_v1 = vcombine.low %v4001_v4, %v4005_v14  ;;  %v9240_v4 = vld [vmem:[#allocation9 + $0x90] sm:$0xff]   ;;  %v9241_v14 = vld [vmem:[#allocation9 + $0x58] sm:$0xff]   ;;  %v9250_v25 = vld [vmem:[#allocation9 + $0xe8] sm:$0xff]  }
 0x427   :  { %7261 = vmatpush1.bf16.msra.mxu1 %v8879_v31  ;;  %7098 = vmatprep.subr.bf16.mxu0 %v8886_v33  ;;  %v8936_v31 = vcombine.high %v4010_v23, %v4014_v28  ;;  %v4017_v33 = vld [vmem:[#allocation6 + $0xf90] sm:$0xff] }
 0x428   :  { %7262 = vmatprep.subr.bf16.mxu1 %v8888_v36  ;;  %v4021_v36 = vld [vmem:[#allocation6 + $0xfb0] sm:$0xff] }
 0x42a   :  { %7099 = vmatpush1.bf16.msra.mxu0 %v8885_v53  ;;  %v8935_v53 = vcombine.low %v4010_v23, %v4014_v28  ;;  %v9251_v23 = vld [vmem:[#allocation9 + $0x28] sm:$0xff]   ;;  %v4036_v28 = vrot.slane %v9728_v40, %v569_v15 }
 0x42b   :  { %7263 = vmatpush1.bf16.msra.mxu1 %v8887_v44  ;;  %7100 = vmatprep.subr.bf16.mxu0 %v8894_v47  ;;  %v8942_v44 = vcombine.high %v4017_v33, %v4021_v36  ;;  %v8944_v47 = vcombine.high %v4018_v38, %v4022_v39 }
 0x42c   :  { %7264 = vmatprep.subr.bf16.mxu1 %v8896_v48  ;;  %v4025_v48 = vld [vmem:[#allocation6 + $0xfd0] sm:$0xff] }
 0x42d   :  { %v8949_v56 = vcombine.low %v4025_v48, %v4029_v43 }
 0x42e   :  { %7101 = vmatpush1.bf16.msra.mxu0 %v8893_v55  ;;  %v4048_v55 = vrot.slane %v9728_v40, %v581_v20  ;;  %v9230_v20 = vld [vmem:[#allocation9 + $0xc0] sm:$0xff]  }
 0x42f   :  { %7265 = vmatpush1.bf16.msra.mxu1 %v8895_v50  ;;  %7102 = vmatprep.subr.bf16.mxu0 %v8902_v51  ;;  %v8941_v50 = vcombine.low %v4017_v33, %v4021_v36  ;;  %v8943_v51 = vcombine.low %v4018_v38, %v4022_v39  ;;  %v9255_v33 = vld [vmem:[#allocation9 + $0x30] sm:$0xff]   ;;  %v9114_v36 = vadd.f32 %v9720_v17, %v4036_v28  ;;  %v9257_v39 = vld [vmem:[#allocation9 + $0x78] sm:$0xff]   ;;  %v9263_v17 = vld [vmem:[#allocation9 + $0x100] sm:$0xff]  }
 0x430   :  { %7266 = vmatprep.subr.bf16.mxu1 %v8904_v52  ;;  %v8950_v52 = vcombine.high %v4025_v48, %v4029_v43  ;;  %v9117_v13 = vadd.f32 %v9726_v26, %v4048_v55  ;;  %v9234_v26 = vld [vmem:[#allocation9 + $0xc8] sm:$0xff]   ;;  %v9256_v38 = vld [vmem:[#allocation9 + $0xb0] sm:$0xff]   ;;  %v9262_v43 = vld [vmem:[#allocation9 + $0x1c0] sm:$0xff]  }
 0x431   :  { %v9266_v55 = vld [vmem:[#allocation9 + $0x1c8] sm:$0xff]  }
 0x432   :  { %7103 = vmatpush1.bf16.msra.mxu0 %v8901_v62  ;;  %v9229_v62 = vld [vmem:[#allocation9 + $0x40] sm:$0xff]  }
 0x433   :  { %7267 = vmatpush1.bf16.msra.mxu1 %v8903_v59  ;;  %7104 = vmatprep.subr.bf16.mxu0 %v8910_v61  ;;  %v7290_v59 = vmax.f32 %v9115_v9, 0.0  ;;  %v7292_v61 = vmax.f32 %v9117_v13, 0.0  ;;  %v9271_v9 = vld [vmem:[#allocation9 + $0x110] sm:$0xff]  }
 0x434   :  { %7268 = vmatprep.subr.bf16.mxu1 %v8912_v63  ;;  %v9231_v63 = vld [vmem:[#allocation9] sm:$0xff]   ;;  %v9272_v13 = vld [vmem:[#allocation9 + $0x190] sm:$0xff]  }
 0x435   :  { %v7298_v24 = vpack.c.bf16 %v7290_v59, %v7290_v59  ;;  %v7300_v5 = vpack.c.bf16 %v7292_v61, %v7292_v61  ;;  %v9277_v59 = vld [vmem:[#allocation9 + $0x160] sm:$0xff]  }
 0x436   :  { %7105 = vmatpush1.bf16.msra.mxu0 %v8909_v8  ;;  %v9236_v8 = vld [vmem:[#allocation9 + $0x88] sm:$0xff]   ;;  %v9278_v61 = vld [vmem:[#allocation9 + $0x1e0] sm:$0xff]  }
 0x437   :  { %7269 = vmatpush1.bf16.msra.mxu1 %v8911_v10  ;;  %7106 = vmatprep.subr.bf16.mxu0 %v8918_v11  ;;  %v9237_v10 = vld [vmem:[#allocation9 + $0x50] sm:$0xff]  }
 0x438   :  { %7270 = vmatprep.subr.bf16.mxu1 %v8920_v57  ;;  %v9238_v11 = vld [vmem:[#allocation9 + $0xd0] sm:$0xff]  }
 0x439   :  { %v9239_v57 = vld [vmem:[#allocation9 + $0x10] sm:$0xff]  }
 0x43a   :  { %7107 = vmatpush1.bf16.msra.mxu0 %v8917_v37  ;;  %v9245_v37 = vld [vmem:[#allocation9 + $0x60] sm:$0xff]  }
 0x43b   :  { %7271 = vmatpush1.bf16.msra.mxu1 %v8919_v21  ;;  %7108 = vmatprep.subr.bf16.mxu0 %v8926_v22  ;;  %v9246_v21 = vld [vmem:[#allocation9 + $0xe0] sm:$0xff]  }
 0x43c   :  { %7272 = vmatprep.subr.bf16.mxu1 %v8928_v18  ;;  %v9247_v22 = vld [vmem:[#allocation9 + $0x20] sm:$0xff]  }
 0x43d   :  { %v9248_v18 = vld [vmem:[#allocation9 + $0xa0] sm:$0xff]  }
 0x43e   :  { %7109 = vmatpush1.bf16.msra.mxu0 %v8925_v1  ;;  %v9252_v1 = vld [vmem:[#allocation9 + $0xa8] sm:$0xff]  }
 0x43f   :  { %7273 = vmatpush1.bf16.msra.mxu1 %v8927_v29  ;;  %7110 = vmatprep.subr.bf16.mxu0 %v8934_v30  ;;  %v9253_v29 = vld [vmem:[#allocation9 + $0x70] sm:$0xff]   ;;  %v4044_v30 = vrot.slane %v9728_v40, %v577_v41  ;;  %v9260_v41 = vld [vmem:[#allocation9 + $0xb8] sm:$0xff]  }
 0x440   :  { %7274 = vmatprep.subr.bf16.mxu1 %v8936_v31  ;;  %v9254_v31 = vld [vmem:[#allocation9 + $0xf0] sm:$0xff]  }
 0x441   :  { %v9116_v15 = vadd.f32 %v9722_v19, %v4044_v30 }
 0x442   :  { %7111 = vmatpush1.bf16.msra.mxu0 %v8933_v42  ;;  %v9258_v42 = vld [vmem:[#allocation9 + $0xf8] sm:$0xff]  }
 0x443   :  { %7275 = vmatpush1.bf16.msra.mxu1 %v8935_v53  ;;  %7112 = vmatprep.subr.bf16.mxu0 %v8942_v44  ;;  %v9259_v53 = vld [vmem:[#allocation9 + $0x38] sm:$0xff]   ;;  %v7289_v44 = vmax.f32 %v9114_v36, 0.0  ;;  %v7291_v48 = vmax.f32 %v9116_v15, 0.0 }
 0x444   :  { %7276 = vmatprep.subr.bf16.mxu1 %v8944_v47  ;;  %v9261_v47 = vld [vmem:[#allocation9 + $0x140] sm:$0xff]  }
 0x445   :  { %v7297_v0 = vpack.c.bf16 %v7289_v44, %v7289_v44  ;;  %v7299_v19 = vpack.c.bf16 %v7291_v48, %v7291_v48 }
 0x446   :  { %7113 = vmatpush1.bf16.msra.mxu0 %v8941_v50  ;;  %v9267_v50 = vld [vmem:[#allocation9 + $0x108] sm:$0xff]  }
 0x447   :  { %7277 = vmatpush1.bf16.msra.mxu1 %v8943_v51  ;;  %7114 = vmatprep.subr.bf16.mxu0 %v8950_v52  ;;  %v9268_v51 = vld [vmem:[#allocation9 + $0x188] sm:$0xff]   ;;  %v9269_v52 = vld [vmem:[#allocation9 + $0x150] sm:$0xff]  }
 0x448   :  { %7278 = vmatprep.subr.bf16.mxu1 %v8952_v54  ;;  %v9270_v54 = vld [vmem:[#allocation9 + $0x1d0] sm:$0xff]  }
 0x44a   :  { %7115 = vmatpush1.bf16.msra.mxu0 %v8949_v56  ;;  %v9273_v56 = vld [vmem:[#allocation9 + $0x158] sm:$0xff]  }
 0x44b   :  { %7279 = vmatpush1.bf16.msra.mxu1 %v8951_v58  ;;  %9018 = vmatprep.subr.bf16.mxu0 %v9229_v62  ;;  %v9274_v58 = vld [vmem:[#allocation9 + $0x1d8] sm:$0xff]  }
 0x44c   :  { %9040 = vmatprep.subr.bf16.mxu1 %v9230_v20  ;;  %v9275_v62 = vld [vmem:[#allocation9 + $0x118] sm:$0xff]  }
 0x44d   :  { %7117 = vmatmul.mubr.bf16.vlgmr.msra.gmra.mrb[12].mxu0 %v9702_v45  ;;  %v9276_v20 = vld [vmem:[#allocation9 + $0x198] sm:$0xff]  }
 0x44e   :  { %7281 = vmatmul.mubr.bf16.vlgmr.msra.gmra.mrb[12].mxu1 %v9702_v45  ;;  %9019 = vmatpush3.bf16.msra.mxu0 %v9231_v63  ;;  %v9243_v45 = vld [vmem:[#allocation9 + $0x18] sm:$0xff]   ;;  %v9279_v63 = vld [vmem:[#allocation9 + $0x120] sm:$0xff]  }
 0x44f   :  { %7856 = vmatprep.mubr.bf16.mxu0 %v7298_v24  ;;  %9041 = vmatpush3.bf16.msra.mxu1 %v9232_v2  ;;  %v9280_v2 = vld [vmem:[#allocation9 + $0x1a0] sm:$0xff]   ;;  %v9282_v24 = vld [vmem:[#allocation9 + $0x1e8] sm:$0xff]  }
 0x450   :  { %7896 = vmatprep.mubr.bf16.mxu1 %v7300_v5  ;;  %9020 = vmatprep.subr.bf16.mxu0 %v9233_v60  ;;  %v9281_v60 = vld [vmem:[#allocation9 + $0x168] sm:$0xff]  }
 0x451   :  { %9042 = vmatprep.subr.bf16.mxu1 %v9234_v26  ;;  %v9283_v26 = vld [vmem:[#allocation9 + $0x128] sm:$0xff]  }
 0x452   :  { %9021 = vmatpush3.bf16.msra.mxu0 %v9235_v6  ;;  %v9284_v5 = vld [vmem:[#allocation9 + $0x1a8] sm:$0xff]   ;;  %v9285_v6 = vld [vmem:[#allocation9 + $0x170] sm:$0xff]  }
 0x453   :  { %9043 = vmatpush3.bf16.msra.mxu1 %v9236_v8  ;;  %9022 = vmatprep.subr.bf16.mxu0 %v9237_v10  ;;  %v9286_v8 = vld [vmem:[#allocation9 + $0x1f0] sm:$0xff]  }
 0x454   :  { %9044 = vmatprep.subr.bf16.mxu1 %v9238_v11  ;;  %v9287_v10 = vld [vmem:[#allocation9 + $0x130] sm:$0xff]  }
 0x455   :  { %v9288_v11 = vld [vmem:[#allocation9 + $0x1b0] sm:$0xff]  }
 0x456   :  { %9023 = vmatpush3.bf16.msra.mxu0 %v9239_v57  ;;  %v9289_v57 = vld [vmem:[#allocation9 + $0x178] sm:$0xff]  }
 0x457   :  { %9045 = vmatpush3.bf16.msra.mxu1 %v9240_v4  ;;  %9024 = vmatprep.subr.bf16.mxu0 %v9241_v14  ;;  %v9290_v4 = vld [vmem:[#allocation9 + $0x1f8] sm:$0xff]  }
 0x458   :  { %9046 = vmatprep.subr.bf16.mxu1 %v9242_v16  ;;  %v9291_v14 = vld [vmem:[#allocation9 + $0x138] sm:$0xff]  }
 0x459   :  { %v9292_v16 = vld [vmem:[#allocation9 + $0x1b8] sm:$0xff]  }
 0x45a   :  { %9025 = vmatpush3.bf16.msra.mxu0 %v9243_v45  ;;  %v4052_v45 = vrot.slane %v9728_v40, %v585_v32 }
 0x45b   :  { %9047 = vmatpush3.bf16.msra.mxu1 %v9244_v12  ;;  %9026 = vmatprep.subr.bf16.mxu0 %v9245_v37  ;;  %v4060_v12 = vrot.slane %v9728_v40, %v593_v7  ;;  %v4056_v37 = vrot.slane %v9728_v40, %v589_v34 }
 0x45c   :  { %9048 = vmatprep.subr.bf16.mxu1 %v9246_v21  ;;  %v4064_v21 = vrot.slane %v9728_v40, %v597_v35 }
 0x45e   :  { %9027 = vmatpush3.bf16.msra.mxu0 %v9247_v22 }
 0x45f   :  { %9049 = vmatpush3.bf16.msra.mxu1 %v9248_v18  ;;  %9028 = vmatprep.subr.bf16.mxu0 %v9249_v27 }
 0x460   :  { %9050 = vmatprep.subr.bf16.mxu1 %v9250_v25 }
 0x462   :  { %9029 = vmatpush3.bf16.msra.mxu0 %v9251_v23 }
 0x463   :  { %9051 = vmatpush3.bf16.msra.mxu1 %v9252_v1  ;;  %9030 = vmatprep.subr.bf16.mxu0 %v9253_v29 }
 0x464   :  { %9052 = vmatprep.subr.bf16.mxu1 %v9254_v31 }
 0x466   :  { %9031 = vmatpush3.bf16.msra.mxu0 %v9255_v33 }
 0x467   :  { %9053 = vmatpush3.bf16.msra.mxu1 %v9256_v38  ;;  %9032 = vmatprep.subr.bf16.mxu0 %v9257_v39 }
 0x468   :  { %9054 = vmatprep.subr.bf16.mxu1 %v9258_v42 }
 0x46a   :  { %9033 = vmatpush3.bf16.msra.mxu0 %v9259_v53  ;;  %v8953_v53 = vld [vmem:[#allocation10] ss:$0 sm:$0xff] }
 0x46b   :  { %9055 = vmatpush3.bf16.msra.mxu1 %v9260_v41  ;;  %9062 = vmatprep.subr.bf16.mxu0 %v9261_v47 }
 0x46c   :  { %9084 = vmatprep.subr.bf16.mxu1 %v9262_v43 }
 0x46d   :  { %7857 = vmatmul.mubr.bf16.vlgmr.msra.gmra.mrb[16].mxu0 %v7297_v0 }
 0x46e   :  { %7897 = vmatmul.mubr.bf16.vlgmr.msra.gmra.mrb[16].mxu1 %v7299_v19  ;;  %9063 = vmatpush3.bf16.msra.mxu0 %v9263_v17 }
 0x46f   :  { %9085 = vmatpush3.bf16.msra.mxu1 %v9264_v49  ;;  %9064 = vmatprep.subr.bf16.mxu0 %v9265_v3 }
 0x470   :  { %9086 = vmatprep.subr.bf16.mxu1 %v9266_v55 }
 0x472   :  { %9065 = vmatpush3.bf16.msra.mxu0 %v9267_v50 }
 0x473   :  { %9087 = vmatpush3.bf16.msra.mxu1 %v9268_v51  ;;  %9066 = vmatprep.subr.bf16.mxu0 %v9269_v52 }
 0x474   :  { %9088 = vmatprep.subr.bf16.mxu1 %v9270_v54 }
 0x476   :  { %9067 = vmatpush3.bf16.msra.mxu0 %v9271_v9 }
 0x477   :  { %9089 = vmatpush3.bf16.msra.mxu1 %v9272_v13  ;;  %9068 = vmatprep.subr.bf16.mxu0 %v9273_v56 }
 0x478   :  { %9090 = vmatprep.subr.bf16.mxu1 %v9274_v58 }
 0x47a   :  { %9069 = vmatpush3.bf16.msra.mxu0 %v9275_v62 }
 0x47b   :  { %9091 = vmatpush3.bf16.msra.mxu1 %v9276_v20  ;;  %9070 = vmatprep.subr.bf16.mxu0 %v9277_v59 }
 0x47c   :  { %9092 = vmatprep.subr.bf16.mxu1 %v9278_v61 }
 0x47e   :  { %9071 = vmatpush3.bf16.msra.mxu0 %v9279_v63 }
 0x47f   :  { %9093 = vmatpush3.bf16.msra.mxu1 %v9280_v2  ;;  %9072 = vmatprep.subr.bf16.mxu0 %v9281_v60 }
 0x480   :  { %9094 = vmatprep.subr.bf16.mxu1 %v9282_v24 }
 0x482   :  { %9073 = vmatpush3.bf16.msra.mxu0 %v9283_v26 }
 0x483   :  { %9095 = vmatpush3.bf16.msra.mxu1 %v9284_v5  ;;  %9074 = vmatprep.subr.bf16.mxu0 %v9285_v6 }
 0x484   :  { %9096 = vmatprep.subr.bf16.mxu1 %v9286_v8 }
 0x486   :  { %9075 = vmatpush3.bf16.msra.mxu0 %v9287_v10 }
 0x487   :  { %9097 = vmatpush3.bf16.msra.mxu1 %v9288_v11  ;;  %9076 = vmatprep.subr.bf16.mxu0 %v9289_v57 }
 0x488   :  { %9098 = vmatprep.subr.bf16.mxu1 %v9290_v4 }
 0x48a   :  { %9077 = vmatpush3.bf16.msra.mxu0 %v9291_v14 }
 0x48b   :  { %9099 = vmatpush3.bf16.msra.mxu1 %v9292_v16 }
 0x520   :  { %v7118_v22 = vpop.f32.mrb[12].mxu0 }
 0x521   :  { %v9118_v18 = vadd.f32 %v7118_v22, %v4052_v45  ;;  %v7282_v27 = vpop.f32.mrb[12].mxu1  ;;  %v7120_v25 = vpop.f32.mrb[13].mxu0 }
 0x522   :  { %v9120_v23 = vadd.f32 %v7282_v27, %v4060_v12  ;;  %v9119_v28 = vadd.f32 %v7120_v25, %v4056_v37  ;;  %v7284_v1 = vpop.f32.mrb[13].mxu1  ;;  %v7122_v32 = vpop.f32.mrb[14].mxu0 }
 0x523   :  { %v7293_v29 = vmax.f32 %v9118_v18, 0.0  ;;  %v9121_v30 = vadd.f32 %v7284_v1, %v4064_v21  ;;  %v7286_v31 = vpop.f32.mrb[14].mxu1  ;;  %v7123_v7 = vpop.f32.mrb[15].mxu0 }
 0x524   :  { %v7295_v33 = vmax.f32 %v9120_v23, 0.0  ;;  %v7294_v36 = vmax.f32 %v9119_v28, 0.0  ;;  %v7287_v38 = vpop.f32.mrb[15].mxu1 }
 0x525   :  { %v7296_v34 = vmax.f32 %v9121_v30, 0.0  ;;  %v7301_v46 = vpack.c.bf16 %v7293_v29, %v7293_v29 }
 0x526   :  { %v7302_v39 = vpack.c.bf16 %v7294_v36, %v7294_v36  ;;  %v7303_v35 = vpack.c.bf16 %v7295_v33, %v7295_v33 }
 0x527   :  { %v7304_v15 = vpack.c.bf16 %v7296_v34, %v7296_v34 }
 0x528   :  { %7936 = vmatprep.mubr.bf16.mxu0 %v7302_v39 }
 0x529   :  { %7976 = vmatprep.mubr.bf16.mxu1 %v7304_v15  ;;  %7937 = vmatmul.mubr.bf16.vlgmr.msra.gmra.mrb[20].mxu0 %v7301_v46 }
 0x52a   :  { %7977 = vmatmul.mubr.bf16.vlgmr.msra.gmra.mrb[20].mxu1 %v7303_v35 }
 0x540   :  { %v9034_v40 = vpop.f32.mrb[16].mxu0 }
 0x541   :  { %v9056_v42 = vpop.f32.mrb[16].mxu1  ;;  %v9035_v44 = vpop.f32.mrb[17].mxu0 }
 0x542   :  { %v9036_v41 = vadd.f32 %v9035_v44, %v9034_v40  ;;  %v9057_v47 = vpop.f32.mrb[17].mxu1  ;;  %v9037_v48 = vpop.f32.mrb[18].mxu0 }
 0x543   :  { %v9058_v43 = vadd.f32 %v9057_v47, %v9056_v42  ;;  %v9059_v17 = vpop.f32.mrb[18].mxu1  ;;  %v9038_v0 = vpop.f32.mrb[19].mxu0 }
 0x544   :  { %v7859_v49 = vadd.f32 %v9036_v41, %v8953_v53  ;;  %v9060_v3 = vpop.f32.mrb[19].mxu1 }
 0x546   :  { %v7899_v19 = vadd.f32 %v9058_v43, %v7859_v49 }
 0x5fc   :  { %v9078_v55 = vpop.f32.mrb[20].mxu0 }
 0x5fd   :  { %v9100_v50 = vpop.f32.mrb[20].mxu1  ;;  %v9079_v51 = vpop.f32.mrb[21].mxu0 }
 0x5fe   :  { %v9080_v52 = vadd.f32 %v9079_v51, %v9078_v55  ;;  %v9101_v54 = vpop.f32.mrb[21].mxu1  ;;  %v9081_v9 = vpop.f32.mrb[22].mxu0 }
 0x5ff   :  { %v9102_v13 = vadd.f32 %v9101_v54, %v9100_v50  ;;  %v9103_v56 = vpop.f32.mrb[22].mxu1  ;;  %v9082_v58 = vpop.f32.mrb[23].mxu0 }
 0x600   :  { %v7939_v62 = vadd.f32 %v9080_v52, %v7899_v19  ;;  %v9104_v20 = vpop.f32.mrb[23].mxu1 }
 0x602   :  { %v7979_v59 = vadd.f32 %v9102_v13, %v7939_v62 }
 0x604   :  { %7984 = vst [vmem:[%s9770_s7] sm:$0xff] %v7979_v59 }
 0x605   :  { %7989 = vsyncpa [#allocation3], 1 }
 0x606   :  { %7990 = vsyncpa [#allocation5], 1 }
 0x607   :  { %7991 = vsyncpa [#allocation8], 1 }
 0x608   :  { %7992 = vsyncpa [#allocation11], 1 }

</bundles_post_ra>
